<compile_context>
chip_gen: v7x
topology: tpu7x:2x2x1
jax: 0.10.0
libtpu: 0.0.40
codegen_flags: <defaults>
</compile_context>

<pallas_src>
import jax
import jax.numpy as jnp
from jax.experimental import pallas as pl
from jax.experimental.pallas import tpu as pltpu


_LANE = 128     # channel axes are padded per layer to a multiple of the lane width
_SUBLANE = 8    # f32 sublane tile: time rows / offsets are kept multiples of this


def _round_up(n, m):
    return (n + m - 1) // m * m


def _make_postnet_kernel(L, K, T, T_pad, pad, front, cin_pads, cout_pads, compute_dtype):
    """Builds the fused 5-layer conv+BN(+tanh) kernel body (statically unrolled)."""

    def kernel(*refs):
        x_ref = refs[0]                      # (1, T_pad, cin_pads[0])  f32, channel-last
        w_refs = refs[1:1 + L]               # (K*cin_pads[l], cout_pads[l])  bf16
        aff_refs = refs[1 + L:1 + 2 * L]     # (2, cout_pads[l]) f32: row0=scale, row1=shift
        out_ref = refs[1 + 2 * L]            # (1, T_pad, cout_pads[-1])  f32
        buf_ref = refs[2 + 2 * L]            # (front + T_pad + 8, max(cin_pads)) f32 scratch

        # Zero once per grid step; the time-pad rows are never rewritten afterwards,
        # so they provide SAME (zero) padding for every layer.
        buf_ref[...] = jnp.zeros_like(buf_ref)
        buf_ref[front:front + T_pad, :cin_pads[0]] = x_ref[0, :, :]

        for l in range(L):                   # statically unrolled over the 5 layers
            cin, cout = cin_pads[l], cout_pads[l]
            # im2col: K shifted, lane-aligned reads fused into one (T_pad, K*cin) slab
            # -> a single MXU matmul per layer (no per-tap f32 VPU adds).
            taps = [buf_ref[front - pad + k:front - pad + k + T_pad, :cin]
                    for k in range(K)]
            lhs = jnp.concatenate(taps, axis=-1).astype(compute_dtype)
            acc = jnp.dot(lhs, w_refs[l][...], preferred_element_type=jnp.float32)
            # Conv1d bias + BatchNorm1d(eval) folded into one per-channel affine (f32).
            y = acc * aff_refs[l][0:1, :] + aff_refs[l][1:2, :]
            if l < L - 1:
                a = jnp.tanh(y)              # dropout(0.5, training=False) == identity
                if T_pad != T:
                    # Keep rows beyond the real sequence length exactly zero so they
                    # keep acting as SAME padding for the next layer.
                    row = jax.lax.broadcasted_iota(jnp.int32, (T_pad, cout), 0)
                    a = jnp.where(row < T, a, 0.0)
                # front % 8 == 0 -> sublane-aligned, full-lane store.
                buf_ref[front:front + T_pad, :cout] = a
            else:
                # forward() returns the LAST layer's pre-tanh (post-BN) output.
                out_ref[0, :, :] = y.astype(out_ref.dtype)
        # TODO(synk): training-mode dropout (p=0.5) would need pltpu.prng_seed /
        # pltpu.prng_random_bits; this kernel implements eval-mode semantics.

    return kernel


def _postnet_infer(x, conv_weights, conv_biases, bn_gammas, bn_betas, bn_means, bn_vars,
                   eps=1e-5, compute_dtype=jnp.bfloat16):
    """Postnet.forward in eval mode.  x: (B, n_acoustic_feat_dims, T) f32 (PyTorch layout)."""
    B, n_feat, T = x.shape
    L = len(conv_weights)
    K = conv_weights[0].shape[-1]
    pad = (K - 1) // 2

    # ---- fold conv bias + BN(eval) into a per-channel affine; pad channels per layer ----
    w_packed, affines, cin_pads, cout_pads = [], [], [], []
    for l in range(L):
        W = conv_weights[l]                              # (C_out, C_in, K)  nn.Conv1d layout
        C_out, C_in, _ = W.shape
        cin_p, cout_p = _round_up(C_in, _LANE), _round_up(C_out, _LANE)
        w = jnp.transpose(W, (2, 1, 0))                  # (K, C_in, C_out)
        w = jnp.pad(w, ((0, 0), (0, cin_p - C_in), (0, cout_p - C_out)))
        w_packed.append(w.reshape(K * cin_p, cout_p).astype(compute_dtype))
        sc = bn_gammas[l] / jnp.sqrt(bn_vars[l] + eps)
        sh = bn_betas[l] + sc * (conv_biases[l] - bn_means[l])
        aff = jnp.zeros((2, cout_p), jnp.float32)
        aff = aff.at[0, :C_out].set(sc).at[1, :C_out].set(sh)
        affines.append(aff)
        cin_pads.append(cin_p)
        cout_pads.append(cout_p)

    T_pad = _round_up(T, _SUBLANE)
    front = _SUBLANE                       # >= pad and a full sublane tile
    buf_rows = front + T_pad + _SUBLANE    # back slack >= pad, total rows stay a multiple of 8
    c0, cL = cin_pads[0], cout_pads[-1]

    # (B, C, T) -> channel-last (B, T, C), zero-padded to lane-dense widths.
    x_tc = jnp.transpose(x, (0, 2, 1))
    x_tc = jnp.pad(x_tc, ((0, 0), (0, T_pad - T), (0, c0 - n_feat)))

    kernel = _make_postnet_kernel(L, K, T, T_pad, pad, front,
                                  tuple(cin_pads), tuple(cout_pads), compute_dtype)

    in_specs = [pl.BlockSpec((1, T_pad, c0), lambda b: (b, 0, 0))]
    # Weights / affines are grid-invariant (constant index_map).
    # TODO(synk): at production widths on v7x (64 MiB VMEM), pass the weights with
    # pipeline_mode=pl.Buffered(1) or memory_space=pl.ANY + a one-time VMEM copy so they
    # are not double-buffered.
    in_specs += [pl.BlockSpec(w.shape, lambda b: (0, 0)) for w in w_packed]
    in_specs += [pl.BlockSpec(a.shape, lambda b: (0, 0)) for a in affines]

    out_tc = pl.pallas_call(
        kernel,
        out_shape=jax.ShapeDtypeStruct((B, T_pad, cL), jnp.float32),
        grid=(B,),
        in_specs=in_specs,
        out_specs=pl.BlockSpec((1, T_pad, cL), lambda b: (b, 0, 0)),
        scratch_shapes=[pltpu.VMEM((buf_rows, max(cin_pads)), jnp.float32)],
        compiler_params=pltpu.CompilerParams(dimension_semantics=("parallel",)),
    )(x_tc, *w_packed, *affines)
    # TODO(synk): for production T, tile the time axis as a second grid dimension with a
    # (K-1)-row halo so HBM traffic overlaps compute instead of one monolithic T block.

    # Drop channel/time padding, back to PyTorch (B, C, T) layout.
    return jnp.transpose(out_tc[:, :T, :n_feat], (0, 2, 1))


# The wrapper (param folding, layout transpose/pad, kernel, unpad) compiles to one XLA
# program; at real sizes the parameter packing would be done once, not per call.
postnet_infer = jax.jit(_postnet_infer, static_argnames=("eps", "compute_dtype"))


if __name__ == "__main__":
    # Small hparams consistent with the module: 5 convs, kernel size 5.
    # n_feat and emb deliberately round to DIFFERENT lane widths (16->128, 160->256) so
    # the ragged per-layer padding path is exercised.
    B, T = 2, 16
    n_feat, emb, K, L = 16, 160, 5, 5
    eps = 1e-5

    key0 = jax.random.PRNGKey(0)
    keys = jax.random.split(key0, 1 + 6 * L)
    x = jax.random.normal(keys[0], (B, n_feat, T), jnp.float32)

    dims = [(n_feat, emb)] + [(emb, emb)] * (L - 2) + [(emb, n_feat)]
    conv_w, conv_b, gammas, betas, means, variances = [], [], [], [], [], []
    ki = 1
    for (ci, co) in dims:
        std = (ci * K) ** -0.5                      # Xavier-ish, keeps activations O(1)
        conv_w.append(std * jax.random.normal(keys[ki], (co, ci, K), jnp.float32)); ki += 1
        conv_b.append(0.1 * jax.random.normal(keys[ki], (co,), jnp.float32)); ki += 1
        gammas.append(1.0 + 0.1 * jax.random.normal(keys[ki], (co,), jnp.float32)); ki += 1
        betas.append(0.1 * jax.random.normal(keys[ki], (co,), jnp.float32)); ki += 1
        means.append(0.1 * jax.random.normal(keys[ki], (co,), jnp.float32)); ki += 1
        variances.append(1.0 + 0.2 * jax.random.uniform(keys[ki], (co,), jnp.float32)); ki += 1

    out = postnet_infer(x, conv_w, conv_b, gammas, betas, means, variances, eps=eps)
    out = jax.block_until_ready(out)

    # Pure-JAX f32 (HIGHEST precision) reference of Postnet.forward in eval mode.
    cur = x
    x1 = cur
    for l in range(L):
        y = jax.lax.conv_general_dilated(
            cur, conv_w[l], window_strides=(1,), padding=[(K // 2, K // 2)],
            dimension_numbers=("NCH", "OIH", "NCH"),
            precision=jax.lax.Precision.HIGHEST)
        y = y + conv_b[l][None, :, None]
        y = (gammas[l][None, :, None] * (y - means[l][None, :, None])
             / jnp.sqrt(variances[l][None, :, None] + eps) + betas[l][None, :, None])
        x1 = y
        cur = jnp.tanh(x1)
    ref = x1  # final forward() result: dropout(x1) == x1 in eval mode

    assert out.shape == (B, n_feat, T)
    # The kernel uses bf16 matmul operands (f32 accumulation) per the TPU MXU guidance,
    # so compare against the full-f32 reference at bf16-class tolerance.
    err = float(jnp.max(jnp.abs(out - ref)))
    tol = 5e-2 * max(1.0, float(jnp.max(jnp.abs(ref))))
    assert err <= tol, (err, tol)
    print("KERNEL_OK")
</pallas_src>

<mosaic_0001>
module attributes {stable_mosaic.version = 11 : i64} {
  func.func @kernel(%arg0: i32, %arg1: memref<1x16x128xf32, #tpu.memory_space<vmem>>, %arg2: memref<640x256xbf16, #tpu.memory_space<vmem>>, %arg3: memref<1280x256xbf16, #tpu.memory_space<vmem>>, %arg4: memref<1280x256xbf16, #tpu.memory_space<vmem>>, %arg5: memref<1280x256xbf16, #tpu.memory_space<vmem>>, %arg6: memref<1280x128xbf16, #tpu.memory_space<vmem>>, %arg7: memref<2x256xf32, #tpu.memory_space<vmem>>, %arg8: memref<2x256xf32, #tpu.memory_space<vmem>>, %arg9: memref<2x256xf32, #tpu.memory_space<vmem>>, %arg10: memref<2x256xf32, #tpu.memory_space<vmem>>, %arg11: memref<2x128xf32, #tpu.memory_space<vmem>>, %arg12: memref<1x16x128xf32, #tpu.memory_space<vmem>>, %arg13: memref<32x256xf32, #tpu.memory_space<vmem>>) attributes {dimension_semantics = [#tpu.dimension_semantics<parallel>], iteration_bounds = array<i64: 2>, scalar_prefetch = 0 : i64, scratch_operands = 1 : i64, tpu.core_type = #tpu.core_type<tc>, window_params = [{transform_indices = @transform_0, window_bounds = array<i64: 1, 16, 128>}, {pipeline_mode = #tpu.pipeline_mode<synchronous>, transform_indices = @transform_1, window_bounds = array<i64: 640, 256>}, {pipeline_mode = #tpu.pipeline_mode<synchronous>, transform_indices = @transform_2, window_bounds = array<i64: 1280, 256>}, {pipeline_mode = #tpu.pipeline_mode<synchronous>, transform_indices = @transform_3, window_bounds = array<i64: 1280, 256>}, {pipeline_mode = #tpu.pipeline_mode<synchronous>, transform_indices = @transform_4, window_bounds = array<i64: 1280, 256>}, {pipeline_mode = #tpu.pipeline_mode<synchronous>, transform_indices = @transform_5, window_bounds = array<i64: 1280, 128>}, {pipeline_mode = #tpu.pipeline_mode<synchronous>, transform_indices = @transform_6, window_bounds = array<i64: 2, 256>}, {pipeline_mode = #tpu.pipeline_mode<synchronous>, transform_indices = @transform_7, window_bounds = array<i64: 2, 256>}, {pipeline_mode = #tpu.pipeline_mode<synchronous>, transform_indices = @transform_8, window_bounds = array<i64: 2, 256>}, {pipeline_mode = #tpu.pipeline_mode<synchronous>, transform_indices = @transform_9, window_bounds = array<i64: 2, 256>}, {pipeline_mode = #tpu.pipeline_mode<synchronous>, transform_indices = @transform_10, window_bounds = array<i64: 2, 128>}, {transform_indices = @transform_11, window_bounds = array<i64: 1, 16, 128>}]} {
    %cst = arith.constant 0.000000e+00 : f32
    %0 = vector.broadcast %cst : f32 to vector<32x256xf32>
    %c0 = arith.constant 0 : index
    %c0_0 = arith.constant 0 : index
    %1 = vector.load %arg13[%c0, %c0_0] : memref<32x256xf32, #tpu.memory_space<vmem>>, vector<32x256xf32>
    tpu.vector_store %arg13[%c0, %c0_0], %0 {strides = array<i32>} : memref<32x256xf32, #tpu.memory_space<vmem>>, vector<32x256xf32>,
    %c0_1 = arith.constant 0 : index
    %c0_2 = arith.constant 0 : index
    %c0_3 = arith.constant 0 : index
    %2 = vector.load %arg1[%c0_1, %c0_2, %c0_3] : memref<1x16x128xf32, #tpu.memory_space<vmem>>, vector<1x16x128xf32>
    %3 = vector.shape_cast %2 : vector<1x16x128xf32> to vector<16x128xf32>
    %c8 = arith.constant 8 : index
    %c0_4 = arith.constant 0 : index
    %4 = vector.load %arg13[%c8, %c0_4] : memref<32x256xf32, #tpu.memory_space<vmem>>, vector<16x128xf32>
    tpu.vector_store %arg13[%c8, %c0_4], %3 {strides = array<i32>} : memref<32x256xf32, #tpu.memory_space<vmem>>, vector<16x128xf32>,
    %c6 = arith.constant 6 : index
    %c0_5 = arith.constant 0 : index
    %5 = vector.load %arg13[%c6, %c0_5] : memref<32x256xf32, #tpu.memory_space<vmem>>, vector<16x128xf32>
    %c7 = arith.constant 7 : index
    %c0_6 = arith.constant 0 : index
    %6 = vector.load %arg13[%c7, %c0_6] : memref<32x256xf32, #tpu.memory_space<vmem>>, vector<16x128xf32>
    %c8_7 = arith.constant 8 : index
    %c0_8 = arith.constant 0 : index
    %7 = vector.load %arg13[%c8_7, %c0_8] : memref<32x256xf32, #tpu.memory_space<vmem>>, vector<16x128xf32>
    %c9 = arith.constant 9 : index
    %c0_9 = arith.constant 0 : index
    %8 = vector.load %arg13[%c9, %c0_9] : memref<32x256xf32, #tpu.memory_space<vmem>>, vector<16x128xf32>
    %c10 = arith.constant 10 : index
    %c0_10 = arith.constant 0 : index
    %9 = vector.load %arg13[%c10, %c0_10] : memref<32x256xf32, #tpu.memory_space<vmem>>, vector<16x128xf32>
    %10 = tpu.concatenate %5, %6, %7, %8, %9 in 1 : vector<16x128xf32>, vector<16x128xf32>, vector<16x128xf32>, vector<16x128xf32>, vector<16x128xf32> -> vector<16x640xf32>
    %11 = arith.truncf %10 : vector<16x640xf32> to vector<16x640xbf16>
    %c0_11 = arith.constant 0 : index
    %c0_12 = arith.constant 0 : index
    %12 = vector.load %arg2[%c0_11, %c0_12] : memref<640x256xbf16, #tpu.memory_space<vmem>>, vector<640x256xbf16>
    %cst_13 = arith.constant dense<0.000000e+00> : vector<16x256xf32>
    %13 = tpu.matmul %11, %12, %cst_13 {dimension_numbers = #tpu.dot_dimension_numbers<[1], [0], [0], [1], [0, 0, 1, 1], [], []>} : vector<16x640xbf16>, vector<640x256xbf16>, vector<16x256xf32> -> vector<16x256xf32>
    %c0_14 = arith.constant 0 : index
    %c0_15 = arith.constant 0 : index
    %14 = vector.load %arg7[%c0_14, %c0_15] : memref<2x256xf32, #tpu.memory_space<vmem>>, vector<1x256xf32>
    %15 = vector.broadcast %14 : vector<1x256xf32> to vector<16x256xf32>
    %16 = arith.mulf %13, %15 : vector<16x256xf32>
    %c1 = arith.constant 1 : index
    %c0_16 = arith.constant 0 : index
    %17 = vector.load %arg7[%c1, %c0_16] : memref<2x256xf32, #tpu.memory_space<vmem>>, vector<1x256xf32>
    %18 = vector.broadcast %17 : vector<1x256xf32> to vector<16x256xf32>
    %19 = arith.addf %16, %18 : vector<16x256xf32>
    %20 = math.tanh %19 : vector<16x256xf32>
    %c8_17 = arith.constant 8 : index
    %c0_18 = arith.constant 0 : index
    %21 = vector.load %arg13[%c8_17, %c0_18] : memref<32x256xf32, #tpu.memory_space<vmem>>, vector<16x256xf32>
    tpu.vector_store %arg13[%c8_17, %c0_18], %20 {strides = array<i32>} : memref<32x256xf32, #tpu.memory_space<vmem>>, vector<16x256xf32>,
    %c6_19 = arith.constant 6 : index
    %c0_20 = arith.constant 0 : index
    %22 = vector.load %arg13[%c6_19, %c0_20] : memref<32x256xf32, #tpu.memory_space<vmem>>, vector<16x256xf32>
    %c7_21 = arith.constant 7 : index
    %c0_22 = arith.constant 0 : index
    %23 = vector.load %arg13[%c7_21, %c0_22] : memref<32x256xf32, #tpu.memory_space<vmem>>, vector<16x256xf32>
    %c8_23 = arith.constant 8 : index
    %c0_24 = arith.constant 0 : index
    %24 = vector.load %arg13[%c8_23, %c0_24] : memref<32x256xf32, #tpu.memory_space<vmem>>, vector<16x256xf32>
    %c9_25 = arith.constant 9 : index
    %c0_26 = arith.constant 0 : index
    %25 = vector.load %arg13[%c9_25, %c0_26] : memref<32x256xf32, #tpu.memory_space<vmem>>, vector<16x256xf32>
    %c10_27 = arith.constant 10 : index
    %c0_28 = arith.constant 0 : index
    %26 = vector.load %arg13[%c10_27, %c0_28] : memref<32x256xf32, #tpu.memory_space<vmem>>, vector<16x256xf32>
    %27 = tpu.concatenate %22, %23, %24, %25, %26 in 1 : vector<16x256xf32>, vector<16x256xf32>, vector<16x256xf32>, vector<16x256xf32>, vector<16x256xf32> -> vector<16x1280xf32>
    %28 = arith.truncf %27 : vector<16x1280xf32> to vector<16x1280xbf16>
    %c0_29 = arith.constant 0 : index
    %c0_30 = arith.constant 0 : index
    %29 = vector.load %arg3[%c0_29, %c0_30] : memref<1280x256xbf16, #tpu.memory_space<vmem>>, vector<1280x256xbf16>
    %cst_31 = arith.constant dense<0.000000e+00> : vector<16x256xf32>
    %30 = tpu.matmul %28, %29, %cst_31 {dimension_numbers = #tpu.dot_dimension_numbers<[1], [0], [0], [1], [0, 0, 1, 1], [], []>} : vector<16x1280xbf16>, vector<1280x256xbf16>, vector<16x256xf32> -> vector<16x256xf32>
    %c0_32 = arith.constant 0 : index
    %c0_33 = arith.constant 0 : index
    %31 = vector.load %arg8[%c0_32, %c0_33] : memref<2x256xf32, #tpu.memory_space<vmem>>, vector<1x256xf32>
    %32 = vector.broadcast %31 : vector<1x256xf32> to vector<16x256xf32>
    %33 = arith.mulf %30, %32 : vector<16x256xf32>
    %c1_34 = arith.constant 1 : index
    %c0_35 = arith.constant 0 : index
    %34 = vector.load %arg8[%c1_34, %c0_35] : memref<2x256xf32, #tpu.memory_space<vmem>>, vector<1x256xf32>
    %35 = vector.broadcast %34 : vector<1x256xf32> to vector<16x256xf32>
    %36 = arith.addf %33, %35 : vector<16x256xf32>
    %37 = math.tanh %36 : vector<16x256xf32>
    %c8_36 = arith.constant 8 : index
    %c0_37 = arith.constant 0 : index
    %38 = vector.load %arg13[%c8_36, %c0_37] : memref<32x256xf32, #tpu.memory_space<vmem>>, vector<16x256xf32>
    tpu.vector_store %arg13[%c8_36, %c0_37], %37 {strides = array<i32>} : memref<32x256xf32, #tpu.memory_space<vmem>>, vector<16x256xf32>,
    %c6_38 = arith.constant 6 : index
    %c0_39 = arith.constant 0 : index
    %39 = vector.load %arg13[%c6_38, %c0_39] : memref<32x256xf32, #tpu.memory_space<vmem>>, vector<16x256xf32>
    %c7_40 = arith.constant 7 : index
    %c0_41 = arith.constant 0 : index
    %40 = vector.load %arg13[%c7_40, %c0_41] : memref<32x256xf32, #tpu.memory_space<vmem>>, vector<16x256xf32>
    %c8_42 = arith.constant 8 : index
    %c0_43 = arith.constant 0 : index
    %41 = vector.load %arg13[%c8_42, %c0_43] : memref<32x256xf32, #tpu.memory_space<vmem>>, vector<16x256xf32>
    %c9_44 = arith.constant 9 : index
    %c0_45 = arith.constant 0 : index
    %42 = vector.load %arg13[%c9_44, %c0_45] : memref<32x256xf32, #tpu.memory_space<vmem>>, vector<16x256xf32>
    %c10_46 = arith.constant 10 : index
    %c0_47 = arith.constant 0 : index
    %43 = vector.load %arg13[%c10_46, %c0_47] : memref<32x256xf32, #tpu.memory_space<vmem>>, vector<16x256xf32>
    %44 = tpu.concatenate %39, %40, %41, %42, %43 in 1 : vector<16x256xf32>, vector<16x256xf32>, vector<16x256xf32>, vector<16x256xf32>, vector<16x256xf32> -> vector<16x1280xf32>
    %45 = arith.truncf %44 : vector<16x1280xf32> to vector<16x1280xbf16>
    %c0_48 = arith.constant 0 : index
    %c0_49 = arith.constant 0 : index
    %46 = vector.load %arg4[%c0_48, %c0_49] : memref<1280x256xbf16, #tpu.memory_space<vmem>>, vector<1280x256xbf16>
    %cst_50 = arith.constant dense<0.000000e+00> : vector<16x256xf32>
    %47 = tpu.matmul %45, %46, %cst_50 {dimension_numbers = #tpu.dot_dimension_numbers<[1], [0], [0], [1], [0, 0, 1, 1], [], []>} : vector<16x1280xbf16>, vector<1280x256xbf16>, vector<16x256xf32> -> vector<16x256xf32>
    %c0_51 = arith.constant 0 : index
    %c0_52 = arith.constant 0 : index
    %48 = vector.load %arg9[%c0_51, %c0_52] : memref<2x256xf32, #tpu.memory_space<vmem>>, vector<1x256xf32>
    %49 = vector.broadcast %48 : vector<1x256xf32> to vector<16x256xf32>
    %50 = arith.mulf %47, %49 : vector<16x256xf32>
    %c1_53 = arith.constant 1 : index
    %c0_54 = arith.constant 0 : index
    %51 = vector.load %arg9[%c1_53, %c0_54] : memref<2x256xf32, #tpu.memory_space<vmem>>, vector<1x256xf32>
    %52 = vector.broadcast %51 : vector<1x256xf32> to vector<16x256xf32>
    %53 = arith.addf %50, %52 : vector<16x256xf32>
    %54 = math.tanh %53 : vector<16x256xf32>
    %c8_55 = arith.constant 8 : index
    %c0_56 = arith.constant 0 : index
    %55 = vector.load %arg13[%c8_55, %c0_56] : memref<32x256xf32, #tpu.memory_space<vmem>>, vector<16x256xf32>
    tpu.vector_store %arg13[%c8_55, %c0_56], %54 {strides = array<i32>} : memref<32x256xf32, #tpu.memory_space<vmem>>, vector<16x256xf32>,
    %c6_57 = arith.constant 6 : index
    %c0_58 = arith.constant 0 : index
    %56 = vector.load %arg13[%c6_57, %c0_58] : memref<32x256xf32, #tpu.memory_space<vmem>>, vector<16x256xf32>
    %c7_59 = arith.constant 7 : index
    %c0_60 = arith.constant 0 : index
    %57 = vector.load %arg13[%c7_59, %c0_60] : memref<32x256xf32, #tpu.memory_space<vmem>>, vector<16x256xf32>
    %c8_61 = arith.constant 8 : index
    %c0_62 = arith.constant 0 : index
    %58 = vector.load %arg13[%c8_61, %c0_62] : memref<32x256xf32, #tpu.memory_space<vmem>>, vector<16x256xf32>
    %c9_63 = arith.constant 9 : index
    %c0_64 = arith.constant 0 : index
    %59 = vector.load %arg13[%c9_63, %c0_64] : memref<32x256xf32, #tpu.memory_space<vmem>>, vector<16x256xf32>
    %c10_65 = arith.constant 10 : index
    %c0_66 = arith.constant 0 : index
    %60 = vector.load %arg13[%c10_65, %c0_66] : memref<32x256xf32, #tpu.memory_space<vmem>>, vector<16x256xf32>
    %61 = tpu.concatenate %56, %57, %58, %59, %60 in 1 : vector<16x256xf32>, vector<16x256xf32>, vector<16x256xf32>, vector<16x256xf32>, vector<16x256xf32> -> vector<16x1280xf32>
    %62 = arith.truncf %61 : vector<16x1280xf32> to vector<16x1280xbf16>
    %c0_67 = arith.constant 0 : index
    %c0_68 = arith.constant 0 : index
    %63 = vector.load %arg5[%c0_67, %c0_68] : memref<1280x256xbf16, #tpu.memory_space<vmem>>, vector<1280x256xbf16>
    %cst_69 = arith.constant dense<0.000000e+00> : vector<16x256xf32>
    %64 = tpu.matmul %62, %63, %cst_69 {dimension_numbers = #tpu.dot_dimension_numbers<[1], [0], [0], [1], [0, 0, 1, 1], [], []>} : vector<16x1280xbf16>, vector<1280x256xbf16>, vector<16x256xf32> -> vector<16x256xf32>
    %c0_70 = arith.constant 0 : index
    %c0_71 = arith.constant 0 : index
    %65 = vector.load %arg10[%c0_70, %c0_71] : memref<2x256xf32, #tpu.memory_space<vmem>>, vector<1x256xf32>
    %66 = vector.broadcast %65 : vector<1x256xf32> to vector<16x256xf32>
    %67 = arith.mulf %64, %66 : vector<16x256xf32>
    %c1_72 = arith.constant 1 : index
    %c0_73 = arith.constant 0 : index
    %68 = vector.load %arg10[%c1_72, %c0_73] : memref<2x256xf32, #tpu.memory_space<vmem>>, vector<1x256xf32>
    %69 = vector.broadcast %68 : vector<1x256xf32> to vector<16x256xf32>
    %70 = arith.addf %67, %69 : vector<16x256xf32>
    %71 = math.tanh %70 : vector<16x256xf32>
    %c8_74 = arith.constant 8 : index
    %c0_75 = arith.constant 0 : index
    %72 = vector.load %arg13[%c8_74, %c0_75] : memref<32x256xf32, #tpu.memory_space<vmem>>, vector<16x256xf32>
    tpu.vector_store %arg13[%c8_74, %c0_75], %71 {strides = array<i32>} : memref<32x256xf32, #tpu.memory_space<vmem>>, vector<16x256xf32>,
    %c6_76 = arith.constant 6 : index
    %c0_77 = arith.constant 0 : index
    %73 = vector.load %arg13[%c6_76, %c0_77] : memref<32x256xf32, #tpu.memory_space<vmem>>, vector<16x256xf32>
    %c7_78 = arith.constant 7 : index
    %c0_79 = arith.constant 0 : index
    %74 = vector.load %arg13[%c7_78, %c0_79] : memref<32x256xf32, #tpu.memory_space<vmem>>, vector<16x256xf32>
    %c8_80 = arith.constant 8 : index
    %c0_81 = arith.constant 0 : index
    %75 = vector.load %arg13[%c8_80, %c0_81] : memref<32x256xf32, #tpu.memory_space<vmem>>, vector<16x256xf32>
    %c9_82 = arith.constant 9 : index
    %c0_83 = arith.constant 0 : index
    %76 = vector.load %arg13[%c9_82, %c0_83] : memref<32x256xf32, #tpu.memory_space<vmem>>, vector<16x256xf32>
    %c10_84 = arith.constant 10 : index
    %c0_85 = arith.constant 0 : index
    %77 = vector.load %arg13[%c10_84, %c0_85] : memref<32x256xf32, #tpu.memory_space<vmem>>, vector<16x256xf32>
    %78 = tpu.concatenate %73, %74, %75, %76, %77 in 1 : vector<16x256xf32>, vector<16x256xf32>, vector<16x256xf32>, vector<16x256xf32>, vector<16x256xf32> -> vector<16x1280xf32>
    %79 = arith.truncf %78 : vector<16x1280xf32> to vector<16x1280xbf16>
    %c0_86 = arith.constant 0 : index
    %c0_87 = arith.constant 0 : index
    %80 = vector.load %arg6[%c0_86, %c0_87] : memref<1280x128xbf16, #tpu.memory_space<vmem>>, vector<1280x128xbf16>
    %cst_88 = arith.constant dense<0.000000e+00> : vector<16x128xf32>
    %81 = tpu.matmul %79, %80, %cst_88 {dimension_numbers = #tpu.dot_dimension_numbers<[1], [0], [0], [1], [0, 0, 1, 1], [], []>} : vector<16x1280xbf16>, vector<1280x128xbf16>, vector<16x128xf32> -> vector<16x128xf32>
    %c0_89 = arith.constant 0 : index
    %c0_90 = arith.constant 0 : index
    %82 = vector.load %arg11[%c0_89, %c0_90] : memref<2x128xf32, #tpu.memory_space<vmem>>, vector<1x128xf32>
    %83 = vector.broadcast %82 : vector<1x128xf32> to vector<16x128xf32>
    %84 = arith.mulf %81, %83 : vector<16x128xf32>
    %c1_91 = arith.constant 1 : index
    %c0_92 = arith.constant 0 : index
    %85 = vector.load %arg11[%c1_91, %c0_92] : memref<2x128xf32, #tpu.memory_space<vmem>>, vector<1x128xf32>
    %86 = vector.broadcast %85 : vector<1x128xf32> to vector<16x128xf32>
    %87 = arith.addf %84, %86 : vector<16x128xf32>
    %c0_93 = arith.constant 0 : index
    %c0_94 = arith.constant 0 : index
    %c0_95 = arith.constant 0 : index
    %88 = vector.load %arg12[%c0_93, %c0_94, %c0_95] : memref<1x16x128xf32, #tpu.memory_space<vmem>>, vector<1x16x128xf32>
    %89 = vector.shape_cast %88 : vector<1x16x128xf32> to vector<16x128xf32>
    %90 = vector.shape_cast %87 : vector<16x128xf32> to vector<1x16x128xf32>
    tpu.vector_store %arg12[%c0_93, %c0_94, %c0_95], %90 {strides = array<i32>} : memref<1x16x128xf32, #tpu.memory_space<vmem>>, vector<1x16x128xf32>,
    return
  }
  func.func @transform_0(%arg0: i32) -> (i32, i32, i32) {
    %c0_i32 = arith.constant 0 : i32
    %c0_i32_0 = arith.constant 0 : i32
    %c0_i32_1 = arith.constant 0 : i32
    return %arg0, %c0_i32, %c0_i32_0 : i32, i32, i32
  }
  func.func @transform_1(%arg0: i32) -> (i32, i32) {
    %c0_i32 = arith.constant 0 : i32
    %c0_i32_0 = arith.constant 0 : i32
    %c0_i32_1 = arith.constant 0 : i32
    return %c0_i32, %c0_i32_0 : i32, i32
  }
  func.func @transform_2(%arg0: i32) -> (i32, i32) {
    %c0_i32 = arith.constant 0 : i32
    %c0_i32_0 = arith.constant 0 : i32
    %c0_i32_1 = arith.constant 0 : i32
    return %c0_i32, %c0_i32_0 : i32, i32
  }
  func.func @transform_3(%arg0: i32) -> (i32, i32) {
    %c0_i32 = arith.constant 0 : i32
    %c0_i32_0 = arith.constant 0 : i32
    %c0_i32_1 = arith.constant 0 : i32
    return %c0_i32, %c0_i32_0 : i32, i32
  }
  func.func @transform_4(%arg0: i32) -> (i32, i32) {
    %c0_i32 = arith.constant 0 : i32
    %c0_i32_0 = arith.constant 0 : i32
    %c0_i32_1 = arith.constant 0 : i32
    return %c0_i32, %c0_i32_0 : i32, i32
  }
  func.func @transform_5(%arg0: i32) -> (i32, i32) {
    %c0_i32 = arith.constant 0 : i32
    %c0_i32_0 = arith.constant 0 : i32
    %c0_i32_1 = arith.constant 0 : i32
    return %c0_i32, %c0_i32_0 : i32, i32
  }
  func.func @transform_6(%arg0: i32) -> (i32, i32) {
    %c0_i32 = arith.constant 0 : i32
    %c0_i32_0 = arith.constant 0 : i32
    %c0_i32_1 = arith.constant 0 : i32
    return %c0_i32, %c0_i32_0 : i32, i32
  }
  func.func @transform_7(%arg0: i32) -> (i32, i32) {
    %c0_i32 = arith.constant 0 : i32
    %c0_i32_0 = arith.constant 0 : i32
    %c0_i32_1 = arith.constant 0 : i32
    return %c0_i32, %c0_i32_0 : i32, i32
  }
  func.func @transform_8(%arg0: i32) -> (i32, i32) {
    %c0_i32 = arith.constant 0 : i32
    %c0_i32_0 = arith.constant 0 : i32
    %c0_i32_1 = arith.constant 0 : i32
    return %c0_i32, %c0_i32_0 : i32, i32
  }
  func.func @transform_9(%arg0: i32) -> (i32, i32) {
    %c0_i32 = arith.constant 0 : i32
    %c0_i32_0 = arith.constant 0 : i32
    %c0_i32_1 = arith.constant 0 : i32
    return %c0_i32, %c0_i32_0 : i32, i32
  }
  func.func @transform_10(%arg0: i32) -> (i32, i32) {
    %c0_i32 = arith.constant 0 : i32
    %c0_i32_0 = arith.constant 0 : i32
    %c0_i32_1 = arith.constant 0 : i32
    return %c0_i32, %c0_i32_0 : i32, i32
  }
  func.func @transform_11(%arg0: i32) -> (i32, i32, i32) {
    %c0_i32 = arith.constant 0 : i32
    %c0_i32_0 = arith.constant 0 : i32
    %c0_i32_1 = arith.constant 0 : i32
    return %arg0, %c0_i32, %c0_i32_0 : i32, i32, i32
  }
}

</mosaic_0001>

<bundles_post_ra>
// kernel: _postnet_infer.1
= control target key start
LH: loop header
LB: loop body
LE: loop exit
PB: predicated region body
PF: predicated region fallthrough
CT: control target
= control target key end

     0   :  { %s8284_s17 = smov 0   ;;  %s10497_s0 = inlined_call_operand.vmem [shape: f32[2,16,128], index: 0, kind: input, shape index: {}]   ;;  %s10498_s1 = inlined_call_operand.vmem [shape: bf16[640,256], index: 1, kind: input, shape index: {}]   ;;  %s10499_s2 = inlined_call_operand.vmem [shape: bf16[1280,256], index: 2, kind: input, shape index: {}]   ;;  %s10500_s3 = inlined_call_operand.vmem [shape: bf16[1280,256], index: 3, kind: input, shape index: {}]   ;;  %s10501_s4 = inlined_call_operand.vmem [shape: bf16[1280,256], index: 4, kind: input, shape index: {}]   ;;  %s10502_s5 = inlined_call_operand.vmem [shape: bf16[1280,128], index: 5, kind: input, shape index: {}]   ;;  %s10503_s6 = inlined_call_operand.vmem [shape: f32[2,256], index: 6, kind: input, shape index: {}]   ;;  %s10504_s7 = inlined_call_operand.vmem [shape: f32[2,256], index: 7, kind: input, shape index: {}]   ;;  %s10505_s8 = inlined_call_operand.vmem [shape: f32[2,256], index: 8, kind: input, shape index: {}]   ;;  %s10506_s9 = inlined_call_operand.vmem [shape: f32[2,256], index: 9, kind: input, shape index: {}]   ;;  %s10507_s10 = inlined_call_operand.vmem [shape: f32[2,128], index: 10, kind: input, shape index: {}]   ;;  %s10508_s11 = inlined_call_operand.vmem [shape: f32[2,16,128], index: 11, kind: output, shape index: {}]  }
   0x1 LB: > { %s6427_s18 = sadd.s32 4294967295, %s8220_s17   ;;  %p6431_p0 = scmp.ge.s32.totalorder %s8220_s17, 1  ;;  %s8220_s17 = sphi %s8284_s17, %s21_s17  }
   0x2   : > { %p337_p1 = scmp.lt.s32.totalorder %s8220_s17, 3 }
   0x4   : > { %p338_p2 = pnand %p6431_p0, %p337_p1 }
   0x5   : > { %v7262_v0 = vld [vmem:[%s10498_s1 + $0x4] ss:$8 sps:$4 sm:$0xff] (!%p338_p2)   ;;  %v7264_v1 = vld [vmem:[%s10498_s1] ss:$8 sps:$4 sm:$0xff] (!%p338_p2)   ;;  %v8222_v2 = vmov (!%p338_p2), 0.0   ;;  %p377_p3 = scmp.lt.s32.totalorder (!%p338_p2), %s6427_s18, 1 }
   0x6   : > { %341 = sbr.rel (%p338_p2) target bundleno = 2262 (0x8d6), region = 64  ;;  %388 = vst [vmem:[#allocation2] sm:$0xff] (!%p338_p2), %v8222_v2  ;;  %389 = vst [vmem:[#allocation2 + $0x8] sm:$0xff] (!%p338_p2), %v8222_v2  ;;  %973 = vmatprep.subr.bf16.mxu0 (!%p338_p2), %v7262_v0  ;;  %v7265_v3 = vld [vmem:[%s10498_s1 + $0x14] ss:$8 sps:$4 sm:$0xff] (!%p338_p2)   ;;  %vm423_vm0 = vcmask (!%p338_p2), 1045504  }
   0x7   : > { %394 = vst [vmem:[#allocation2 + $0x30] sm:$0xff] (!%p338_p2), %v8222_v2  ;;  %395 = vst [vmem:[#allocation2 + $0x38] sm:$0xff] (!%p338_p2), %v8222_v2  ;;  %974 = vmatpush1.bf16.msra.mxu0 (!%p338_p2), %v7264_v1  ;;  %v7267_v4 = vld [vmem:[%s10498_s1 + $0x10] ss:$8 sps:$4 sm:$0xff] (!%p338_p2)   ;;  %v7268_v5 = vld [vmem:[%s10498_s1 + $0x24] ss:$8 sps:$4 sm:$0xff] (!%p338_p2)  }
   0x8   : > { %975 = vmatprep.subr.bf16.mxu0 (!%p338_p2), %v7265_v3  ;;  %v7270_v6 = vld [vmem:[%s10498_s1 + $0x20] ss:$8 sps:$4 sm:$0xff] (!%p338_p2)   ;;  %v7271_v7 = vld [vmem:[%s10498_s1 + $0x34] ss:$8 sps:$4 sm:$0xff] (!%p338_p2)   ;;  %v7273_v8 = vld [vmem:[%s10498_s1 + $0x30] ss:$8 sps:$4 sm:$0xff] (!%p338_p2)  }
   0x9   : > { %v7274_v9 = vld [vmem:[%s10498_s1 + $0x44] ss:$8 sps:$4 sm:$0xff] (!%p338_p2)   ;;  %v7276_v10 = vld [vmem:[%s10498_s1 + $0x40] ss:$8 sps:$4 sm:$0xff] (!%p338_p2)   ;;  %v7277_v11 = vld [vmem:[%s10498_s1 + $0x54] ss:$8 sps:$4 sm:$0xff] (!%p338_p2)  }
   0xa   : > { %v7279_v12 = vld [vmem:[%s10498_s1 + $0x50] ss:$8 sps:$4 sm:$0xff] (!%p338_p2)   ;;  %v7280_v13 = vld [vmem:[%s10498_s1 + $0x64] ss:$8 sps:$4 sm:$0xff] (!%p338_p2)   ;;  %v7282_v16 = vld [vmem:[%s10498_s1 + $0x60] ss:$8 sps:$4 sm:$0xff] (!%p338_p2)  }
   0xb   : > { %976 = vmatpush1.bf16.msra.mxu0 (!%p338_p2), %v7267_v4  ;;  %v7283_v18 = vld [vmem:[%s10498_s1 + $0x74] ss:$8 sps:$4 sm:$0xff] (!%p338_p2)   ;;  %v7285_v23 = vld [vmem:[%s10498_s1 + $0x70] ss:$8 sps:$4 sm:$0xff] (!%p338_p2)   ;;  %vm413_vm1 = vcmask (!%p338_p2), 1046528   ;;  %vm432_vm2 = vcmask (!%p338_p2), 1044480  }
   0xc   : > { %977 = vmatprep.subr.bf16.mxu0 (!%p338_p2), %v7268_v5  ;;  %v7286_v26 = vld [vmem:[%s10498_s1 + $0x84] ss:$8 sps:$4 sm:$0xff] (!%p338_p2)   ;;  %v7288_v32 = vld [vmem:[%s10498_s1 + $0x80] ss:$8 sps:$4 sm:$0xff] (!%p338_p2)   ;;  %v7289_v34 = vld [vmem:[%s10498_s1 + $0x94] ss:$8 sps:$4 sm:$0xff] (!%p338_p2)  }
   0xd   : > { %s10510_s18 = smov (!%p377_p3, %s6427_s18), 1  ;;  %v403_v17 = vld [vmem:[#allocation2] sm:$0x80]  ;;  %v7291_v40 = vld [vmem:[%s10498_s1 + $0x90] ss:$8 sps:$4 sm:$0xff]   ;;  %vm443_vm3 = vcmask 1043456  }
   0xe   : > { %s7084_s22 = sshll.u32 %s10510_s18, 4  ;;  %v414_v21 = vrot.slane %v403_v17, 1  ;;  %v7292_v42 = vld [vmem:[%s10498_s1 + $0xa4] ss:$8 sps:$4 sm:$0xff]   ;;  %v7294_v44 = vld [vmem:[%s10498_s1 + $0xa0] ss:$8 sps:$4 sm:$0xff]  }
   0xf   : > { %978 = vmatpush1.bf16.msra.mxu0 %v7270_v6  ;;  %s381_s27 = scalar_lea.vmem %s10497_s0, %s7084_s22  ;;  %v7295_v45 = vld [vmem:[%s10498_s1 + $0xb4] ss:$8 sps:$4 sm:$0xff]   ;;  %v7297_v46 = vld [vmem:[%s10498_s1 + $0xb0] ss:$8 sps:$4 sm:$0xff]   ;;  %v7298_v47 = vld [vmem:[%s10498_s1 + $0xc4] ss:$8 sps:$4 sm:$0xff]   ;;  %s386_s28 = scalar_lea.vmem %s10508_s11, %s7084_s22 }
  0x10   : > { %979 = vmatprep.subr.bf16.mxu0 %v7271_v7  ;;  %v8339_v14 = vld [vmem:[%s381_s27] sm:$0xff]  ;;  %v8341_v15 = vld [vmem:[%s381_s27 + $0x8] sm:$0xff]  ;;  %v407_v49 = vld [vmem:[#allocation2 + $0x30] sm:$0x1] }
  0x11   : > { %398 = vst [vmem:[#allocation2 + $0x10] sm:$0xff] %v8339_v14  ;;  %399 = vst [vmem:[#allocation2 + $0x20] sm:$0xff] %v8341_v15  ;;  %v424_v19 = vrot.slane %v8339_v14, 2  ;;  %v425_v20 = vrot.slane %v8341_v15, 2  ;;  %v415_v22 = vrot.slane %v8339_v14, 1  ;;  %v434_v53 = vrot.slane %v8341_v15, 3 }
  0x12   : > { %v7300_v50 = vld [vmem:[%s10498_s1 + $0xc0] ss:$8 sps:$4 sm:$0xff]   ;;  %v7301_v51 = vld [vmem:[%s10498_s1 + $0xd4] ss:$8 sps:$4 sm:$0xff]   ;;  %v436_v54 = vrot.slane %v407_v49, 3 }
  0x13   : > { %980 = vmatpush1.bf16.msra.mxu0 %v7273_v8  ;;  %v426_v24 = vsel %vm423_vm0, %v424_v19, %v425_v20  ;;  %v459_v25 = vpack.c.bf16 %v425_v20, %v425_v20  ;;  %v416_v29 = vsel %vm413_vm1, %v414_v21, %v415_v22  ;;  %v7303_v55 = vld [vmem:[%s10498_s1 + $0xd0] ss:$8 sps:$4 sm:$0xff]   ;;  %v7304_v56 = vld [vmem:[%s10498_s1 + $0xe4] ss:$8 sps:$4 sm:$0xff]   ;;  %v7306_v61 = vld [vmem:[%s10498_s1 + $0xe0] ss:$8 sps:$4 sm:$0xff]  }
  0x14   : > { %981 = vmatprep.subr.bf16.mxu0 %v7274_v9  ;;  %v454_v27 = vpack.c.bf16 %v426_v24, %v424_v19  ;;  %v400_v57 = vld [vmem:[#allocation2] sm:$0xc0]  ;;  %v437_v60 = vsel %vm432_vm2, %v434_v53, %v436_v54  ;;  %v7307_v0 = vld [vmem:[%s10498_s1 + $0xf4] ss:$8 sps:$4 sm:$0xff]   ;;  %v7309_v3 = vld [vmem:[%s10498_s1 + $0xf0] ss:$8 sps:$4 sm:$0xff]  }
  0x15   : > { %v560_v33 = vrot.slane %v459_v25, 3  ;;  %v452_v62 = vpack.c.bf16 %v8339_v14, %v400_v57  ;;  %v460_v2 = vpack.c.bf16 %v437_v60, %v437_v60  ;;  %v7382_v4 = vld [vmem:[%s10499_s2 + $0x4] ss:$8 sps:$4 sm:$0xff]   ;;  %v7384_v5 = vld [vmem:[%s10499_s2] ss:$8 sps:$4 sm:$0xff]  }
  0x16   : > { %v559_v31 = vrot.slane %v454_v27, 3  ;;  %v7385_v6 = vld [vmem:[%s10499_s2 + $0x14] ss:$8 sps:$4 sm:$0xff]   ;;  %v7312_v7 = vld [vmem:[%s10498_s1 + $0x104] ss:$8 sps:$4 sm:$0xff]   ;;  %2283 = vmatprep.subr.bf16.mxu1 %v7382_v4 }
  0x17   : > { %982 = vmatpush1.bf16.msra.mxu0 %v7276_v10  ;;  %v553_v8 = vrot.slane %v452_v62, 3  ;;  %2284 = vmatpush1.bf16.msra.mxu1 %v7384_v5  ;;  %v7310_v14 = vld [vmem:[%s10498_s1 + $0x100] ss:$8 sps:$4 sm:$0xff]   ;;  %v7315_v17 = vld [vmem:[%s10498_s1 + $0x114] ss:$8 sps:$4 sm:$0xff]  }
  0x18   : > { %983 = vmatprep.subr.bf16.mxu0 %v7277_v11  ;;  %v404_v28 = vld [vmem:[#allocation2 + $0x20] sm:$0x7f]  ;;  %v8370_v38 = vsel %vm432_vm2, %v559_v31, %v560_v33  ;;  %v406_v48 = vld [vmem:[#allocation2 + $0x10] sm:$0xfe]  ;;  %v563_v11 = vrot.slane %v460_v2, 3  ;;  %2285 = vmatprep.subr.bf16.mxu1 %v7385_v6 }
  0x19   : > { %v417_v30 = vrot.slane %v404_v28, 1  ;;  %v433_v52 = vrot.slane %v406_v48, 3  ;;  %v402_v58 = vld [vmem:[#allocation2 + $0x20] sm:$0x3f]  ;;  %v7313_v20 = vld [vmem:[%s10498_s1 + $0x110] ss:$8 sps:$4 sm:$0xff]  }
  0x1a   : > { %v457_v63 = vpack.c.bf16 %v402_v58, %v402_v58  ;;  %v7390_v19 = vld [vmem:[%s10499_s2 + $0x20] ss:$8 sps:$4 sm:$0xff]   ;;  %v7391_v21 = vld [vmem:[%s10499_s2 + $0x34] ss:$8 sps:$4 sm:$0xff]   ;;  %v7394_v24 = vld [vmem:[%s10499_s2 + $0x44] ss:$8 sps:$4 sm:$0xff]  }
  0x1b   : > { %984 = vmatpush1.bf16.msra.mxu0 %v7279_v12  ;;  %v418_v35 = vsel %vm413_vm1, %v415_v22, %v417_v30  ;;  %v458_v36 = vpack.c.bf16 %v417_v30, %v417_v30  ;;  %v435_v59 = vsel %vm432_vm2, %v433_v52, %v434_v53  ;;  %v7387_v12 = vld [vmem:[%s10499_s2 + $0x10] ss:$8 sps:$4 sm:$0xff]   ;;  %v7318_v22 = vld [vmem:[%s10498_s1 + $0x124] ss:$8 sps:$4 sm:$0xff]   ;;  %v7316_v25 = vld [vmem:[%s10498_s1 + $0x120] ss:$8 sps:$4 sm:$0xff]  }
  0x1c   : > { %985 = vmatprep.subr.bf16.mxu0 %v7280_v13  ;;  %v453_v37 = vpack.c.bf16 %v418_v35, %v416_v29  ;;  %v455_v1 = vpack.c.bf16 %v435_v59, %v433_v52  ;;  %v554_v9 = vrot.slane %v457_v63, 3  ;;  %v7388_v13 = vld [vmem:[%s10499_s2 + $0x24] ss:$8 sps:$4 sm:$0xff]   ;;  %2286 = vmatpush1.bf16.msra.mxu1 %v7387_v12  ;;  %v7396_v27 = vld [vmem:[%s10499_s2 + $0x40] ss:$8 sps:$4 sm:$0xff]  }
  0x1d   : > { %v557_v39 = vrot.slane %v458_v36, 3  ;;  %2287 = vmatprep.subr.bf16.mxu1 %v7388_v13  ;;  %v7397_v28 = vld [vmem:[%s10499_s2 + $0x54] ss:$8 sps:$4 sm:$0xff]   ;;  %v7319_v29 = vld [vmem:[%s10498_s1 + $0x130] ss:$8 sps:$4 sm:$0xff]  }
  0x1e   : > { %v556_v41 = vrot.slane %v453_v37, 3  ;;  %v562_v10 = vrot.slane %v455_v1, 3  ;;  %v7324_v30 = vld [vmem:[%s10498_s1 + $0x144] ss:$8 sps:$4 sm:$0xff]   ;;  %v7399_v31 = vld [vmem:[%s10499_s2 + $0x50] ss:$8 sps:$4 sm:$0xff]  }
  0x1f   : > { %986 = vmatpush1.bf16.msra.mxu0 %v7282_v16  ;;  %v555_v16 = vsel %vm432_vm2, %v553_v8, %v554_v9  ;;  %v7322_v33 = vld [vmem:[%s10498_s1 + $0x140] ss:$8 sps:$4 sm:$0xff]   ;;  %v7403_v36 = vld [vmem:[%s10499_s2 + $0x74] ss:$8 sps:$4 sm:$0xff]   ;;  %v7325_v37 = vld [vmem:[%s10498_s1 + $0x150] ss:$8 sps:$4 sm:$0xff]  }
  0x20   : > { %987 = vmatprep.subr.bf16.mxu0 %v7283_v18  ;;  %v558_v43 = vsel %vm432_vm2, %v556_v41, %v557_v39  ;;  %v564_v18 = vsel %vm432_vm2, %v562_v10, %v563_v11  ;;  %2288 = vmatpush1.bf16.msra.mxu1 %v7390_v19  ;;  %v7402_v35 = vld [vmem:[%s10499_s2 + $0x60] ss:$8 sps:$4 sm:$0xff]   ;;  %v7330_v39 = vld [vmem:[%s10498_s1 + $0x164] ss:$8 sps:$4 sm:$0xff]   ;;  %v7351_v54 = vld [vmem:[%s10498_s1 + $0x1d4] ss:$8 sps:$4 sm:$0xff]  }
  0x21   : > { %1005 = vmatprep.mubr.bf16.mxu0 %v558_v43  ;;  %2289 = vmatprep.subr.bf16.mxu1 %v7391_v21  ;;  %v7328_v41 = vld [vmem:[%s10498_s1 + $0x160] ss:$8 sps:$4 sm:$0xff]   ;;  %v7331_v43 = vld [vmem:[%s10498_s1 + $0x170] ss:$8 sps:$4 sm:$0xff]   ;;  %v7342_v48 = vld [vmem:[%s10498_s1 + $0x1a4] ss:$8 sps:$4 sm:$0xff]  }
  0x22   : > { %v7340_v49 = vld [vmem:[%s10498_s1 + $0x1a0] ss:$8 sps:$4 sm:$0xff]   ;;  %v7348_v52 = vld [vmem:[%s10498_s1 + $0x1c4] ss:$8 sps:$4 sm:$0xff]   ;;  %v7357_v58 = vld [vmem:[%s10498_s1 + $0x1f4] ss:$8 sps:$4 sm:$0xff]  }
  0x23   : > { %988 = vmatpush1.bf16.msra.mxu0 %v7285_v23  ;;  %v7393_v23 = vld [vmem:[%s10499_s2 + $0x30] ss:$8 sps:$4 sm:$0xff]   ;;  %v7346_v53 = vld [vmem:[%s10498_s1 + $0x1c0] ss:$8 sps:$4 sm:$0xff]   ;;  %v7360_v60 = vld [vmem:[%s10498_s1 + $0x204] ss:$8 sps:$4 sm:$0xff]  }
  0x24   : > { %989 = vmatprep.subr.bf16.mxu0 %v7286_v26  ;;  %v7321_v26 = vld [vmem:[%s10498_s1 + $0x134] ss:$8 sps:$4 sm:$0xff]   ;;  %2290 = vmatpush1.bf16.msra.mxu1 %v7393_v23  ;;  %v7352_v57 = vld [vmem:[%s10498_s1 + $0x1e0] ss:$8 sps:$4 sm:$0xff]   ;;  %v7355_v59 = vld [vmem:[%s10498_s1 + $0x1f0] ss:$8 sps:$4 sm:$0xff]  }
  0x25   : > { %2291 = vmatprep.subr.bf16.mxu1 %v7394_v24  ;;  %v7363_v62 = vld [vmem:[%s10498_s1 + $0x214] ss:$8 sps:$4 sm:$0xff]   ;;  %v7361_v63 = vld [vmem:[%s10498_s1 + $0x210] ss:$8 sps:$4 sm:$0xff]   ;;  %v8223_v1 = vmov 0   ;;  %v445_v10 = vrot.slane %v8341_v15, 4 }
  0x26   : > { %v7364_v2 = vld [vmem:[%s10498_s1 + $0x220] ss:$8 sps:$4 sm:$0xff]   ;;  %v7372_v4 = vld [vmem:[%s10498_s1 + $0x244] ss:$8 sps:$4 sm:$0xff]   ;;  %v408_v5 = vld [vmem:[#allocation2 + $0x10] sm:$0xfc] }
  0x27   : > { %990 = vmatpush1.bf16.msra.mxu0 %v7288_v32  ;;  %v7400_v32 = vld [vmem:[%s10499_s2 + $0x64] ss:$8 sps:$4 sm:$0xff]   ;;  %v409_v6 = vld [vmem:[#allocation2 + $0x30] sm:$0x3]  ;;  %v7375_v8 = vld [vmem:[%s10498_s1 + $0x254] ss:$8 sps:$4 sm:$0xff]  }
  0x28   : > { %991 = vmatprep.subr.bf16.mxu0 %v7289_v34  ;;  %2292 = vmatpush1.bf16.msra.mxu1 %v7396_v27  ;;  %v7327_v34 = vld [vmem:[%s10498_s1 + $0x154] ss:$8 sps:$4 sm:$0xff]   ;;  %v444_v9 = vrot.slane %v408_v5, 4  ;;  %v447_v11 = vrot.slane %v409_v6, 4  ;;  %v7373_v12 = vld [vmem:[%s10498_s1 + $0x250] ss:$8 sps:$4 sm:$0xff]  }
  0x29   : > { %2293 = vmatprep.subr.bf16.mxu1 %v7397_v28  ;;  %v7378_v13 = vld [vmem:[%s10498_s1 + $0x264] ss:$8 sps:$4 sm:$0xff]   ;;  %v7376_v15 = vld [vmem:[%s10498_s1 + $0x260] ss:$8 sps:$4 sm:$0xff]   ;;  %v7411_v27 = vld [vmem:[%s10499_s2 + $0x90] ss:$8 sps:$4 sm:$0xff]  }
  0x2a   : > { %v7406_v24 = vld [vmem:[%s10499_s2 + $0x84] ss:$8 sps:$4 sm:$0xff]  }
  0x2b   : > { %992 = vmatpush1.bf16.msra.mxu0 %v7291_v40  ;;  %v7405_v40 = vld [vmem:[%s10499_s2 + $0x70] ss:$8 sps:$4 sm:$0xff]   ;;  %v7412_v28 = vld [vmem:[%s10499_s2 + $0xa4] ss:$8 sps:$4 sm:$0xff]  }
  0x2c   : > { %993 = vmatprep.subr.bf16.mxu0 %v7292_v42  ;;  %2294 = vmatpush1.bf16.msra.mxu1 %v7399_v31  ;;  %v7333_v42 = vld [vmem:[%s10498_s1 + $0x174] ss:$8 sps:$4 sm:$0xff]   ;;  %v7417_v31 = vld [vmem:[%s10499_s2 + $0xb0] ss:$8 sps:$4 sm:$0xff]  }
  0x2d   : > { %2295 = vmatprep.subr.bf16.mxu1 %v7400_v32  ;;  %v7418_v32 = vld [vmem:[%s10499_s2 + $0xc4] ss:$8 sps:$4 sm:$0xff]  }
  0x2f   : > { %994 = vmatpush1.bf16.msra.mxu0 %v7294_v44  ;;  %v7336_v44 = vld [vmem:[%s10498_s1 + $0x184] ss:$8 sps:$4 sm:$0xff]  }
  0x30   : > { %995 = vmatprep.subr.bf16.mxu0 %v7295_v45  ;;  %2296 = vmatpush1.bf16.msra.mxu1 %v7402_v35  ;;  %v7334_v45 = vld [vmem:[%s10498_s1 + $0x180] ss:$8 sps:$4 sm:$0xff]   ;;  %v7423_v35 = vld [vmem:[%s10499_s2 + $0xd0] ss:$8 sps:$4 sm:$0xff]  }
  0x31   : > { %2297 = vmatprep.subr.bf16.mxu1 %v7403_v36  ;;  %v7424_v36 = vld [vmem:[%s10499_s2 + $0xe4] ss:$8 sps:$4 sm:$0xff]  }
  0x33   : > { %996 = vmatpush1.bf16.msra.mxu0 %v7297_v46  ;;  %v7339_v46 = vld [vmem:[%s10498_s1 + $0x194] ss:$8 sps:$4 sm:$0xff]  }
  0x34   : > { %997 = vmatprep.subr.bf16.mxu0 %v7298_v47  ;;  %2298 = vmatpush1.bf16.msra.mxu1 %v7405_v40  ;;  %v7337_v47 = vld [vmem:[%s10498_s1 + $0x190] ss:$8 sps:$4 sm:$0xff]  }
  0x35   : > { %2299 = vmatprep.subr.bf16.mxu1 %v7406_v24  ;;  %v7429_v40 = vld [vmem:[%s10499_s2 + $0xf0] ss:$8 sps:$4 sm:$0xff]  }
  0x37   : > { %998 = vmatpush1.bf16.msra.mxu0 %v7300_v50  ;;  %v7345_v50 = vld [vmem:[%s10498_s1 + $0x1b4] ss:$8 sps:$4 sm:$0xff]  }
  0x38   : > { %999 = vmatprep.subr.bf16.mxu0 %v7301_v51  ;;  %v7343_v51 = vld [vmem:[%s10498_s1 + $0x1b0] ss:$8 sps:$4 sm:$0xff]  }
  0x3b   : > { %1000 = vmatpush1.bf16.msra.mxu0 %v7303_v55  ;;  %v7349_v55 = vld [vmem:[%s10498_s1 + $0x1d0] ss:$8 sps:$4 sm:$0xff]  }
  0x3c   : > { %1001 = vmatprep.subr.bf16.mxu0 %v7304_v56  ;;  %v7354_v56 = vld [vmem:[%s10498_s1 + $0x1e4] ss:$8 sps:$4 sm:$0xff]  }
  0x3f   : > { %1002 = vmatpush1.bf16.msra.mxu0 %v7306_v61  ;;  %v7358_v61 = vld [vmem:[%s10498_s1 + $0x200] ss:$8 sps:$4 sm:$0xff]  }
  0x40   : > { %1003 = vmatprep.subr.bf16.mxu0 %v7307_v0  ;;  %v7366_v0 = vld [vmem:[%s10498_s1 + $0x224] ss:$8 sps:$4 sm:$0xff]  }
  0x43   : > { %1004 = vmatpush1.bf16.msra.mxu0 %v7309_v3  ;;  %v7369_v3 = vld [vmem:[%s10498_s1 + $0x234] ss:$8 sps:$4 sm:$0xff]  }
  0x44   : > { %1016 = vmatprep.subr.bf16.mxu0 %v7312_v7  ;;  %v7370_v7 = vld [vmem:[%s10498_s1 + $0x240] ss:$8 sps:$4 sm:$0xff]  }
  0x46   : > { %1006 = vmatmul.mubr.bf16.vlgmr.msra.gmra.mrb[0].mxu0 %v555_v16  ;;  %v448_v16 = vsel %vm443_vm3, %v445_v10, %v447_v11 }
  0x47   : > { %1017 = vmatpush1.bf16.msra.mxu0 %v7310_v14  ;;  %1048 = vmatprep.mubr.bf16.mxu0 %v564_v18  ;;  %v446_v14 = vsel %vm443_vm3, %v444_v9, %v445_v10  ;;  %v461_v19 = vpack.c.bf16 %v448_v16, %v448_v16 }
  0x48   : > { %1018 = vmatprep.subr.bf16.mxu0 %v7315_v17  ;;  %v7381_v17 = vld [vmem:[%s10498_s1 + $0x274] ss:$8 sps:$4 sm:$0xff]   ;;  %v456_v18 = vpack.c.bf16 %v446_v14, %v444_v9  ;;  %v1144_v9 = vld [vmem:[#allocation2 + $0x8] sm:$0xc0] }
  0x4a   : > { %v565_v21 = vrot.slane %v456_v18, 3 }
  0x4b   : > { %1019 = vmatpush1.bf16.msra.mxu0 %v7313_v20  ;;  %v7379_v20 = vld [vmem:[%s10498_s1 + $0x270] ss:$8 sps:$4 sm:$0xff]  }
  0x4c   : > { %1020 = vmatprep.subr.bf16.mxu0 %v7318_v22  ;;  %v566_v22 = vrot.slane %v461_v19, 3 }
  0x4e   : > { %v567_v23 = vsel %vm432_vm2, %v565_v21, %v566_v22 }
  0x4f   : > { %1021 = vmatpush1.bf16.msra.mxu0 %v7316_v25  ;;  %v7408_v25 = vld [vmem:[%s10499_s2 + $0x80] ss:$8 sps:$4 sm:$0xff]  }
  0x50   : > { %1022 = vmatprep.subr.bf16.mxu0 %v7321_v26  ;;  %2300 = vmatpush1.bf16.msra.mxu1 %v7408_v25  ;;  %v7409_v26 = vld [vmem:[%s10499_s2 + $0x94] ss:$8 sps:$4 sm:$0xff]  }
  0x51   : > { %2301 = vmatprep.subr.bf16.mxu1 %v7409_v26 }
  0x53   : > { %1023 = vmatpush1.bf16.msra.mxu0 %v7319_v29  ;;  %v7414_v29 = vld [vmem:[%s10499_s2 + $0xa0] ss:$8 sps:$4 sm:$0xff]  }
  0x54   : > { %1024 = vmatprep.subr.bf16.mxu0 %v7324_v30  ;;  %2302 = vmatpush1.bf16.msra.mxu1 %v7411_v27  ;;  %v7415_v30 = vld [vmem:[%s10499_s2 + $0xb4] ss:$8 sps:$4 sm:$0xff]  }
  0x55   : > { %2303 = vmatprep.subr.bf16.mxu1 %v7412_v28 }
  0x57   : > { %1025 = vmatpush1.bf16.msra.mxu0 %v7322_v33  ;;  %v7420_v33 = vld [vmem:[%s10499_s2 + $0xc0] ss:$8 sps:$4 sm:$0xff]  }
  0x58   : > { %1026 = vmatprep.subr.bf16.mxu0 %v7327_v34  ;;  %2304 = vmatpush1.bf16.msra.mxu1 %v7414_v29  ;;  %v7421_v34 = vld [vmem:[%s10499_s2 + $0xd4] ss:$8 sps:$4 sm:$0xff]  }
  0x59   : > { %2305 = vmatprep.subr.bf16.mxu1 %v7415_v30 }
  0x5b   : > { %1027 = vmatpush1.bf16.msra.mxu0 %v7325_v37  ;;  %v7426_v37 = vld [vmem:[%s10499_s2 + $0xe0] ss:$8 sps:$4 sm:$0xff]  }
  0x5c   : > { %1028 = vmatprep.subr.bf16.mxu0 %v7330_v39  ;;  %2306 = vmatpush1.bf16.msra.mxu1 %v7417_v31  ;;  %v7427_v39 = vld [vmem:[%s10499_s2 + $0xf4] ss:$8 sps:$4 sm:$0xff]  }
  0x5d   : > { %2307 = vmatprep.subr.bf16.mxu1 %v7418_v32 }
  0x5f   : > { %1029 = vmatpush1.bf16.msra.mxu0 %v7328_v41  ;;  %v7432_v41 = vld [vmem:[%s10499_s2 + $0x104] ss:$8 sps:$4 sm:$0xff]  }
  0x60   : > { %1030 = vmatprep.subr.bf16.mxu0 %v7333_v42  ;;  %2308 = vmatpush1.bf16.msra.mxu1 %v7420_v33  ;;  %v1104_v42 = vlaneseq }
  0x61   : > { %2309 = vmatprep.subr.bf16.mxu1 %v7421_v34 }
  0x63   : > { %1031 = vmatpush1.bf16.msra.mxu0 %v7331_v43  ;;  %v1105_v43 = vshrl.u32 %v1104_v42, 7 }
  0x64   : > { %1032 = vmatprep.subr.bf16.mxu0 %v7336_v44  ;;  %2310 = vmatpush1.bf16.msra.mxu1 %v7423_v35 }
  0x65   : > { %2311 = vmatprep.subr.bf16.mxu1 %v7424_v36  ;;  %v8666_v44 = vsub.s32 0, %v1105_v43 }
  0x67   : > { %1033 = vmatpush1.bf16.msra.mxu0 %v7334_v45  ;;  %v1102_v45 = vld [vmem:[%s10503_s6] ss:$2 sm:$0x3] }
  0x68   : > { %1034 = vmatprep.subr.bf16.mxu0 %v7339_v46  ;;  %2312 = vmatpush1.bf16.msra.mxu1 %v7426_v37  ;;  %v8671_v46 = vsub.s32 1, %v1105_v43 }
  0x69   : > { %2313 = vmatprep.subr.bf16.mxu1 %v7427_v39  ;;  %v7430_v39 = vld [vmem:[%s10499_s2 + $0x100] ss:$8 sps:$4 sm:$0xff]  }
  0x6b   : > { %1035 = vmatpush1.bf16.msra.mxu0 %v7337_v47  ;;  %v6516_v47 = vld [vmem:[%s10503_s6 + $0x1] ss:$2 sm:$0x3] }
  0x6c   : > { %1036 = vmatprep.subr.bf16.mxu0 %v7342_v48  ;;  %2314 = vmatpush1.bf16.msra.mxu1 %v7429_v40  ;;  %v1107_v48 = vrot.slane %v1102_v45, %v8666_v44 }
  0x6d   : > { %2326 = vmatprep.subr.bf16.mxu1 %v7432_v41 }
  0x6f   : > { %1037 = vmatpush1.bf16.msra.mxu0 %v7340_v49  ;;  %v1111_v49 = vrot.slane %v1102_v45, %v8671_v46  ;;  %v7435_v45 = vld [vmem:[%s10499_s2 + $0x114] ss:$8 sps:$4 sm:$0xff]  }
  0x70   : > { %1038 = vmatprep.subr.bf16.mxu0 %v7345_v50  ;;  %v1124_v50 = vrot.slane %v6516_v47, %v8666_v44 }
  0x73   : > { %1039 = vmatpush1.bf16.msra.mxu0 %v7343_v51 }
  0x74   : > { %1040 = vmatprep.subr.bf16.mxu0 %v7348_v52  ;;  %v1128_v52 = vrot.slane %v6516_v47, %v8671_v46 }
  0x77   : > { %1041 = vmatpush1.bf16.msra.mxu0 %v7346_v53 }
  0x78   : > { %1042 = vmatprep.subr.bf16.mxu0 %v7351_v54 }
  0x7b   : > { %1043 = vmatpush1.bf16.msra.mxu0 %v7349_v55 }
  0x7c   : > { %1044 = vmatprep.subr.bf16.mxu0 %v7354_v56 }
  0x7f   : > { %1045 = vmatpush1.bf16.msra.mxu0 %v7352_v57 }
  0x80   : > { %1046 = vmatprep.subr.bf16.mxu0 %v7357_v58 }
  0x83   : > { %1047 = vmatpush1.bf16.msra.mxu0 %v7355_v59 }
  0x84   : > { %1059 = vmatprep.subr.bf16.mxu0 %v7360_v60 }
  0x86   : > { %1049 = vmatmul.mubr.bf16.vlgmr.msra.gmra.mrb[0].mxu0 %v8370_v38  ;;  %v7367_v38 = vld [vmem:[%s10498_s1 + $0x230] ss:$8 sps:$4 sm:$0xff]  }
  0x87   : > { %1060 = vmatpush1.bf16.msra.mxu0 %v7358_v61  ;;  %1091 = vmatprep.mubr.bf16.mxu0 %v8223_v1 }
  0x88   : > { %1061 = vmatprep.subr.bf16.mxu0 %v7363_v62 }
  0x8b   : > { %1062 = vmatpush1.bf16.msra.mxu0 %v7361_v63 }
  0x8c   : > { %1063 = vmatprep.subr.bf16.mxu0 %v7366_v0 }
  0x8f   : > { %1064 = vmatpush1.bf16.msra.mxu0 %v7364_v2 }
  0x90   : > { %1065 = vmatprep.subr.bf16.mxu0 %v7369_v3 }
  0x93   : > { %1066 = vmatpush1.bf16.msra.mxu0 %v7367_v38 }
  0x94   : > { %1067 = vmatprep.subr.bf16.mxu0 %v7372_v4 }
  0x97   : > { %1068 = vmatpush1.bf16.msra.mxu0 %v7370_v7 }
  0x98   : > { %1069 = vmatprep.subr.bf16.mxu0 %v7375_v8 }
  0x9b   : > { %1070 = vmatpush1.bf16.msra.mxu0 %v7373_v12 }
  0x9c   : > { %1071 = vmatprep.subr.bf16.mxu0 %v7378_v13  ;;  %v1150_v13 = vld [vmem:[#allocation2 + $0x8] sm:$0x80] }
  0x9d   : > { %v1174_v22 = vrot.slane %v1150_v13, 1  ;;  %v1149_v13 = vld [vmem:[#allocation2] sm:$0x80] }
  0x9f   : > { %1072 = vmatpush1.bf16.msra.mxu0 %v7376_v15  ;;  %v1143_v15 = vld [vmem:[#allocation2] sm:$0xc0] }
  0xa0   : > { %1073 = vmatprep.subr.bf16.mxu0 %v7381_v17 }
  0xa3   : > { %1074 = vmatpush1.bf16.msra.mxu0 %v7379_v20 }
  0xa6   : > { %1092 = vmatmul.mubr.bf16.vlgmr.msra.gmra.mrb[0].mxu0 %v567_v23 }
 0x179   : > { %v1093_v51 = vpop.f32.mrb[0].mxu0 }
 0x17a   : > { %v1114_v53 = vmul.f32 %v1107_v48, %v1093_v51  ;;  %v1095_v54 = vpop.f32.mrb[1].mxu0  ;;  %v7438_v51 = vld [vmem:[%s10499_s2 + $0x124] ss:$8 sps:$4 sm:$0xff]  }
 0x17b   : > { %v1115_v55 = vmul.f32 %v1111_v49, %v1095_v54  ;;  %v1097_v56 = vpop.f32.mrb[2].mxu0  ;;  %v7439_v54 = vld [vmem:[%s10499_s2 + $0x130] ss:$8 sps:$4 sm:$0xff]  }
 0x17c   : > { %v1131_v57 = vadd.f32 %v1124_v50, %v1114_v53  ;;  %v1116_v58 = vmul.f32 %v1107_v48, %v1097_v56  ;;  %v1099_v59 = vpop.f32.mrb[3].mxu0  ;;  %v7441_v53 = vld [vmem:[%s10499_s2 + $0x134] ss:$8 sps:$4 sm:$0xff]   ;;  %v7442_v56 = vld [vmem:[%s10499_s2 + $0x140] ss:$8 sps:$4 sm:$0xff]  }
 0x17d   : > { %v1132_v60 = vadd.f32 %v1128_v52, %v1115_v55  ;;  %v1117_v61 = vmul.f32 %v1111_v49, %v1099_v59  ;;  %v7444_v55 = vld [vmem:[%s10499_s2 + $0x144] ss:$8 sps:$4 sm:$0xff]  }
 0x17e   : > { %8182 = vtanh.f32 %v1131_v57  ;;  %v1133_v62 = vadd.f32 %v1124_v50, %v1116_v58  ;;  %v7433_v50 = vld [vmem:[%s10499_s2 + $0x110] ss:$8 sps:$4 sm:$0xff]   ;;  %v7447_v57 = vld [vmem:[%s10499_s2 + $0x154] ss:$8 sps:$4 sm:$0xff]   ;;  %v7450_v59 = vld [vmem:[%s10499_s2 + $0x164] ss:$8 sps:$4 sm:$0xff]  }
 0x17f   : > { %8184 = vtanh.f32 %v1132_v60  ;;  %v1134_v63 = vadd.f32 %v1128_v52, %v1117_v61  ;;  %v7436_v52 = vld [vmem:[%s10499_s2 + $0x120] ss:$8 sps:$4 sm:$0xff]   ;;  %v7445_v58 = vld [vmem:[%s10499_s2 + $0x150] ss:$8 sps:$4 sm:$0xff]   ;;  %v7453_v61 = vld [vmem:[%s10499_s2 + $0x174] ss:$8 sps:$4 sm:$0xff]  }
 0x180   : > { %8186 = vtanh.f32 %v1133_v62  ;;  %v7448_v60 = vld [vmem:[%s10499_s2 + $0x160] ss:$8 sps:$4 sm:$0xff]   ;;  %v7451_v62 = vld [vmem:[%s10499_s2 + $0x170] ss:$8 sps:$4 sm:$0xff]  }
 0x181   : > { %8188 = vtanh.f32 %v1134_v63  ;;  %v7456_v63 = vld [vmem:[%s10499_s2 + $0x184] ss:$8 sps:$4 sm:$0xff]  }
 0x188   : > { %v8680_v0 = vpop.eup %8182 }
 0x189   : > { %v8185_v1 = vpop.eup %8184  ;;  %1139 = vst [vmem:[#allocation2 + $0x10] sm:$0xff] %v8680_v0  ;;  %v1189_v38 = vrot.slane %v8680_v0, 2  ;;  %v1243_v26 = vpack.c.bf16 %v8680_v0, %v1143_v15  ;;  %v7474_v15 = vld [vmem:[%s10499_s2 + $0x1e4] ss:$8 sps:$4 sm:$0xff]  }
 0x18a   : > { %v8683_v2 = vpop.eup %8186  ;;  %1140 = vst [vmem:[#allocation2 + $0x18] sm:$0xff] %v8185_v1  ;;  %v1190_v5 = vrot.slane %v8185_v1, 2  ;;  %v1244_v19 = vpack.c.bf16 %v8185_v1, %v1144_v9  ;;  %v1175_v23 = vrot.slane %v8185_v1, 1  ;;  %v7454_v1 = vld [vmem:[%s10499_s2 + $0x180] ss:$8 sps:$4 sm:$0xff]  }
 0x18b   : > { %v8685_v3 = vpop.eup %8188  ;;  %1141 = vst [vmem:[#allocation2 + $0x20] sm:$0xff] %v8683_v2  ;;  %v1191_v4 = vrot.slane %v8683_v2, 2  ;;  %v1443_v40 = vrot.slane %v1243_v26, 3  ;;  %v7468_v9 = vld [vmem:[%s10499_s2 + $0x1c4] ss:$8 sps:$4 sm:$0xff]  }
 0x18c   : > { %1142 = vst [vmem:[#allocation2 + $0x28] sm:$0xff] %v8685_v3  ;;  %v1193_v6 = vrot.slane %v8685_v3, 2  ;;  %v1446_v32 = vrot.slane %v1244_v19, 3  ;;  %v1176_v35 = vsel %vm413_vm1, %v1174_v22, %v1175_v23  ;;  %v7480_v26 = vld [vmem:[%s10499_s2 + $0x204] ss:$8 sps:$4 sm:$0xff]  }
 0x18d   : > { %v1192_v7 = vsel %vm423_vm0, %v1189_v38, %v1191_v4  ;;  %v1257_v8 = vpack.c.bf16 %v1191_v4, %v1191_v4  ;;  %v7457_v4 = vld [vmem:[%s10499_s2 + $0x190] ss:$8 sps:$4 sm:$0xff]  }
 0x18e   : > { %v1194_v10 = vsel %vm423_vm0, %v1190_v5, %v1193_v6  ;;  %v1258_v11 = vpack.c.bf16 %v1193_v6, %v1193_v6  ;;  %v1247_v12 = vpack.c.bf16 %v1192_v7, %v1189_v38  ;;  %v7459_v38 = vld [vmem:[%s10499_s2 + $0x194] ss:$8 sps:$4 sm:$0xff]   ;;  %v7460_v6 = vld [vmem:[%s10499_s2 + $0x1a0] ss:$8 sps:$4 sm:$0xff]  }
 0x18f   : > { %v1248_v14 = vpack.c.bf16 %v1194_v10, %v1190_v5  ;;  %v1456_v16 = vrot.slane %v1257_v8, 3  ;;  %v7462_v5 = vld [vmem:[%s10499_s2 + $0x1a4] ss:$8 sps:$4 sm:$0xff]   ;;  %v7465_v7 = vld [vmem:[%s10499_s2 + $0x1b4] ss:$8 sps:$4 sm:$0xff]  }
 0x190   : > { %v1459_v17 = vrot.slane %v1258_v11, 3  ;;  %v1455_v18 = vrot.slane %v1247_v12, 3  ;;  %v7463_v8 = vld [vmem:[%s10499_s2 + $0x1b0] ss:$8 sps:$4 sm:$0xff]   ;;  %v7466_v10 = vld [vmem:[%s10499_s2 + $0x1c0] ss:$8 sps:$4 sm:$0xff]  }
 0x191   : > { %v1458_v20 = vrot.slane %v1248_v14, 3  ;;  %v7471_v12 = vld [vmem:[%s10499_s2 + $0x1d4] ss:$8 sps:$4 sm:$0xff]  }
 0x192   : > { %v1147_v21 = vld [vmem:[#allocation2 + $0x20] sm:$0x3f]  ;;  %v8695_v24 = vsel %vm432_vm2, %v1455_v18, %v1456_v16  ;;  %v7469_v16 = vld [vmem:[%s10499_s2 + $0x1d0] ss:$8 sps:$4 sm:$0xff]   ;;  %v1172_v18 = vrot.slane %v8680_v0, 1 }
 0x193   : > { %v1148_v25 = vld [vmem:[#allocation2 + $0x28] sm:$0x3f]  ;;  %v1253_v27 = vpack.c.bf16 %v1147_v21, %v1147_v21  ;;  %v8699_v29 = vsel %vm432_vm2, %v1458_v20, %v1459_v17  ;;  %v1151_v11 = vld [vmem:[#allocation2 + $0x20] sm:$0x7f]  ;;  %v1171_v17 = vrot.slane %v1149_v13, 1 }
 0x194   : > { %v1152_v28 = vld [vmem:[#allocation2 + $0x28] sm:$0x7f]  ;;  %v1254_v30 = vpack.c.bf16 %v1148_v25, %v1148_v25  ;;  %v1177_v14 = vrot.slane %v1151_v11, 1  ;;  %v7477_v21 = vld [vmem:[%s10499_s2 + $0x1f4] ss:$8 sps:$4 sm:$0xff]  }
 0x195   : > { %v1179_v31 = vrot.slane %v1152_v28, 1  ;;  %v1444_v33 = vrot.slane %v1253_v27, 3  ;;  %v7472_v20 = vld [vmem:[%s10499_s2 + $0x1e0] ss:$8 sps:$4 sm:$0xff]   ;;  %v1173_v22 = vsel %vm413_vm1, %v1171_v17, %v1172_v18  ;;  %v7475_v0 = vld [vmem:[%s10499_s2 + $0x1f0] ss:$8 sps:$4 sm:$0xff]  }
 0x196   : > { %v1447_v34 = vrot.slane %v1254_v30, 3  ;;  %v1178_v19 = vsel %vm413_vm1, %v1172_v18, %v1177_v14  ;;  %v1255_v25 = vpack.c.bf16 %v1177_v14, %v1177_v14  ;;  %v7478_v30 = vld [vmem:[%s10499_s2 + $0x200] ss:$8 sps:$4 sm:$0xff]   ;;  %v7624_v18 = vld [vmem:[%s10500_s3 + $0x4] ss:$8 sps:$4 sm:$0xff]  }
 0x197   : > { %v1180_v36 = vsel %vm413_vm1, %v1175_v23, %v1179_v31  ;;  %v1256_v37 = vpack.c.bf16 %v1179_v31, %v1179_v31  ;;  %v1445_v47 = vsel %vm432_vm2, %v1443_v40, %v1444_v33  ;;  %v1245_v23 = vpack.c.bf16 %v1178_v19, %v1173_v22  ;;  %v7483_v31 = vld [vmem:[%s10499_s2 + $0x214] ss:$8 sps:$4 sm:$0xff]   ;;  %v7481_v33 = vld [vmem:[%s10499_s2 + $0x210] ss:$8 sps:$4 sm:$0xff]   ;;  %v7526_v13 = vld [vmem:[%s10499_s2 + $0x300] ss:$8 sps:$4 sm:$0xff]   ;;  %3679 = vmatprep.subr.bf16.mxu0 %v7624_v18 }
 0x198   : > { %v1246_v41 = vpack.c.bf16 %v1180_v36, %v1176_v35  ;;  %v1448_v42 = vsel %vm432_vm2, %v1446_v32, %v1447_v34  ;;  %v1450_v28 = vrot.slane %v1255_v25, 3  ;;  %v7486_v34 = vld [vmem:[%s10499_s2 + $0x224] ss:$8 sps:$4 sm:$0xff]   ;;  %v7484_v35 = vld [vmem:[%s10499_s2 + $0x220] ss:$8 sps:$4 sm:$0xff]  }
 0x199   : > { %v1453_v43 = vrot.slane %v1256_v37, 3  ;;  %2315 = vmatprep.mubr.bf16.mxu1 %v1448_v42  ;;  %v1449_v27 = vrot.slane %v1245_v23, 3  ;;  %v7489_v36 = vld [vmem:[%s10499_s2 + $0x234] ss:$8 sps:$4 sm:$0xff]   ;;  %v7492_v37 = vld [vmem:[%s10499_s2 + $0x244] ss:$8 sps:$4 sm:$0xff]  }
 0x19a   : > { %v1452_v48 = vrot.slane %v1246_v41, 3  ;;  %2316 = vmatmul.mubr.bf16.vlgmr.msra.gmra.mrb[0].mxu1 %v1445_v47  ;;  %v7495_v40 = vld [vmem:[%s10499_s2 + $0x254] ss:$8 sps:$4 sm:$0xff]   ;;  %v7493_v41 = vld [vmem:[%s10499_s2 + $0x250] ss:$8 sps:$4 sm:$0xff]  }
 0x19b   : > { %2327 = vmatpush1.bf16.msra.mxu1 %v7430_v39  ;;  %v1451_v32 = vsel %vm432_vm2, %v1449_v27, %v1450_v28  ;;  %v7490_v39 = vld [vmem:[%s10499_s2 + $0x240] ss:$8 sps:$4 sm:$0xff]   ;;  %v7498_v42 = vld [vmem:[%s10499_s2 + $0x264] ss:$8 sps:$4 sm:$0xff]   ;;  %v7499_v47 = vld [vmem:[%s10499_s2 + $0x270] ss:$8 sps:$4 sm:$0xff]  }
 0x19c   : > { %v1454_v49 = vsel %vm432_vm2, %v1452_v48, %v1453_v43  ;;  %2328 = vmatprep.subr.bf16.mxu1 %v7435_v45  ;;  %v7496_v43 = vld [vmem:[%s10499_s2 + $0x260] ss:$8 sps:$4 sm:$0xff]   ;;  %v7501_v45 = vld [vmem:[%s10499_s2 + $0x274] ss:$8 sps:$4 sm:$0xff]   ;;  %v7504_v48 = vld [vmem:[%s10499_s2 + $0x284] ss:$8 sps:$4 sm:$0xff]  }
 0x19d   : > { %2358 = vmatprep.mubr.bf16.mxu1 %v1454_v49  ;;  %v7502_v49 = vld [vmem:[%s10499_s2 + $0x280] ss:$8 sps:$4 sm:$0xff]   ;;  %v7529_v19 = vld [vmem:[%s10499_s2 + $0x310] ss:$8 sps:$4 sm:$0xff]   ;;  %v7630_v22 = vld [vmem:[%s10500_s3 + $0x24] ss:$8 sps:$4 sm:$0xff]  }
 0x19e   : > { %v7622_v17 = vld [vmem:[%s10500_s3] ss:$8 sps:$4 sm:$0xff]   ;;  %v7537_v25 = vld [vmem:[%s10499_s2 + $0x334] ss:$8 sps:$4 sm:$0xff]   ;;  %v7535_v27 = vld [vmem:[%s10499_s2 + $0x330] ss:$8 sps:$4 sm:$0xff]  }
 0x19f   : > { %2329 = vmatpush1.bf16.msra.mxu1 %v7433_v50  ;;  %v7507_v50 = vld [vmem:[%s10499_s2 + $0x294] ss:$8 sps:$4 sm:$0xff]   ;;  %3680 = vmatpush1.bf16.msra.mxu0 %v7622_v17  ;;  %v7532_v23 = vld [vmem:[%s10499_s2 + $0x320] ss:$8 sps:$4 sm:$0xff]   ;;  %v7540_v28 = vld [vmem:[%s10499_s2 + $0x344] ss:$8 sps:$4 sm:$0xff]  }
 0x1a0   : > { %2330 = vmatprep.subr.bf16.mxu1 %v7438_v51  ;;  %v7505_v51 = vld [vmem:[%s10499_s2 + $0x290] ss:$8 sps:$4 sm:$0xff]   ;;  %v7576_v18 = vld [vmem:[%s10499_s2 + $0x404] ss:$8 sps:$4 sm:$0xff]  }
 0x1a3   : > { %2331 = vmatpush1.bf16.msra.mxu1 %v7436_v52  ;;  %v7510_v52 = vld [vmem:[%s10499_s2 + $0x2a4] ss:$8 sps:$4 sm:$0xff]  }
 0x1a4   : > { %2332 = vmatprep.subr.bf16.mxu1 %v7441_v53  ;;  %v7508_v53 = vld [vmem:[%s10499_s2 + $0x2a0] ss:$8 sps:$4 sm:$0xff]  }
 0x1a7   : > { %2333 = vmatpush1.bf16.msra.mxu1 %v7439_v54  ;;  %v7513_v54 = vld [vmem:[%s10499_s2 + $0x2b4] ss:$8 sps:$4 sm:$0xff]  }
 0x1a8   : > { %2334 = vmatprep.subr.bf16.mxu1 %v7444_v55  ;;  %v7511_v55 = vld [vmem:[%s10499_s2 + $0x2b0] ss:$8 sps:$4 sm:$0xff]  }
 0x1ab   : > { %2335 = vmatpush1.bf16.msra.mxu1 %v7442_v56  ;;  %v7516_v56 = vld [vmem:[%s10499_s2 + $0x2c4] ss:$8 sps:$4 sm:$0xff]  }
 0x1ac   : > { %2336 = vmatprep.subr.bf16.mxu1 %v7447_v57  ;;  %v7514_v57 = vld [vmem:[%s10499_s2 + $0x2c0] ss:$8 sps:$4 sm:$0xff]  }
 0x1af   : > { %2337 = vmatpush1.bf16.msra.mxu1 %v7445_v58  ;;  %v7519_v58 = vld [vmem:[%s10499_s2 + $0x2d4] ss:$8 sps:$4 sm:$0xff]  }
 0x1b0   : > { %2338 = vmatprep.subr.bf16.mxu1 %v7450_v59  ;;  %v1156_v59 = vld [vmem:[#allocation2 + $0x18] sm:$0xfe] }
 0x1b3   : > { %2339 = vmatpush1.bf16.msra.mxu1 %v7448_v60  ;;  %v1160_v60 = vld [vmem:[#allocation2 + $0x38] sm:$0x1] }
 0x1b4   : > { %2340 = vmatprep.subr.bf16.mxu1 %v7453_v61  ;;  %v7517_v61 = vld [vmem:[%s10499_s2 + $0x2d0] ss:$8 sps:$4 sm:$0xff]  }
 0x1b7   : > { %2341 = vmatpush1.bf16.msra.mxu1 %v7451_v62  ;;  %v1208_v62 = vrot.slane %v1156_v59, 3  ;;  %v7567_v59 = vld [vmem:[%s10499_s2 + $0x3d4] ss:$8 sps:$4 sm:$0xff]  }
 0x1b8   : > { %2342 = vmatprep.subr.bf16.mxu1 %v7456_v63  ;;  %v7522_v63 = vld [vmem:[%s10499_s2 + $0x2e4] ss:$8 sps:$4 sm:$0xff]  }
 0x1bb   : > { %2343 = vmatpush1.bf16.msra.mxu1 %v7454_v1  ;;  %v1211_v1 = vrot.slane %v8685_v3, 3 }
 0x1bc   : > { %2344 = vmatprep.subr.bf16.mxu1 %v7459_v38  ;;  %v1215_v38 = vrot.slane %v1160_v60, 3  ;;  %v1162_v60 = vld [vmem:[#allocation2 + $0x18] sm:$0xfc] }
 0x1bf   : > { %2345 = vmatpush1.bf16.msra.mxu1 %v7457_v4  ;;  %v7520_v4 = vld [vmem:[%s10499_s2 + $0x2e0] ss:$8 sps:$4 sm:$0xff]  }
 0x1c0   : > { %2346 = vmatprep.subr.bf16.mxu1 %v7462_v5  ;;  %v1212_v5 = vsel %vm432_vm2, %v1208_v62, %v1211_v1 }
 0x1c3   : > { %2347 = vmatpush1.bf16.msra.mxu1 %v7460_v6  ;;  %v7525_v6 = vld [vmem:[%s10499_s2 + $0x2f4] ss:$8 sps:$4 sm:$0xff]  }
 0x1c4   : > { %2348 = vmatprep.subr.bf16.mxu1 %v7465_v7  ;;  %v1216_v7 = vsel %vm432_vm2, %v1211_v1, %v1215_v38  ;;  %v7565_v1 = vld [vmem:[%s10499_s2 + $0x3d0] ss:$8 sps:$4 sm:$0xff]   ;;  %v1228_v38 = vrot.slane %v1162_v60, 4 }
 0x1c5   : > { %v1260_v11 = vpack.c.bf16 %v1216_v7, %v1216_v7  ;;  %v1231_v7 = vrot.slane %v8685_v3, 4 }
 0x1c7   : > { %2349 = vmatpush1.bf16.msra.mxu1 %v7463_v8  ;;  %v1250_v8 = vpack.c.bf16 %v1212_v5, %v1208_v62  ;;  %v1465_v14 = vrot.slane %v1260_v11, 3  ;;  %v1209_v5 = vrot.slane %v8683_v2, 3  ;;  %v1232_v11 = vsel %vm443_vm3, %v1228_v38, %v1231_v7 }
 0x1c8   : > { %2350 = vmatprep.subr.bf16.mxu1 %v7468_v9  ;;  %v7523_v9 = vld [vmem:[%s10499_s2 + $0x2f0] ss:$8 sps:$4 sm:$0xff]  }
 0x1cb   : > { %2351 = vmatpush1.bf16.msra.mxu1 %v7466_v10  ;;  %v7528_v10 = vld [vmem:[%s10499_s2 + $0x304] ss:$8 sps:$4 sm:$0xff]  }
 0x1cc   : > { %2352 = vmatprep.subr.bf16.mxu1 %v7471_v12  ;;  %v1464_v12 = vrot.slane %v1250_v8, 3 }
 0x1cf   : > { %2353 = vmatpush1.bf16.msra.mxu1 %v7469_v16  ;;  %v7531_v16 = vld [vmem:[%s10499_s2 + $0x314] ss:$8 sps:$4 sm:$0xff]  }
 0x1d0   : > { %2354 = vmatprep.subr.bf16.mxu1 %v7474_v15  ;;  %v1466_v15 = vsel %vm432_vm2, %v1464_v12, %v1465_v14  ;;  %v7573_v12 = vld [vmem:[%s10499_s2 + $0x3f4] ss:$8 sps:$4 sm:$0xff]  }
 0x1d3   : > { %2355 = vmatpush1.bf16.msra.mxu1 %v7472_v20  ;;  %v7534_v20 = vld [vmem:[%s10499_s2 + $0x324] ss:$8 sps:$4 sm:$0xff]  }
 0x1d4   : > { %2356 = vmatprep.subr.bf16.mxu1 %v7477_v21  ;;  %v7625_v21 = vld [vmem:[%s10500_s3 + $0x10] ss:$8 sps:$4 sm:$0xff]  }
 0x1d7   : > { %2357 = vmatpush1.bf16.msra.mxu1 %v7475_v0  ;;  %v7628_v0 = vld [vmem:[%s10500_s3 + $0x20] ss:$8 sps:$4 sm:$0xff]  }
 0x1d8   : > { %2369 = vmatprep.subr.bf16.mxu1 %v7480_v26  ;;  %v7633_v26 = vld [vmem:[%s10500_s3 + $0x34] ss:$8 sps:$4 sm:$0xff]  }
 0x1da   : > { %2359 = vmatmul.mubr.bf16.vlgmr.msra.gmra.mrb[0].mxu1 %v1451_v32  ;;  %v7538_v32 = vld [vmem:[%s10499_s2 + $0x340] ss:$8 sps:$4 sm:$0xff]  }
 0x1db   : > { %2370 = vmatpush1.bf16.msra.mxu1 %v7478_v30  ;;  %2401 = vmatprep.mubr.bf16.mxu1 %v8699_v29  ;;  %v7487_v29 = vld [vmem:[%s10499_s2 + $0x230] ss:$8 sps:$4 sm:$0xff]  }
 0x1dc   : > { %2371 = vmatprep.subr.bf16.mxu1 %v7483_v31  ;;  %v7631_v30 = vld [vmem:[%s10500_s3 + $0x30] ss:$8 sps:$4 sm:$0xff]   ;;  %v7636_v31 = vld [vmem:[%s10500_s3 + $0x44] ss:$8 sps:$4 sm:$0xff]  }
 0x1df   : > { %2372 = vmatpush1.bf16.msra.mxu1 %v7481_v33  ;;  %v7543_v33 = vld [vmem:[%s10499_s2 + $0x354] ss:$8 sps:$4 sm:$0xff]  }
 0x1e0   : > { %2373 = vmatprep.subr.bf16.mxu1 %v7486_v34  ;;  %v7634_v34 = vld [vmem:[%s10500_s3 + $0x40] ss:$8 sps:$4 sm:$0xff]  }
 0x1e3   : > { %2374 = vmatpush1.bf16.msra.mxu1 %v7484_v35  ;;  %v7639_v35 = vld [vmem:[%s10500_s3 + $0x54] ss:$8 sps:$4 sm:$0xff]  }
 0x1e4   : > { %2375 = vmatprep.subr.bf16.mxu1 %v7489_v36  ;;  %v7541_v36 = vld [vmem:[%s10499_s2 + $0x350] ss:$8 sps:$4 sm:$0xff]  }
 0x1e7   : > { %2376 = vmatpush1.bf16.msra.mxu1 %v7487_v29  ;;  %v7546_v29 = vld [vmem:[%s10499_s2 + $0x364] ss:$8 sps:$4 sm:$0xff]  }
 0x1e8   : > { %2377 = vmatprep.subr.bf16.mxu1 %v7492_v37  ;;  %v7637_v37 = vld [vmem:[%s10500_s3 + $0x50] ss:$8 sps:$4 sm:$0xff]  }
 0x1eb   : > { %2378 = vmatpush1.bf16.msra.mxu1 %v7490_v39  ;;  %v7642_v39 = vld [vmem:[%s10500_s3 + $0x64] ss:$8 sps:$4 sm:$0xff]  }
 0x1ec   : > { %2379 = vmatprep.subr.bf16.mxu1 %v7495_v40  ;;  %v7544_v40 = vld [vmem:[%s10499_s2 + $0x360] ss:$8 sps:$4 sm:$0xff]  }
 0x1ef   : > { %2380 = vmatpush1.bf16.msra.mxu1 %v7493_v41  ;;  %v7549_v41 = vld [vmem:[%s10499_s2 + $0x374] ss:$8 sps:$4 sm:$0xff]  }
 0x1f0   : > { %2381 = vmatprep.subr.bf16.mxu1 %v7498_v42  ;;  %v7640_v42 = vld [vmem:[%s10500_s3 + $0x60] ss:$8 sps:$4 sm:$0xff]  }
 0x1f3   : > { %2382 = vmatpush1.bf16.msra.mxu1 %v7496_v43  ;;  %v7645_v43 = vld [vmem:[%s10500_s3 + $0x74] ss:$8 sps:$4 sm:$0xff]  }
 0x1f4   : > { %2383 = vmatprep.subr.bf16.mxu1 %v7501_v45  ;;  %v7547_v45 = vld [vmem:[%s10499_s2 + $0x370] ss:$8 sps:$4 sm:$0xff]  }
 0x1f7   : > { %2384 = vmatpush1.bf16.msra.mxu1 %v7499_v47  ;;  %v7552_v47 = vld [vmem:[%s10499_s2 + $0x384] ss:$8 sps:$4 sm:$0xff]  }
 0x1f8   : > { %2385 = vmatprep.subr.bf16.mxu1 %v7504_v48  ;;  %v7643_v48 = vld [vmem:[%s10500_s3 + $0x70] ss:$8 sps:$4 sm:$0xff]  }
 0x1fb   : > { %2386 = vmatpush1.bf16.msra.mxu1 %v7502_v49  ;;  %v7550_v49 = vld [vmem:[%s10499_s2 + $0x380] ss:$8 sps:$4 sm:$0xff]  }
 0x1fc   : > { %2387 = vmatprep.subr.bf16.mxu1 %v7507_v50  ;;  %v7555_v50 = vld [vmem:[%s10499_s2 + $0x394] ss:$8 sps:$4 sm:$0xff]  }
 0x1ff   : > { %2388 = vmatpush1.bf16.msra.mxu1 %v7505_v51  ;;  %v7553_v51 = vld [vmem:[%s10499_s2 + $0x390] ss:$8 sps:$4 sm:$0xff]  }
 0x200   : > { %2389 = vmatprep.subr.bf16.mxu1 %v7510_v52  ;;  %v7558_v52 = vld [vmem:[%s10499_s2 + $0x3a4] ss:$8 sps:$4 sm:$0xff]  }
 0x203   : > { %2390 = vmatpush1.bf16.msra.mxu1 %v7508_v53  ;;  %v7556_v53 = vld [vmem:[%s10499_s2 + $0x3a0] ss:$8 sps:$4 sm:$0xff]  }
 0x204   : > { %2391 = vmatprep.subr.bf16.mxu1 %v7513_v54  ;;  %v7561_v54 = vld [vmem:[%s10499_s2 + $0x3b4] ss:$8 sps:$4 sm:$0xff]  }
 0x207   : > { %2392 = vmatpush1.bf16.msra.mxu1 %v7511_v55  ;;  %v7559_v55 = vld [vmem:[%s10499_s2 + $0x3b0] ss:$8 sps:$4 sm:$0xff]  }
 0x208   : > { %2393 = vmatprep.subr.bf16.mxu1 %v7516_v56  ;;  %v7564_v56 = vld [vmem:[%s10499_s2 + $0x3c4] ss:$8 sps:$4 sm:$0xff]  }
 0x20b   : > { %2394 = vmatpush1.bf16.msra.mxu1 %v7514_v57  ;;  %v7562_v57 = vld [vmem:[%s10499_s2 + $0x3c0] ss:$8 sps:$4 sm:$0xff]  }
 0x20c   : > { %2395 = vmatprep.subr.bf16.mxu1 %v7519_v58  ;;  %v1155_v58 = vld [vmem:[#allocation2 + $0x10] sm:$0xfe] }
 0x20d   : > { %v1207_v62 = vrot.slane %v1155_v58, 3  ;;  %v7618_v58 = vld [vmem:[%s10499_s2 + $0x4e4] ss:$8 sps:$4 sm:$0xff]  }
 0x20f   : > { %2396 = vmatpush1.bf16.msra.mxu1 %v7517_v61  ;;  %v1159_v61 = vld [vmem:[#allocation2 + $0x30] sm:$0x1] }
 0x210   : > { %2397 = vmatprep.subr.bf16.mxu1 %v7522_v63  ;;  %v1164_v63 = vld [vmem:[#allocation2 + $0x38] sm:$0x3] }
 0x211   : > { %v1235_v8 = vrot.slane %v1164_v63, 4  ;;  %v7621_v63 = vld [vmem:[%s10499_s2 + $0x4f4] ss:$8 sps:$4 sm:$0xff]  }
 0x213   : > { %2398 = vmatpush1.bf16.msra.mxu1 %v7520_v4  ;;  %v7570_v4 = vld [vmem:[%s10499_s2 + $0x3e4] ss:$8 sps:$4 sm:$0xff]   ;;  %v1236_v3 = vsel %vm443_vm3, %v1231_v7, %v1235_v8 }
 0x214   : > { %2399 = vmatprep.subr.bf16.mxu1 %v7525_v6  ;;  %v1213_v6 = vrot.slane %v1159_v61, 3  ;;  %v7648_v8 = vld [vmem:[%s10500_s3 + $0x84] ss:$8 sps:$4 sm:$0xff]  }
 0x217   : > { %2400 = vmatpush1.bf16.msra.mxu1 %v7523_v9  ;;  %v1210_v9 = vsel %vm432_vm2, %v1207_v62, %v1209_v5 }
 0x218   : > { %2412 = vmatprep.subr.bf16.mxu1 %v7528_v10  ;;  %v7568_v10 = vld [vmem:[%s10499_s2 + $0x3e0] ss:$8 sps:$4 sm:$0xff]   ;;  %v1249_v14 = vpack.c.bf16 %v1210_v9, %v1207_v62 }
 0x219   : > { %v7616_v62 = vld [vmem:[%s10499_s2 + $0x4e0] ss:$8 sps:$4 sm:$0xff]  }
 0x21a   : > { %2402 = vmatmul.mubr.bf16.vlgmr.msra.gmra.mrb[0].mxu1 %v8695_v24  ;;  %v7627_v24 = vld [vmem:[%s10500_s3 + $0x14] ss:$8 sps:$4 sm:$0xff]   ;;  %v7646_v9 = vld [vmem:[%s10500_s3 + $0x80] ss:$8 sps:$4 sm:$0xff]  }
 0x21b   : > { %2413 = vmatpush1.bf16.msra.mxu1 %v7526_v13  ;;  %2444 = vmatprep.mubr.bf16.mxu1 %v1466_v15  ;;  %v1214_v13 = vsel %vm432_vm2, %v1209_v5, %v1213_v6  ;;  %v7571_v15 = vld [vmem:[%s10499_s2 + $0x3f0] ss:$8 sps:$4 sm:$0xff]  }
 0x21c   : > { %2414 = vmatprep.subr.bf16.mxu1 %v7531_v16  ;;  %3681 = vmatprep.subr.bf16.mxu0 %v7627_v24  ;;  %v1252_v16 = vpack.c.bf16 %v1232_v11, %v1228_v38  ;;  %v1259_v17 = vpack.c.bf16 %v1214_v13, %v1214_v13  ;;  %v1461_v24 = vrot.slane %v1249_v14, 3  ;;  %v7649_v11 = vld [vmem:[%s10500_s3 + $0x90] ss:$8 sps:$4 sm:$0xff]   ;;  %v7654_v13 = vld [vmem:[%s10500_s3 + $0xa4] ss:$8 sps:$4 sm:$0xff]  }
 0x21d   : > { %3682 = vmatpush1.bf16.msra.mxu0 %v7625_v21  ;;  %v7657_v14 = vld [vmem:[%s10500_s3 + $0xb4] ss:$8 sps:$4 sm:$0xff]  }
 0x21e   : > { %3683 = vmatprep.subr.bf16.mxu0 %v7630_v22  ;;  %v1462_v21 = vrot.slane %v1259_v17, 3  ;;  %v7574_v22 = vld [vmem:[%s10499_s2 + $0x400] ss:$8 sps:$4 sm:$0xff]   ;;  %v7663_v17 = vld [vmem:[%s10500_s3 + $0xd4] ss:$8 sps:$4 sm:$0xff]  }
 0x21f   : > { %2415 = vmatpush1.bf16.msra.mxu1 %v7529_v19  ;;  %v1262_v19 = vpack.c.bf16 %v1236_v3, %v1236_v3  ;;  %v7655_v3 = vld [vmem:[%s10500_s3 + $0xb0] ss:$8 sps:$4 sm:$0xff]  }
 0x220   : > { %2416 = vmatprep.subr.bf16.mxu1 %v7534_v20  ;;  %v1470_v20 = vrot.slane %v1252_v16, 3  ;;  %v7660_v16 = vld [vmem:[%s10500_s3 + $0xc4] ss:$8 sps:$4 sm:$0xff]  }
 0x221   : > { %3684 = vmatpush1.bf16.msra.mxu0 %v7628_v0  ;;  %v1463_v0 = vsel %vm432_vm2, %v1461_v24, %v1462_v21  ;;  %v7664_v24 = vld [vmem:[%s10500_s3 + $0xe0] ss:$8 sps:$4 sm:$0xff]   ;;  %v7667_v21 = vld [vmem:[%s10500_s3 + $0xf0] ss:$8 sps:$4 sm:$0xff]  }
 0x222   : > { %3685 = vmatprep.subr.bf16.mxu0 %v7633_v26 }
 0x223   : > { %2417 = vmatpush1.bf16.msra.mxu1 %v7532_v23  ;;  %v1471_v23 = vrot.slane %v1262_v19, 3  ;;  %v7666_v19 = vld [vmem:[%s10500_s3 + $0xe4] ss:$8 sps:$4 sm:$0xff]  }
 0x224   : > { %2418 = vmatprep.subr.bf16.mxu1 %v7537_v25  ;;  %v7579_v25 = vld [vmem:[%s10499_s2 + $0x414] ss:$8 sps:$4 sm:$0xff]  }
 0x225   : > { %3686 = vmatpush1.bf16.msra.mxu0 %v7631_v30  ;;  %v1472_v26 = vsel %vm432_vm2, %v1470_v20, %v1471_v23  ;;  %v7580_v30 = vld [vmem:[%s10499_s2 + $0x420] ss:$8 sps:$4 sm:$0xff]   ;;  %v7669_v20 = vld [vmem:[%s10500_s3 + $0xf4] ss:$8 sps:$4 sm:$0xff]  }
 0x226   : > { %3687 = vmatprep.subr.bf16.mxu0 %v7636_v31  ;;  %v7585_v31 = vld [vmem:[%s10499_s2 + $0x434] ss:$8 sps:$4 sm:$0xff]   ;;  %v2498_v23 = vld [vmem:[%s10504_s7] ss:$2 sm:$0x3] }
 0x227   : > { %2419 = vmatpush1.bf16.msra.mxu1 %v7535_v27  ;;  %v7577_v27 = vld [vmem:[%s10499_s2 + $0x410] ss:$8 sps:$4 sm:$0xff]  }
 0x228   : > { %2420 = vmatprep.subr.bf16.mxu1 %v7540_v28  ;;  %v7582_v28 = vld [vmem:[%s10499_s2 + $0x424] ss:$8 sps:$4 sm:$0xff]  }
 0x229   : > { %3688 = vmatpush1.bf16.msra.mxu0 %v7634_v34  ;;  %v7586_v34 = vld [vmem:[%s10499_s2 + $0x440] ss:$8 sps:$4 sm:$0xff]  }
 0x22a   : > { %3689 = vmatprep.subr.bf16.mxu0 %v7639_v35  ;;  %v7591_v35 = vld [vmem:[%s10499_s2 + $0x454] ss:$8 sps:$4 sm:$0xff]  }
 0x22b   : > { %2421 = vmatpush1.bf16.msra.mxu1 %v7538_v32  ;;  %v7583_v32 = vld [vmem:[%s10499_s2 + $0x430] ss:$8 sps:$4 sm:$0xff]  }
 0x22c   : > { %2422 = vmatprep.subr.bf16.mxu1 %v7543_v33  ;;  %v7588_v33 = vld [vmem:[%s10499_s2 + $0x444] ss:$8 sps:$4 sm:$0xff]  }
 0x22d   : > { %3690 = vmatpush1.bf16.msra.mxu0 %v7637_v37  ;;  %v7592_v37 = vld [vmem:[%s10499_s2 + $0x460] ss:$8 sps:$4 sm:$0xff]  }
 0x22e   : > { %3691 = vmatprep.subr.bf16.mxu0 %v7642_v39  ;;  %v7597_v39 = vld [vmem:[%s10499_s2 + $0x474] ss:$8 sps:$4 sm:$0xff]  }
 0x22f   : > { %2423 = vmatpush1.bf16.msra.mxu1 %v7541_v36  ;;  %v7589_v36 = vld [vmem:[%s10499_s2 + $0x450] ss:$8 sps:$4 sm:$0xff]  }
 0x230   : > { %2424 = vmatprep.subr.bf16.mxu1 %v7546_v29  ;;  %v7594_v29 = vld [vmem:[%s10499_s2 + $0x464] ss:$8 sps:$4 sm:$0xff]  }
 0x231   : > { %3692 = vmatpush1.bf16.msra.mxu0 %v7640_v42  ;;  %v7598_v42 = vld [vmem:[%s10499_s2 + $0x480] ss:$8 sps:$4 sm:$0xff]  }
 0x232   : > { %3693 = vmatprep.subr.bf16.mxu0 %v7645_v43  ;;  %v7603_v43 = vld [vmem:[%s10499_s2 + $0x494] ss:$8 sps:$4 sm:$0xff]  }
 0x233   : > { %2425 = vmatpush1.bf16.msra.mxu1 %v7544_v40  ;;  %v7595_v40 = vld [vmem:[%s10499_s2 + $0x470] ss:$8 sps:$4 sm:$0xff]  }
 0x234   : > { %2426 = vmatprep.subr.bf16.mxu1 %v7549_v41  ;;  %v7600_v41 = vld [vmem:[%s10499_s2 + $0x484] ss:$8 sps:$4 sm:$0xff]  }
 0x235   : > { %3694 = vmatpush1.bf16.msra.mxu0 %v7643_v48  ;;  %v7604_v48 = vld [vmem:[%s10499_s2 + $0x4a0] ss:$8 sps:$4 sm:$0xff]  }
 0x236   : > { %3695 = vmatprep.subr.bf16.mxu0 %v7648_v8 }
 0x237   : > { %2427 = vmatpush1.bf16.msra.mxu1 %v7547_v45  ;;  %v7601_v45 = vld [vmem:[%s10499_s2 + $0x490] ss:$8 sps:$4 sm:$0xff]  }
 0x238   : > { %2428 = vmatprep.subr.bf16.mxu1 %v7552_v47  ;;  %v7606_v47 = vld [vmem:[%s10499_s2 + $0x4a4] ss:$8 sps:$4 sm:$0xff]  }
 0x239   : > { %3696 = vmatpush1.bf16.msra.mxu0 %v7646_v9 }
 0x23b   : > { %2429 = vmatpush1.bf16.msra.mxu1 %v7550_v49  ;;  %v7609_v49 = vld [vmem:[%s10499_s2 + $0x4b4] ss:$8 sps:$4 sm:$0xff]  }
 0x23c   : > { %2430 = vmatprep.subr.bf16.mxu1 %v7555_v50  ;;  %v7607_v50 = vld [vmem:[%s10499_s2 + $0x4b0] ss:$8 sps:$4 sm:$0xff]  }
 0x23f   : > { %2431 = vmatpush1.bf16.msra.mxu1 %v7553_v51  ;;  %v7612_v51 = vld [vmem:[%s10499_s2 + $0x4c4] ss:$8 sps:$4 sm:$0xff]  }
 0x240   : > { %2432 = vmatprep.subr.bf16.mxu1 %v7558_v52  ;;  %v7610_v52 = vld [vmem:[%s10499_s2 + $0x4c0] ss:$8 sps:$4 sm:$0xff]  }
 0x243   : > { %2433 = vmatpush1.bf16.msra.mxu1 %v7556_v53  ;;  %v1161_v53 = vld [vmem:[#allocation2 + $0x10] sm:$0xfc] }
 0x244   : > { %2434 = vmatprep.subr.bf16.mxu1 %v7561_v54  ;;  %v7615_v54 = vld [vmem:[%s10499_s2 + $0x4d4] ss:$8 sps:$4 sm:$0xff]  }
 0x247   : > { %2435 = vmatpush1.bf16.msra.mxu1 %v7559_v55  ;;  %v1163_v55 = vld [vmem:[#allocation2 + $0x30] sm:$0x3] }
 0x248   : > { %2436 = vmatprep.subr.bf16.mxu1 %v7564_v56  ;;  %v1227_v56 = vrot.slane %v1161_v53, 4  ;;  %v1233_v60 = vrot.slane %v1163_v55, 4 }
 0x24b   : > { %2437 = vmatpush1.bf16.msra.mxu1 %v7562_v57  ;;  %v7613_v57 = vld [vmem:[%s10499_s2 + $0x4d0] ss:$8 sps:$4 sm:$0xff]  }
 0x24c   : > { %2438 = vmatprep.subr.bf16.mxu1 %v7567_v59  ;;  %v1229_v59 = vrot.slane %v8683_v2, 4  ;;  %v7619_v2 = vld [vmem:[%s10499_s2 + $0x4f0] ss:$8 sps:$4 sm:$0xff]  }
 0x24e   : > { %v1230_v61 = vsel %vm443_vm3, %v1227_v56, %v1229_v59 }
 0x24f   : > { %2439 = vmatpush1.bf16.msra.mxu1 %v7565_v1  ;;  %v1234_v1 = vsel %vm443_vm3, %v1229_v59, %v1233_v60  ;;  %v1251_v38 = vpack.c.bf16 %v1230_v61, %v1227_v56  ;;  %v2539_v61 = vld [vmem:[#allocation2] sm:$0xc0] }
 0x250   : > { %2440 = vmatprep.subr.bf16.mxu1 %v7570_v4  ;;  %v1261_v4 = vpack.c.bf16 %v1234_v1, %v1234_v1 }
 0x251   : > { %v1467_v5 = vrot.slane %v1251_v38, 3 }
 0x252   : > { %v1468_v6 = vrot.slane %v1261_v4, 3 }
 0x253   : > { %2441 = vmatpush1.bf16.msra.mxu1 %v7568_v10  ;;  %v7651_v10 = vld [vmem:[%s10500_s3 + $0x94] ss:$8 sps:$4 sm:$0xff]  }
 0x254   : > { %2442 = vmatprep.subr.bf16.mxu1 %v7573_v12  ;;  %v1469_v7 = vsel %vm432_vm2, %v1467_v5, %v1468_v6  ;;  %3697 = vmatprep.subr.bf16.mxu0 %v7651_v10  ;;  %v7652_v12 = vld [vmem:[%s10500_s3 + $0xa0] ss:$8 sps:$4 sm:$0xff]  }
 0x255   : > { %3698 = vmatpush1.bf16.msra.mxu0 %v7649_v11 }
 0x256   : > { %3699 = vmatprep.subr.bf16.mxu0 %v7654_v13 }
 0x257   : > { %2443 = vmatpush1.bf16.msra.mxu1 %v7571_v15  ;;  %v7658_v15 = vld [vmem:[%s10500_s3 + $0xc0] ss:$8 sps:$4 sm:$0xff]  }
 0x258   : > { %2455 = vmatprep.subr.bf16.mxu1 %v7576_v18  ;;  %v7661_v18 = vld [vmem:[%s10500_s3 + $0xd0] ss:$8 sps:$4 sm:$0xff]  }
 0x259   : > { %3700 = vmatpush1.bf16.msra.mxu0 %v7652_v12 }
 0x25a   : > { %2445 = vmatmul.mubr.bf16.vlgmr.msra.gmra.mrb[0].mxu1 %v1463_v0  ;;  %3701 = vmatprep.subr.bf16.mxu0 %v7657_v14  ;;  %v2503_v0 = vrot.slane %v2498_v23, %v8666_v44 }
 0x25b   : > { %2456 = vmatpush1.bf16.msra.mxu1 %v7574_v22  ;;  %2487 = vmatprep.mubr.bf16.mxu1 %v1472_v26  ;;  %v7672_v22 = vld [vmem:[%s10500_s3 + $0x104] ss:$8 sps:$4 sm:$0xff]   ;;  %v2507_v26 = vrot.slane %v2498_v23, %v8671_v46  ;;  %v7675_v23 = vld [vmem:[%s10500_s3 + $0x114] ss:$8 sps:$4 sm:$0xff]  }
 0x25c   : > { %2457 = vmatprep.subr.bf16.mxu1 %v7579_v25  ;;  %v6677_v25 = vld [vmem:[%s10504_s7 + $0x1] ss:$2 sm:$0x3] }
 0x25d   : > { %3702 = vmatpush1.bf16.msra.mxu0 %v7655_v3 }
 0x25e   : > { %3703 = vmatprep.subr.bf16.mxu0 %v7660_v16 }
 0x25f   : > { %2458 = vmatpush1.bf16.msra.mxu1 %v7577_v27  ;;  %v2520_v27 = vrot.slane %v6677_v25, %v8666_v44 }
 0x260   : > { %2459 = vmatprep.subr.bf16.mxu1 %v7582_v28 }
 0x261   : > { %3704 = vmatpush1.bf16.msra.mxu0 %v7658_v15 }
 0x262   : > { %3705 = vmatprep.subr.bf16.mxu0 %v7663_v17 }
 0x263   : > { %2460 = vmatpush1.bf16.msra.mxu1 %v7580_v30  ;;  %v2524_v30 = vrot.slane %v6677_v25, %v8671_v46 }
 0x264   : > { %2461 = vmatprep.subr.bf16.mxu1 %v7585_v31 }
 0x265   : > { %3706 = vmatpush1.bf16.msra.mxu0 %v7661_v18 }
 0x266   : > { %3707 = vmatprep.subr.bf16.mxu0 %v7666_v19  ;;  %v7670_v19 = vld [vmem:[%s10500_s3 + $0x100] ss:$8 sps:$4 sm:$0xff]  }
 0x267   : > { %2462 = vmatpush1.bf16.msra.mxu1 %v7583_v32 }
 0x268   : > { %2463 = vmatprep.subr.bf16.mxu1 %v7588_v33 }
 0x269   : > { %3708 = vmatpush1.bf16.msra.mxu0 %v7664_v24 }
 0x26a   : > { %3709 = vmatprep.subr.bf16.mxu0 %v7669_v20 }
 0x26b   : > { %2464 = vmatpush1.bf16.msra.mxu1 %v7586_v34 }
 0x26c   : > { %2465 = vmatprep.subr.bf16.mxu1 %v7591_v35 }
 0x26d   : > { %3710 = vmatpush1.bf16.msra.mxu0 %v7667_v21 }
 0x26e   : > { %3722 = vmatprep.subr.bf16.mxu0 %v7672_v22 }
 0x26f   : > { %2466 = vmatpush1.bf16.msra.mxu1 %v7589_v36 }
 0x270   : > { %2467 = vmatprep.subr.bf16.mxu1 %v7594_v29 }
 0x273   : > { %2468 = vmatpush1.bf16.msra.mxu1 %v7592_v37 }
 0x274   : > { %2469 = vmatprep.subr.bf16.mxu1 %v7597_v39 }
 0x277   : > { %2470 = vmatpush1.bf16.msra.mxu1 %v7595_v40 }
 0x278   : > { %2471 = vmatprep.subr.bf16.mxu1 %v7600_v41 }
 0x27b   : > { %2472 = vmatpush1.bf16.msra.mxu1 %v7598_v42 }
 0x27c   : > { %2473 = vmatprep.subr.bf16.mxu1 %v7603_v43 }
 0x27f   : > { %2474 = vmatpush1.bf16.msra.mxu1 %v7601_v45 }
 0x280   : > { %2475 = vmatprep.subr.bf16.mxu1 %v7606_v47 }
 0x283   : > { %2476 = vmatpush1.bf16.msra.mxu1 %v7604_v48 }
 0x284   : > { %2477 = vmatprep.subr.bf16.mxu1 %v7609_v49 }
 0x287   : > { %2478 = vmatpush1.bf16.msra.mxu1 %v7607_v50 }
 0x288   : > { %2479 = vmatprep.subr.bf16.mxu1 %v7612_v51 }
 0x28b   : > { %2480 = vmatpush1.bf16.msra.mxu1 %v7610_v52 }
 0x28c   : > { %2481 = vmatprep.subr.bf16.mxu1 %v7615_v54  ;;  %v2540_v54 = vld [vmem:[#allocation2 + $0x8] sm:$0xc0] }
 0x28f   : > { %2482 = vmatpush1.bf16.msra.mxu1 %v7613_v57 }
 0x290   : > { %2483 = vmatprep.subr.bf16.mxu1 %v7618_v58  ;;  %v2546_v58 = vld [vmem:[#allocation2 + $0x8] sm:$0x80] }
 0x291   : > { %v2570_v4 = vrot.slane %v2546_v58, 1  ;;  %v2545_v58 = vld [vmem:[#allocation2] sm:$0x80] }
 0x293   : > { %2484 = vmatpush1.bf16.msra.mxu1 %v7616_v62 }
 0x294   : > { %2485 = vmatprep.subr.bf16.mxu1 %v7621_v63 }
 0x297   : > { %2486 = vmatpush1.bf16.msra.mxu1 %v7619_v2 }
 0x29a   : > { %2488 = vmatmul.mubr.bf16.vlgmr.msra.gmra.mrb[0].mxu1 %v1469_v7 }
 0x36d   : > { %v2489_v28 = vpop.f32.mrb[0].mxu1 }
 0x36e   : > { %v2510_v31 = vmul.f32 %v2503_v0, %v2489_v28  ;;  %v2491_v32 = vpop.f32.mrb[1].mxu1  ;;  %v7678_v28 = vld [vmem:[%s10500_s3 + $0x124] ss:$8 sps:$4 sm:$0xff]  }
 0x36f   : > { %v2511_v33 = vmul.f32 %v2507_v26, %v2491_v32  ;;  %v2493_v34 = vpop.f32.mrb[2].mxu1  ;;  %v7679_v32 = vld [vmem:[%s10500_s3 + $0x130] ss:$8 sps:$4 sm:$0xff]  }
 0x370   : > { %v2527_v35 = vadd.f32 %v2520_v27, %v2510_v31  ;;  %v2512_v36 = vmul.f32 %v2503_v0, %v2493_v34  ;;  %v2495_v29 = vpop.f32.mrb[3].mxu1  ;;  %v7681_v31 = vld [vmem:[%s10500_s3 + $0x134] ss:$8 sps:$4 sm:$0xff]   ;;  %v7682_v34 = vld [vmem:[%s10500_s3 + $0x140] ss:$8 sps:$4 sm:$0xff]  }
 0x371   : > { %v2528_v37 = vadd.f32 %v2524_v30, %v2511_v33  ;;  %v2513_v39 = vmul.f32 %v2507_v26, %v2495_v29  ;;  %v7684_v33 = vld [vmem:[%s10500_s3 + $0x144] ss:$8 sps:$4 sm:$0xff]  }
 0x372   : > { %8190 = vtanh.f32 %v2527_v35  ;;  %v2529_v40 = vadd.f32 %v2520_v27, %v2512_v36  ;;  %v7673_v27 = vld [vmem:[%s10500_s3 + $0x110] ss:$8 sps:$4 sm:$0xff]   ;;  %v7687_v35 = vld [vmem:[%s10500_s3 + $0x154] ss:$8 sps:$4 sm:$0xff]   ;;  %v7690_v29 = vld [vmem:[%s10500_s3 + $0x164] ss:$8 sps:$4 sm:$0xff]  }
 0x373   : > { %8192 = vtanh.f32 %v2528_v37  ;;  %v2530_v41 = vadd.f32 %v2524_v30, %v2513_v39  ;;  %v7676_v30 = vld [vmem:[%s10500_s3 + $0x120] ss:$8 sps:$4 sm:$0xff]   ;;  %v7685_v36 = vld [vmem:[%s10500_s3 + $0x150] ss:$8 sps:$4 sm:$0xff]   ;;  %v7693_v39 = vld [vmem:[%s10500_s3 + $0x174] ss:$8 sps:$4 sm:$0xff]  }
 0x374   : > { %8194 = vtanh.f32 %v2529_v40  ;;  %v7688_v37 = vld [vmem:[%s10500_s3 + $0x160] ss:$8 sps:$4 sm:$0xff]   ;;  %v7691_v40 = vld [vmem:[%s10500_s3 + $0x170] ss:$8 sps:$4 sm:$0xff]  }
 0x375   : > { %8196 = vtanh.f32 %v2530_v41  ;;  %v7696_v41 = vld [vmem:[%s10500_s3 + $0x184] ss:$8 sps:$4 sm:$0xff]  }
 0x37c   : > { %v9218_v42 = vpop.eup %8190 }
 0x37d   : > { %v8193_v43 = vpop.eup %8192  ;;  %2535 = vst [vmem:[#allocation2 + $0x10] sm:$0xff] %v9218_v42  ;;  %v2585_v48 = vrot.slane %v9218_v42, 2  ;;  %v2639_v8 = vpack.c.bf16 %v9218_v42, %v2539_v61  ;;  %v7714_v61 = vld [vmem:[%s10500_s3 + $0x1e4] ss:$8 sps:$4 sm:$0xff]  }
 0x37e   : > { %v9221_v45 = vpop.eup %8194  ;;  %2536 = vst [vmem:[#allocation2 + $0x18] sm:$0xff] %v8193_v43  ;;  %v2586_v50 = vrot.slane %v8193_v43, 2  ;;  %v2640_v1 = vpack.c.bf16 %v8193_v43, %v2540_v54  ;;  %v2571_v5 = vrot.slane %v8193_v43, 1  ;;  %v7694_v43 = vld [vmem:[%s10500_s3 + $0x180] ss:$8 sps:$4 sm:$0xff]  }
 0x37f   : > { %v9223_v47 = vpop.eup %8196  ;;  %2537 = vst [vmem:[#allocation2 + $0x20] sm:$0xff] %v9221_v45  ;;  %v2587_v49 = vrot.slane %v9221_v45, 2  ;;  %v2839_v24 = vrot.slane %v2639_v8, 3  ;;  %v7708_v54 = vld [vmem:[%s10500_s3 + $0x1c4] ss:$8 sps:$4 sm:$0xff]  }
 0x380   : > { %2538 = vst [vmem:[#allocation2 + $0x28] sm:$0xff] %v9223_v47  ;;  %v2589_v51 = vrot.slane %v9223_v47, 2  ;;  %v2842_v14 = vrot.slane %v2640_v1, 3  ;;  %v2572_v15 = vsel %vm413_vm1, %v2570_v4, %v2571_v5  ;;  %v7720_v8 = vld [vmem:[%s10500_s3 + $0x204] ss:$8 sps:$4 sm:$0xff]  }
 0x381   : > { %v2588_v52 = vsel %vm423_vm0, %v2585_v48, %v2587_v49  ;;  %v2653_v53 = vpack.c.bf16 %v2587_v49, %v2587_v49  ;;  %v7697_v49 = vld [vmem:[%s10500_s3 + $0x190] ss:$8 sps:$4 sm:$0xff]  }
 0x382   : > { %v2590_v55 = vsel %vm423_vm0, %v2586_v50, %v2589_v51  ;;  %v2654_v56 = vpack.c.bf16 %v2589_v51, %v2589_v51  ;;  %v2643_v57 = vpack.c.bf16 %v2588_v52, %v2585_v48  ;;  %v7699_v48 = vld [vmem:[%s10500_s3 + $0x194] ss:$8 sps:$4 sm:$0xff]   ;;  %v7700_v51 = vld [vmem:[%s10500_s3 + $0x1a0] ss:$8 sps:$4 sm:$0xff]  }
 0x383   : > { %v2644_v59 = vpack.c.bf16 %v2590_v55, %v2586_v50  ;;  %v2852_v60 = vrot.slane %v2653_v53, 3  ;;  %v7702_v50 = vld [vmem:[%s10500_s3 + $0x1a4] ss:$8 sps:$4 sm:$0xff]   ;;  %v7705_v52 = vld [vmem:[%s10500_s3 + $0x1b4] ss:$8 sps:$4 sm:$0xff]  }
 0x384   : > { %v2855_v62 = vrot.slane %v2654_v56, 3  ;;  %v2851_v63 = vrot.slane %v2643_v57, 3  ;;  %v7703_v53 = vld [vmem:[%s10500_s3 + $0x1b0] ss:$8 sps:$4 sm:$0xff]   ;;  %v7706_v55 = vld [vmem:[%s10500_s3 + $0x1c0] ss:$8 sps:$4 sm:$0xff]  }
 0x385   : > { %v2854_v38 = vrot.slane %v2644_v59, 3  ;;  %v7711_v57 = vld [vmem:[%s10500_s3 + $0x1d4] ss:$8 sps:$4 sm:$0xff]  }
 0x386   : > { %v2543_v2 = vld [vmem:[#allocation2 + $0x20] sm:$0x3f]  ;;  %v9233_v6 = vsel %vm432_vm2, %v2851_v63, %v2852_v60  ;;  %v7709_v60 = vld [vmem:[%s10500_s3 + $0x1d0] ss:$8 sps:$4 sm:$0xff]   ;;  %v2568_v63 = vrot.slane %v9218_v42, 1 }
 0x387   : > { %v2544_v7 = vld [vmem:[#allocation2 + $0x28] sm:$0x3f]  ;;  %v2649_v9 = vpack.c.bf16 %v2543_v2, %v2543_v2  ;;  %v9237_v11 = vsel %vm432_vm2, %v2854_v38, %v2855_v62  ;;  %v2547_v56 = vld [vmem:[#allocation2 + $0x20] sm:$0x7f]  ;;  %v2567_v62 = vrot.slane %v2545_v58, 1 }
 0x388   : > { %v2548_v10 = vld [vmem:[#allocation2 + $0x28] sm:$0x7f]  ;;  %v2650_v12 = vpack.c.bf16 %v2544_v7, %v2544_v7  ;;  %v2573_v59 = vrot.slane %v2547_v56, 1  ;;  %v7717_v2 = vld [vmem:[%s10500_s3 + $0x1f4] ss:$8 sps:$4 sm:$0xff]  }
 0x389   : > { %v2575_v13 = vrot.slane %v2548_v10, 1  ;;  %v2840_v3 = vrot.slane %v2649_v9, 3  ;;  %v7712_v38 = vld [vmem:[%s10500_s3 + $0x1e0] ss:$8 sps:$4 sm:$0xff]   ;;  %v2569_v4 = vsel %vm413_vm1, %v2567_v62, %v2568_v63  ;;  %v7715_v42 = vld [vmem:[%s10500_s3 + $0x1f0] ss:$8 sps:$4 sm:$0xff]  }
 0x38a   : > { %v2843_v16 = vrot.slane %v2650_v12, 3  ;;  %v2574_v1 = vsel %vm413_vm1, %v2568_v63, %v2573_v59  ;;  %v2651_v7 = vpack.c.bf16 %v2573_v59, %v2573_v59  ;;  %v7718_v12 = vld [vmem:[%s10500_s3 + $0x200] ss:$8 sps:$4 sm:$0xff]   ;;  %v7864_v63 = vld [vmem:[%s10501_s4 + $0x4] ss:$8 sps:$4 sm:$0xff]  }
 0x38b   : > { %v2576_v17 = vsel %vm413_vm1, %v2571_v5, %v2575_v13  ;;  %v2652_v18 = vpack.c.bf16 %v2575_v13, %v2575_v13  ;;  %v2841_v25 = vsel %vm432_vm2, %v2839_v24, %v2840_v3  ;;  %v2641_v5 = vpack.c.bf16 %v2574_v1, %v2569_v4  ;;  %v7723_v13 = vld [vmem:[%s10500_s3 + $0x214] ss:$8 sps:$4 sm:$0xff]   ;;  %v7721_v3 = vld [vmem:[%s10500_s3 + $0x210] ss:$8 sps:$4 sm:$0xff]   ;;  %v7766_v58 = vld [vmem:[%s10500_s3 + $0x300] ss:$8 sps:$4 sm:$0xff]   ;;  %5075 = vmatprep.subr.bf16.mxu1 %v7864_v63 }
 0x38c   : > { %v2642_v20 = vpack.c.bf16 %v2576_v17, %v2572_v15  ;;  %v2844_v21 = vsel %vm432_vm2, %v2842_v14, %v2843_v16  ;;  %v2846_v10 = vrot.slane %v2651_v7, 3  ;;  %v7726_v16 = vld [vmem:[%s10500_s3 + $0x224] ss:$8 sps:$4 sm:$0xff]   ;;  %v7724_v15 = vld [vmem:[%s10500_s3 + $0x220] ss:$8 sps:$4 sm:$0xff]  }
 0x38d   : > { %v2849_v22 = vrot.slane %v2652_v18, 3  ;;  %3711 = vmatprep.mubr.bf16.mxu0 %v2844_v21  ;;  %v2845_v9 = vrot.slane %v2641_v5, 3  ;;  %v7729_v17 = vld [vmem:[%s10500_s3 + $0x234] ss:$8 sps:$4 sm:$0xff]   ;;  %v7732_v18 = vld [vmem:[%s10500_s3 + $0x244] ss:$8 sps:$4 sm:$0xff]  }
 0x38e   : > { %v2848_v0 = vrot.slane %v2642_v20, 3  ;;  %3712 = vmatmul.mubr.bf16.vlgmr.msra.gmra.mrb[4].mxu0 %v2841_v25  ;;  %v7735_v24 = vld [vmem:[%s10500_s3 + $0x254] ss:$8 sps:$4 sm:$0xff]   ;;  %v7733_v20 = vld [vmem:[%s10500_s3 + $0x250] ss:$8 sps:$4 sm:$0xff]  }
 0x38f   : > { %3723 = vmatpush1.bf16.msra.mxu0 %v7670_v19  ;;  %v2847_v14 = vsel %vm432_vm2, %v2845_v9, %v2846_v10  ;;  %v7730_v19 = vld [vmem:[%s10500_s3 + $0x240] ss:$8 sps:$4 sm:$0xff]   ;;  %v7738_v21 = vld [vmem:[%s10500_s3 + $0x264] ss:$8 sps:$4 sm:$0xff]   ;;  %v7739_v25 = vld [vmem:[%s10500_s3 + $0x270] ss:$8 sps:$4 sm:$0xff]  }
 0x390   : > { %v2850_v26 = vsel %vm432_vm2, %v2848_v0, %v2849_v22  ;;  %3724 = vmatprep.subr.bf16.mxu0 %v7675_v23  ;;  %v7736_v22 = vld [vmem:[%s10500_s3 + $0x260] ss:$8 sps:$4 sm:$0xff]   ;;  %v7741_v23 = vld [vmem:[%s10500_s3 + $0x274] ss:$8 sps:$4 sm:$0xff]   ;;  %v7744_v0 = vld [vmem:[%s10500_s3 + $0x284] ss:$8 sps:$4 sm:$0xff]  }
 0x391   : > { %3754 = vmatprep.mubr.bf16.mxu0 %v2850_v26  ;;  %v7742_v26 = vld [vmem:[%s10500_s3 + $0x280] ss:$8 sps:$4 sm:$0xff]   ;;  %v7769_v1 = vld [vmem:[%s10500_s3 + $0x310] ss:$8 sps:$4 sm:$0xff]   ;;  %v7870_v4 = vld [vmem:[%s10501_s4 + $0x24] ss:$8 sps:$4 sm:$0xff]  }
 0x392   : > { %v7862_v62 = vld [vmem:[%s10501_s4] ss:$8 sps:$4 sm:$0xff]   ;;  %v7777_v7 = vld [vmem:[%s10500_s3 + $0x334] ss:$8 sps:$4 sm:$0xff]   ;;  %v7775_v9 = vld [vmem:[%s10500_s3 + $0x330] ss:$8 sps:$4 sm:$0xff]  }
 0x393   : > { %3725 = vmatpush1.bf16.msra.mxu0 %v7673_v27  ;;  %v7747_v27 = vld [vmem:[%s10500_s3 + $0x294] ss:$8 sps:$4 sm:$0xff]   ;;  %5076 = vmatpush1.bf16.msra.mxu1 %v7862_v62  ;;  %v7772_v5 = vld [vmem:[%s10500_s3 + $0x320] ss:$8 sps:$4 sm:$0xff]   ;;  %v7780_v10 = vld [vmem:[%s10500_s3 + $0x344] ss:$8 sps:$4 sm:$0xff]  }
 0x394   : > { %3726 = vmatprep.subr.bf16.mxu0 %v7678_v28  ;;  %v7745_v28 = vld [vmem:[%s10500_s3 + $0x290] ss:$8 sps:$4 sm:$0xff]   ;;  %v7816_v63 = vld [vmem:[%s10500_s3 + $0x404] ss:$8 sps:$4 sm:$0xff]  }
 0x397   : > { %3727 = vmatpush1.bf16.msra.mxu0 %v7676_v30  ;;  %v7750_v30 = vld [vmem:[%s10500_s3 + $0x2a4] ss:$8 sps:$4 sm:$0xff]  }
 0x398   : > { %3728 = vmatprep.subr.bf16.mxu0 %v7681_v31  ;;  %v7748_v31 = vld [vmem:[%s10500_s3 + $0x2a0] ss:$8 sps:$4 sm:$0xff]  }
 0x39b   : > { %3729 = vmatpush1.bf16.msra.mxu0 %v7679_v32  ;;  %v7753_v32 = vld [vmem:[%s10500_s3 + $0x2b4] ss:$8 sps:$4 sm:$0xff]  }
 0x39c   : > { %3730 = vmatprep.subr.bf16.mxu0 %v7684_v33  ;;  %v7751_v33 = vld [vmem:[%s10500_s3 + $0x2b0] ss:$8 sps:$4 sm:$0xff]  }
 0x39f   : > { %3731 = vmatpush1.bf16.msra.mxu0 %v7682_v34  ;;  %v7756_v34 = vld [vmem:[%s10500_s3 + $0x2c4] ss:$8 sps:$4 sm:$0xff]  }
 0x3a0   : > { %3732 = vmatprep.subr.bf16.mxu0 %v7687_v35  ;;  %v7754_v35 = vld [vmem:[%s10500_s3 + $0x2c0] ss:$8 sps:$4 sm:$0xff]  }
 0x3a3   : > { %3733 = vmatpush1.bf16.msra.mxu0 %v7685_v36  ;;  %v7759_v36 = vld [vmem:[%s10500_s3 + $0x2d4] ss:$8 sps:$4 sm:$0xff]  }
 0x3a4   : > { %3734 = vmatprep.subr.bf16.mxu0 %v7690_v29  ;;  %v2552_v29 = vld [vmem:[#allocation2 + $0x18] sm:$0xfe] }
 0x3a7   : > { %3735 = vmatpush1.bf16.msra.mxu0 %v7688_v37  ;;  %v2556_v37 = vld [vmem:[#allocation2 + $0x38] sm:$0x1] }
 0x3a8   : > { %3736 = vmatprep.subr.bf16.mxu0 %v7693_v39  ;;  %v7757_v39 = vld [vmem:[%s10500_s3 + $0x2d0] ss:$8 sps:$4 sm:$0xff]  }
 0x3ab   : > { %3737 = vmatpush1.bf16.msra.mxu0 %v7691_v40  ;;  %v2604_v40 = vrot.slane %v2552_v29, 3  ;;  %v7807_v29 = vld [vmem:[%s10500_s3 + $0x3d4] ss:$8 sps:$4 sm:$0xff]  }
 0x3ac   : > { %3738 = vmatprep.subr.bf16.mxu0 %v7696_v41  ;;  %v7762_v41 = vld [vmem:[%s10500_s3 + $0x2e4] ss:$8 sps:$4 sm:$0xff]  }
 0x3af   : > { %3739 = vmatpush1.bf16.msra.mxu0 %v7694_v43  ;;  %v2607_v43 = vrot.slane %v9223_v47, 3 }
 0x3b0   : > { %3740 = vmatprep.subr.bf16.mxu0 %v7699_v48  ;;  %v2611_v48 = vrot.slane %v2556_v37, 3  ;;  %v2558_v37 = vld [vmem:[#allocation2 + $0x18] sm:$0xfc] }
 0x3b3   : > { %3741 = vmatpush1.bf16.msra.mxu0 %v7697_v49  ;;  %v7760_v49 = vld [vmem:[%s10500_s3 + $0x2e0] ss:$8 sps:$4 sm:$0xff]  }
 0x3b4   : > { %3742 = vmatprep.subr.bf16.mxu0 %v7702_v50  ;;  %v2608_v50 = vsel %vm432_vm2, %v2604_v40, %v2607_v43 }
 0x3b7   : > { %3743 = vmatpush1.bf16.msra.mxu0 %v7700_v51  ;;  %v7765_v51 = vld [vmem:[%s10500_s3 + $0x2f4] ss:$8 sps:$4 sm:$0xff]  }
 0x3b8   : > { %3744 = vmatprep.subr.bf16.mxu0 %v7705_v52  ;;  %v2612_v52 = vsel %vm432_vm2, %v2607_v43, %v2611_v48  ;;  %v7805_v43 = vld [vmem:[%s10500_s3 + $0x3d0] ss:$8 sps:$4 sm:$0xff]   ;;  %v2624_v48 = vrot.slane %v2558_v37, 4 }
 0x3b9   : > { %v2656_v56 = vpack.c.bf16 %v2612_v52, %v2612_v52  ;;  %v2627_v52 = vrot.slane %v9223_v47, 4 }
 0x3bb   : > { %3745 = vmatpush1.bf16.msra.mxu0 %v7703_v53  ;;  %v2646_v53 = vpack.c.bf16 %v2608_v50, %v2604_v40  ;;  %v2861_v59 = vrot.slane %v2656_v56, 3  ;;  %v2605_v50 = vrot.slane %v9221_v45, 3  ;;  %v2628_v56 = vsel %vm443_vm3, %v2624_v48, %v2627_v52 }
 0x3bc   : > { %3746 = vmatprep.subr.bf16.mxu0 %v7708_v54  ;;  %v7763_v54 = vld [vmem:[%s10500_s3 + $0x2f0] ss:$8 sps:$4 sm:$0xff]  }
 0x3bf   : > { %3747 = vmatpush1.bf16.msra.mxu0 %v7706_v55  ;;  %v7768_v55 = vld [vmem:[%s10500_s3 + $0x304] ss:$8 sps:$4 sm:$0xff]  }
 0x3c0   : > { %3748 = vmatprep.subr.bf16.mxu0 %v7711_v57  ;;  %v2860_v57 = vrot.slane %v2646_v53, 3 }
 0x3c3   : > { %3749 = vmatpush1.bf16.msra.mxu0 %v7709_v60  ;;  %v7771_v60 = vld [vmem:[%s10500_s3 + $0x314] ss:$8 sps:$4 sm:$0xff]  }
 0x3c4   : > { %3750 = vmatprep.subr.bf16.mxu0 %v7714_v61  ;;  %v2862_v61 = vsel %vm432_vm2, %v2860_v57, %v2861_v59  ;;  %v7813_v57 = vld [vmem:[%s10500_s3 + $0x3f4] ss:$8 sps:$4 sm:$0xff]  }
 0x3c7   : > { %3751 = vmatpush1.bf16.msra.mxu0 %v7712_v38  ;;  %v7774_v38 = vld [vmem:[%s10500_s3 + $0x324] ss:$8 sps:$4 sm:$0xff]  }
 0x3c8   : > { %3752 = vmatprep.subr.bf16.mxu0 %v7717_v2  ;;  %v7865_v2 = vld [vmem:[%s10501_s4 + $0x10] ss:$8 sps:$4 sm:$0xff]  }
 0x3cb   : > { %3753 = vmatpush1.bf16.msra.mxu0 %v7715_v42  ;;  %v7868_v42 = vld [vmem:[%s10501_s4 + $0x20] ss:$8 sps:$4 sm:$0xff]  }
 0x3cc   : > { %3765 = vmatprep.subr.bf16.mxu0 %v7720_v8  ;;  %v7873_v8 = vld [vmem:[%s10501_s4 + $0x34] ss:$8 sps:$4 sm:$0xff]  }
 0x3ce   : > { %3755 = vmatmul.mubr.bf16.vlgmr.msra.gmra.mrb[4].mxu0 %v2847_v14  ;;  %v7778_v14 = vld [vmem:[%s10500_s3 + $0x340] ss:$8 sps:$4 sm:$0xff]  }
 0x3cf   : > { %3766 = vmatpush1.bf16.msra.mxu0 %v7718_v12  ;;  %3797 = vmatprep.mubr.bf16.mxu0 %v9237_v11  ;;  %v7727_v11 = vld [vmem:[%s10500_s3 + $0x230] ss:$8 sps:$4 sm:$0xff]  }
 0x3d0   : > { %3767 = vmatprep.subr.bf16.mxu0 %v7723_v13  ;;  %v7871_v12 = vld [vmem:[%s10501_s4 + $0x30] ss:$8 sps:$4 sm:$0xff]   ;;  %v7876_v13 = vld [vmem:[%s10501_s4 + $0x44] ss:$8 sps:$4 sm:$0xff]  }
 0x3d3   : > { %3768 = vmatpush1.bf16.msra.mxu0 %v7721_v3  ;;  %v7783_v3 = vld [vmem:[%s10500_s3 + $0x354] ss:$8 sps:$4 sm:$0xff]  }
 0x3d4   : > { %3769 = vmatprep.subr.bf16.mxu0 %v7726_v16  ;;  %v7874_v16 = vld [vmem:[%s10501_s4 + $0x40] ss:$8 sps:$4 sm:$0xff]  }
 0x3d7   : > { %3770 = vmatpush1.bf16.msra.mxu0 %v7724_v15  ;;  %v7879_v15 = vld [vmem:[%s10501_s4 + $0x54] ss:$8 sps:$4 sm:$0xff]  }
 0x3d8   : > { %3771 = vmatprep.subr.bf16.mxu0 %v7729_v17  ;;  %v7781_v17 = vld [vmem:[%s10500_s3 + $0x350] ss:$8 sps:$4 sm:$0xff]  }
 0x3db   : > { %3772 = vmatpush1.bf16.msra.mxu0 %v7727_v11  ;;  %v7786_v11 = vld [vmem:[%s10500_s3 + $0x364] ss:$8 sps:$4 sm:$0xff]  }
 0x3dc   : > { %3773 = vmatprep.subr.bf16.mxu0 %v7732_v18  ;;  %v7877_v18 = vld [vmem:[%s10501_s4 + $0x50] ss:$8 sps:$4 sm:$0xff]  }
 0x3df   : > { %3774 = vmatpush1.bf16.msra.mxu0 %v7730_v19  ;;  %v7882_v19 = vld [vmem:[%s10501_s4 + $0x64] ss:$8 sps:$4 sm:$0xff]  }
 0x3e0   : > { %3775 = vmatprep.subr.bf16.mxu0 %v7735_v24  ;;  %v7784_v24 = vld [vmem:[%s10500_s3 + $0x360] ss:$8 sps:$4 sm:$0xff]  }
 0x3e3   : > { %3776 = vmatpush1.bf16.msra.mxu0 %v7733_v20  ;;  %v7789_v20 = vld [vmem:[%s10500_s3 + $0x374] ss:$8 sps:$4 sm:$0xff]  }
 0x3e4   : > { %3777 = vmatprep.subr.bf16.mxu0 %v7738_v21  ;;  %v7880_v21 = vld [vmem:[%s10501_s4 + $0x60] ss:$8 sps:$4 sm:$0xff]  }
 0x3e7   : > { %3778 = vmatpush1.bf16.msra.mxu0 %v7736_v22  ;;  %v7885_v22 = vld [vmem:[%s10501_s4 + $0x74] ss:$8 sps:$4 sm:$0xff]  }
 0x3e8   : > { %3779 = vmatprep.subr.bf16.mxu0 %v7741_v23  ;;  %v7787_v23 = vld [vmem:[%s10500_s3 + $0x370] ss:$8 sps:$4 sm:$0xff]  }
 0x3eb   : > { %3780 = vmatpush1.bf16.msra.mxu0 %v7739_v25  ;;  %v7792_v25 = vld [vmem:[%s10500_s3 + $0x384] ss:$8 sps:$4 sm:$0xff]  }
 0x3ec   : > { %3781 = vmatprep.subr.bf16.mxu0 %v7744_v0  ;;  %v7883_v0 = vld [vmem:[%s10501_s4 + $0x70] ss:$8 sps:$4 sm:$0xff]  }
 0x3ef   : > { %3782 = vmatpush1.bf16.msra.mxu0 %v7742_v26  ;;  %v7790_v26 = vld [vmem:[%s10500_s3 + $0x380] ss:$8 sps:$4 sm:$0xff]  }
 0x3f0   : > { %3783 = vmatprep.subr.bf16.mxu0 %v7747_v27  ;;  %v7795_v27 = vld [vmem:[%s10500_s3 + $0x394] ss:$8 sps:$4 sm:$0xff]  }
 0x3f3   : > { %3784 = vmatpush1.bf16.msra.mxu0 %v7745_v28  ;;  %v7793_v28 = vld [vmem:[%s10500_s3 + $0x390] ss:$8 sps:$4 sm:$0xff]  }
 0x3f4   : > { %3785 = vmatprep.subr.bf16.mxu0 %v7750_v30  ;;  %v7798_v30 = vld [vmem:[%s10500_s3 + $0x3a4] ss:$8 sps:$4 sm:$0xff]  }
 0x3f7   : > { %3786 = vmatpush1.bf16.msra.mxu0 %v7748_v31  ;;  %v7796_v31 = vld [vmem:[%s10500_s3 + $0x3a0] ss:$8 sps:$4 sm:$0xff]  }
 0x3f8   : > { %3787 = vmatprep.subr.bf16.mxu0 %v7753_v32  ;;  %v7801_v32 = vld [vmem:[%s10500_s3 + $0x3b4] ss:$8 sps:$4 sm:$0xff]  }
 0x3fb   : > { %3788 = vmatpush1.bf16.msra.mxu0 %v7751_v33  ;;  %v7799_v33 = vld [vmem:[%s10500_s3 + $0x3b0] ss:$8 sps:$4 sm:$0xff]  }
 0x3fc   : > { %3789 = vmatprep.subr.bf16.mxu0 %v7756_v34  ;;  %v7804_v34 = vld [vmem:[%s10500_s3 + $0x3c4] ss:$8 sps:$4 sm:$0xff]  }
 0x3ff   : > { %3790 = vmatpush1.bf16.msra.mxu0 %v7754_v35  ;;  %v7802_v35 = vld [vmem:[%s10500_s3 + $0x3c0] ss:$8 sps:$4 sm:$0xff]  }
 0x400   : > { %3791 = vmatprep.subr.bf16.mxu0 %v7759_v36  ;;  %v2551_v36 = vld [vmem:[#allocation2 + $0x10] sm:$0xfe] }
 0x401   : > { %v2603_v40 = vrot.slane %v2551_v36, 3  ;;  %v7858_v36 = vld [vmem:[%s10500_s3 + $0x4e4] ss:$8 sps:$4 sm:$0xff]  }
 0x403   : > { %3792 = vmatpush1.bf16.msra.mxu0 %v7757_v39  ;;  %v2555_v39 = vld [vmem:[#allocation2 + $0x30] sm:$0x1] }
 0x404   : > { %3793 = vmatprep.subr.bf16.mxu0 %v7762_v41  ;;  %v2560_v41 = vld [vmem:[#allocation2 + $0x38] sm:$0x3] }
 0x405   : > { %v2631_v53 = vrot.slane %v2560_v41, 4  ;;  %v7861_v41 = vld [vmem:[%s10500_s3 + $0x4f4] ss:$8 sps:$4 sm:$0xff]  }
 0x407   : > { %3794 = vmatpush1.bf16.msra.mxu0 %v7760_v49  ;;  %v7810_v49 = vld [vmem:[%s10500_s3 + $0x3e4] ss:$8 sps:$4 sm:$0xff]   ;;  %v2632_v47 = vsel %vm443_vm3, %v2627_v52, %v2631_v53 }
 0x408   : > { %3795 = vmatprep.subr.bf16.mxu0 %v7765_v51  ;;  %v2609_v51 = vrot.slane %v2555_v39, 3  ;;  %v7888_v53 = vld [vmem:[%s10501_s4 + $0x84] ss:$8 sps:$4 sm:$0xff]  }
 0x40b   : > { %3796 = vmatpush1.bf16.msra.mxu0 %v7763_v54  ;;  %v2606_v54 = vsel %vm432_vm2, %v2603_v40, %v2605_v50 }
 0x40c   : > { %3808 = vmatprep.subr.bf16.mxu0 %v7768_v55  ;;  %v7808_v55 = vld [vmem:[%s10500_s3 + $0x3e0] ss:$8 sps:$4 sm:$0xff]   ;;  %v2645_v59 = vpack.c.bf16 %v2606_v54, %v2603_v40 }
 0x40d   : > { %v7856_v40 = vld [vmem:[%s10500_s3 + $0x4e0] ss:$8 sps:$4 sm:$0xff]  }
 0x40e   : > { %3798 = vmatmul.mubr.bf16.vlgmr.msra.gmra.mrb[4].mxu0 %v9233_v6  ;;  %v7867_v6 = vld [vmem:[%s10501_s4 + $0x14] ss:$8 sps:$4 sm:$0xff]   ;;  %v7886_v54 = vld [vmem:[%s10501_s4 + $0x80] ss:$8 sps:$4 sm:$0xff]  }
 0x40f   : > { %3809 = vmatpush1.bf16.msra.mxu0 %v7766_v58  ;;  %3840 = vmatprep.mubr.bf16.mxu0 %v2862_v61  ;;  %v2610_v58 = vsel %vm432_vm2, %v2605_v50, %v2609_v51  ;;  %v7811_v61 = vld [vmem:[%s10500_s3 + $0x3f0] ss:$8 sps:$4 sm:$0xff]  }
 0x410   : > { %3810 = vmatprep.subr.bf16.mxu0 %v7771_v60  ;;  %5077 = vmatprep.subr.bf16.mxu1 %v7867_v6  ;;  %v2648_v60 = vpack.c.bf16 %v2628_v56, %v2624_v48  ;;  %v2655_v62 = vpack.c.bf16 %v2610_v58, %v2610_v58  ;;  %v2857_v6 = vrot.slane %v2645_v59, 3  ;;  %v7889_v56 = vld [vmem:[%s10501_s4 + $0x90] ss:$8 sps:$4 sm:$0xff]   ;;  %v7894_v58 = vld [vmem:[%s10501_s4 + $0xa4] ss:$8 sps:$4 sm:$0xff]  }
 0x411   : > { %5078 = vmatpush1.bf16.msra.mxu1 %v7865_v2  ;;  %v7897_v59 = vld [vmem:[%s10501_s4 + $0xb4] ss:$8 sps:$4 sm:$0xff]  }
 0x412   : > { %5079 = vmatprep.subr.bf16.mxu1 %v7870_v4  ;;  %v2858_v2 = vrot.slane %v2655_v62, 3  ;;  %v7814_v4 = vld [vmem:[%s10500_s3 + $0x400] ss:$8 sps:$4 sm:$0xff]   ;;  %v7903_v62 = vld [vmem:[%s10501_s4 + $0xd4] ss:$8 sps:$4 sm:$0xff]  }
 0x413   : > { %3811 = vmatpush1.bf16.msra.mxu0 %v7769_v1  ;;  %v2658_v1 = vpack.c.bf16 %v2632_v47, %v2632_v47  ;;  %v7895_v47 = vld [vmem:[%s10501_s4 + $0xb0] ss:$8 sps:$4 sm:$0xff]  }
 0x414   : > { %3812 = vmatprep.subr.bf16.mxu0 %v7774_v38  ;;  %v2866_v38 = vrot.slane %v2648_v60, 3  ;;  %v7900_v60 = vld [vmem:[%s10501_s4 + $0xc4] ss:$8 sps:$4 sm:$0xff]  }
 0x415   : > { %5080 = vmatpush1.bf16.msra.mxu1 %v7868_v42  ;;  %v2859_v42 = vsel %vm432_vm2, %v2857_v6, %v2858_v2  ;;  %v7904_v6 = vld [vmem:[%s10501_s4 + $0xe0] ss:$8 sps:$4 sm:$0xff]   ;;  %v7907_v2 = vld [vmem:[%s10501_s4 + $0xf0] ss:$8 sps:$4 sm:$0xff]  }
 0x416   : > { %5081 = vmatprep.subr.bf16.mxu1 %v7873_v8 }
 0x417   : > { %3813 = vmatpush1.bf16.msra.mxu0 %v7772_v5  ;;  %v2867_v5 = vrot.slane %v2658_v1, 3  ;;  %v7906_v1 = vld [vmem:[%s10501_s4 + $0xe4] ss:$8 sps:$4 sm:$0xff]  }
 0x418   : > { %3814 = vmatprep.subr.bf16.mxu0 %v7777_v7  ;;  %v7819_v7 = vld [vmem:[%s10500_s3 + $0x414] ss:$8 sps:$4 sm:$0xff]  }
 0x419   : > { %5082 = vmatpush1.bf16.msra.mxu1 %v7871_v12  ;;  %v2868_v8 = vsel %vm432_vm2, %v2866_v38, %v2867_v5  ;;  %v7820_v12 = vld [vmem:[%s10500_s3 + $0x420] ss:$8 sps:$4 sm:$0xff]   ;;  %v7909_v38 = vld [vmem:[%s10501_s4 + $0xf4] ss:$8 sps:$4 sm:$0xff]  }
 0x41a   : > { %5083 = vmatprep.subr.bf16.mxu1 %v7876_v13  ;;  %v7825_v13 = vld [vmem:[%s10500_s3 + $0x434] ss:$8 sps:$4 sm:$0xff]   ;;  %v3894_v5 = vld [vmem:[%s10505_s8] ss:$2 sm:$0x3] }
 0x41b   : > { %3815 = vmatpush1.bf16.msra.mxu0 %v7775_v9  ;;  %v7817_v9 = vld [vmem:[%s10500_s3 + $0x410] ss:$8 sps:$4 sm:$0xff]  }
 0x41c   : > { %3816 = vmatprep.subr.bf16.mxu0 %v7780_v10  ;;  %v7822_v10 = vld [vmem:[%s10500_s3 + $0x424] ss:$8 sps:$4 sm:$0xff]  }
 0x41d   : > { %5084 = vmatpush1.bf16.msra.mxu1 %v7874_v16  ;;  %v7826_v16 = vld [vmem:[%s10500_s3 + $0x440] ss:$8 sps:$4 sm:$0xff]  }
 0x41e   : > { %5085 = vmatprep.subr.bf16.mxu1 %v7879_v15  ;;  %v7831_v15 = vld [vmem:[%s10500_s3 + $0x454] ss:$8 sps:$4 sm:$0xff]  }
 0x41f   : > { %3817 = vmatpush1.bf16.msra.mxu0 %v7778_v14  ;;  %v7823_v14 = vld [vmem:[%s10500_s3 + $0x430] ss:$8 sps:$4 sm:$0xff]  }
 0x420   : > { %3818 = vmatprep.subr.bf16.mxu0 %v7783_v3  ;;  %v7828_v3 = vld [vmem:[%s10500_s3 + $0x444] ss:$8 sps:$4 sm:$0xff]  }
 0x421   : > { %5086 = vmatpush1.bf16.msra.mxu1 %v7877_v18  ;;  %v7832_v18 = vld [vmem:[%s10500_s3 + $0x460] ss:$8 sps:$4 sm:$0xff]  }
 0x422   : > { %5087 = vmatprep.subr.bf16.mxu1 %v7882_v19  ;;  %v7837_v19 = vld [vmem:[%s10500_s3 + $0x474] ss:$8 sps:$4 sm:$0xff]  }
 0x423   : > { %3819 = vmatpush1.bf16.msra.mxu0 %v7781_v17  ;;  %v7829_v17 = vld [vmem:[%s10500_s3 + $0x450] ss:$8 sps:$4 sm:$0xff]  }
 0x424   : > { %3820 = vmatprep.subr.bf16.mxu0 %v7786_v11  ;;  %v7834_v11 = vld [vmem:[%s10500_s3 + $0x464] ss:$8 sps:$4 sm:$0xff]  }
 0x425   : > { %5088 = vmatpush1.bf16.msra.mxu1 %v7880_v21  ;;  %v7838_v21 = vld [vmem:[%s10500_s3 + $0x480] ss:$8 sps:$4 sm:$0xff]  }
 0x426   : > { %5089 = vmatprep.subr.bf16.mxu1 %v7885_v22  ;;  %v7843_v22 = vld [vmem:[%s10500_s3 + $0x494] ss:$8 sps:$4 sm:$0xff]  }
 0x427   : > { %3821 = vmatpush1.bf16.msra.mxu0 %v7784_v24  ;;  %v7835_v24 = vld [vmem:[%s10500_s3 + $0x470] ss:$8 sps:$4 sm:$0xff]  }
 0x428   : > { %3822 = vmatprep.subr.bf16.mxu0 %v7789_v20  ;;  %v7840_v20 = vld [vmem:[%s10500_s3 + $0x484] ss:$8 sps:$4 sm:$0xff]  }
 0x429   : > { %5090 = vmatpush1.bf16.msra.mxu1 %v7883_v0  ;;  %v7844_v0 = vld [vmem:[%s10500_s3 + $0x4a0] ss:$8 sps:$4 sm:$0xff]  }
 0x42a   : > { %5091 = vmatprep.subr.bf16.mxu1 %v7888_v53 }
 0x42b   : > { %3823 = vmatpush1.bf16.msra.mxu0 %v7787_v23  ;;  %v7841_v23 = vld [vmem:[%s10500_s3 + $0x490] ss:$8 sps:$4 sm:$0xff]  }
 0x42c   : > { %3824 = vmatprep.subr.bf16.mxu0 %v7792_v25  ;;  %v7846_v25 = vld [vmem:[%s10500_s3 + $0x4a4] ss:$8 sps:$4 sm:$0xff]  }
 0x42d   : > { %5092 = vmatpush1.bf16.msra.mxu1 %v7886_v54 }
 0x42f   : > { %3825 = vmatpush1.bf16.msra.mxu0 %v7790_v26  ;;  %v7849_v26 = vld [vmem:[%s10500_s3 + $0x4b4] ss:$8 sps:$4 sm:$0xff]  }
 0x430   : > { %3826 = vmatprep.subr.bf16.mxu0 %v7795_v27  ;;  %v7847_v27 = vld [vmem:[%s10500_s3 + $0x4b0] ss:$8 sps:$4 sm:$0xff]  }
 0x433   : > { %3827 = vmatpush1.bf16.msra.mxu0 %v7793_v28  ;;  %v7852_v28 = vld [vmem:[%s10500_s3 + $0x4c4] ss:$8 sps:$4 sm:$0xff]  }
 0x434   : > { %3828 = vmatprep.subr.bf16.mxu0 %v7798_v30  ;;  %v7850_v30 = vld [vmem:[%s10500_s3 + $0x4c0] ss:$8 sps:$4 sm:$0xff]  }
 0x437   : > { %3829 = vmatpush1.bf16.msra.mxu0 %v7796_v31  ;;  %v2557_v31 = vld [vmem:[#allocation2 + $0x10] sm:$0xfc] }
 0x438   : > { %3830 = vmatprep.subr.bf16.mxu0 %v7801_v32  ;;  %v7855_v32 = vld [vmem:[%s10500_s3 + $0x4d4] ss:$8 sps:$4 sm:$0xff]  }
 0x43b   : > { %3831 = vmatpush1.bf16.msra.mxu0 %v7799_v33  ;;  %v2559_v33 = vld [vmem:[#allocation2 + $0x30] sm:$0x3] }
 0x43c   : > { %3832 = vmatprep.subr.bf16.mxu0 %v7804_v34  ;;  %v2623_v34 = vrot.slane %v2557_v31, 4  ;;  %v2629_v37 = vrot.slane %v2559_v33, 4 }
 0x43f   : > { %3833 = vmatpush1.bf16.msra.mxu0 %v7802_v35  ;;  %v7853_v35 = vld [vmem:[%s10500_s3 + $0x4d0] ss:$8 sps:$4 sm:$0xff]  }
 0x440   : > { %3834 = vmatprep.subr.bf16.mxu0 %v7807_v29  ;;  %v2625_v29 = vrot.slane %v9221_v45, 4  ;;  %v7859_v45 = vld [vmem:[%s10500_s3 + $0x4f0] ss:$8 sps:$4 sm:$0xff]  }
 0x442   : > { %v2626_v39 = vsel %vm443_vm3, %v2623_v34, %v2625_v29 }
 0x443   : > { %3835 = vmatpush1.bf16.msra.mxu0 %v7805_v43  ;;  %v2630_v43 = vsel %vm443_vm3, %v2625_v29, %v2629_v37  ;;  %v2647_v48 = vpack.c.bf16 %v2626_v39, %v2623_v34  ;;  %v3935_v39 = vld [vmem:[#allocation2] sm:$0xc0] }
 0x444   : > { %3836 = vmatprep.subr.bf16.mxu0 %v7810_v49  ;;  %v2657_v49 = vpack.c.bf16 %v2630_v43, %v2630_v43 }
 0x445   : > { %v2863_v50 = vrot.slane %v2647_v48, 3 }
 0x446   : > { %v2864_v51 = vrot.slane %v2657_v49, 3 }
 0x447   : > { %3837 = vmatpush1.bf16.msra.mxu0 %v7808_v55  ;;  %v7891_v55 = vld [vmem:[%s10501_s4 + $0x94] ss:$8 sps:$4 sm:$0xff]  }
 0x448   : > { %3838 = vmatprep.subr.bf16.mxu0 %v7813_v57  ;;  %v2865_v52 = vsel %vm432_vm2, %v2863_v50, %v2864_v51  ;;  %5093 = vmatprep.subr.bf16.mxu1 %v7891_v55  ;;  %v7892_v57 = vld [vmem:[%s10501_s4 + $0xa0] ss:$8 sps:$4 sm:$0xff]  }
 0x449   : > { %5094 = vmatpush1.bf16.msra.mxu1 %v7889_v56 }
 0x44a   : > { %5095 = vmatprep.subr.bf16.mxu1 %v7894_v58 }
 0x44b   : > { %3839 = vmatpush1.bf16.msra.mxu0 %v7811_v61  ;;  %v7898_v61 = vld [vmem:[%s10501_s4 + $0xc0] ss:$8 sps:$4 sm:$0xff]  }
 0x44c   : > { %3851 = vmatprep.subr.bf16.mxu0 %v7816_v63  ;;  %v7901_v63 = vld [vmem:[%s10501_s4 + $0xd0] ss:$8 sps:$4 sm:$0xff]  }
 0x44d   : > { %5096 = vmatpush1.bf16.msra.mxu1 %v7892_v57 }
 0x44e   : > { %3841 = vmatmul.mubr.bf16.vlgmr.msra.gmra.mrb[4].mxu0 %v2859_v42  ;;  %5097 = vmatprep.subr.bf16.mxu1 %v7897_v59  ;;  %v3899_v42 = vrot.slane %v3894_v5, %v8666_v44 }
 0x44f   : > { %3852 = vmatpush1.bf16.msra.mxu0 %v7814_v4  ;;  %3883 = vmatprep.mubr.bf16.mxu0 %v2868_v8  ;;  %v7912_v4 = vld [vmem:[%s10501_s4 + $0x104] ss:$8 sps:$4 sm:$0xff]   ;;  %v3903_v8 = vrot.slane %v3894_v5, %v8671_v46  ;;  %v7915_v5 = vld [vmem:[%s10501_s4 + $0x114] ss:$8 sps:$4 sm:$0xff]  }
 0x450   : > { %3853 = vmatprep.subr.bf16.mxu0 %v7819_v7  ;;  %v6838_v7 = vld [vmem:[%s10505_s8 + $0x1] ss:$2 sm:$0x3] }
 0x451   : > { %5098 = vmatpush1.bf16.msra.mxu1 %v7895_v47 }
 0x452   : > { %5099 = vmatprep.subr.bf16.mxu1 %v7900_v60 }
 0x453   : > { %3854 = vmatpush1.bf16.msra.mxu0 %v7817_v9  ;;  %v3916_v9 = vrot.slane %v6838_v7, %v8666_v44 }
 0x454   : > { %3855 = vmatprep.subr.bf16.mxu0 %v7822_v10 }
 0x455   : > { %5100 = vmatpush1.bf16.msra.mxu1 %v7898_v61 }
 0x456   : > { %5101 = vmatprep.subr.bf16.mxu1 %v7903_v62 }
 0x457   : > { %3856 = vmatpush1.bf16.msra.mxu0 %v7820_v12  ;;  %v3920_v12 = vrot.slane %v6838_v7, %v8671_v46 }
 0x458   : > { %3857 = vmatprep.subr.bf16.mxu0 %v7825_v13 }
 0x459   : > { %5102 = vmatpush1.bf16.msra.mxu1 %v7901_v63 }
 0x45a   : > { %5103 = vmatprep.subr.bf16.mxu1 %v7906_v1  ;;  %v7910_v1 = vld [vmem:[%s10501_s4 + $0x100] ss:$8 sps:$4 sm:$0xff]  }
 0x45b   : > { %3858 = vmatpush1.bf16.msra.mxu0 %v7823_v14 }
 0x45c   : > { %3859 = vmatprep.subr.bf16.mxu0 %v7828_v3 }
 0x45d   : > { %5104 = vmatpush1.bf16.msra.mxu1 %v7904_v6 }
 0x45e   : > { %5105 = vmatprep.subr.bf16.mxu1 %v7909_v38 }
 0x45f   : > { %3860 = vmatpush1.bf16.msra.mxu0 %v7826_v16 }
 0x460   : > { %3861 = vmatprep.subr.bf16.mxu0 %v7831_v15 }
 0x461   : > { %5106 = vmatpush1.bf16.msra.mxu1 %v7907_v2 }
 0x462   : > { %5118 = vmatprep.subr.bf16.mxu1 %v7912_v4 }
 0x463   : > { %3862 = vmatpush1.bf16.msra.mxu0 %v7829_v17 }
 0x464   : > { %3863 = vmatprep.subr.bf16.mxu0 %v7834_v11 }
 0x467   : > { %3864 = vmatpush1.bf16.msra.mxu0 %v7832_v18 }
 0x468   : > { %3865 = vmatprep.subr.bf16.mxu0 %v7837_v19 }
 0x46b   : > { %3866 = vmatpush1.bf16.msra.mxu0 %v7835_v24 }
 0x46c   : > { %3867 = vmatprep.subr.bf16.mxu0 %v7840_v20 }
 0x46f   : > { %3868 = vmatpush1.bf16.msra.mxu0 %v7838_v21 }
 0x470   : > { %3869 = vmatprep.subr.bf16.mxu0 %v7843_v22 }
 0x473   : > { %3870 = vmatpush1.bf16.msra.mxu0 %v7841_v23 }
 0x474   : > { %3871 = vmatprep.subr.bf16.mxu0 %v7846_v25 }
 0x477   : > { %3872 = vmatpush1.bf16.msra.mxu0 %v7844_v0 }
 0x478   : > { %3873 = vmatprep.subr.bf16.mxu0 %v7849_v26 }
 0x47b   : > { %3874 = vmatpush1.bf16.msra.mxu0 %v7847_v27 }
 0x47c   : > { %3875 = vmatprep.subr.bf16.mxu0 %v7852_v28 }
 0x47f   : > { %3876 = vmatpush1.bf16.msra.mxu0 %v7850_v30 }
 0x480   : > { %3877 = vmatprep.subr.bf16.mxu0 %v7855_v32  ;;  %v3936_v32 = vld [vmem:[#allocation2 + $0x8] sm:$0xc0] }
 0x483   : > { %3878 = vmatpush1.bf16.msra.mxu0 %v7853_v35 }
 0x484   : > { %3879 = vmatprep.subr.bf16.mxu0 %v7858_v36  ;;  %v3942_v36 = vld [vmem:[#allocation2 + $0x8] sm:$0x80] }
 0x485   : > { %v3966_v49 = vrot.slane %v3942_v36, 1  ;;  %v3941_v36 = vld [vmem:[#allocation2] sm:$0x80] }
 0x487   : > { %3880 = vmatpush1.bf16.msra.mxu0 %v7856_v40 }
 0x488   : > { %3881 = vmatprep.subr.bf16.mxu0 %v7861_v41 }
 0x48b   : > { %3882 = vmatpush1.bf16.msra.mxu0 %v7859_v45 }
 0x48e   : > { %3884 = vmatmul.mubr.bf16.vlgmr.msra.gmra.mrb[4].mxu0 %v2865_v52 }
 0x561   : > { %v3885_v10 = vpop.f32.mrb[4].mxu0 }
 0x562   : > { %v3906_v13 = vmul.f32 %v3899_v42, %v3885_v10  ;;  %v3887_v14 = vpop.f32.mrb[5].mxu0  ;;  %v7918_v10 = vld [vmem:[%s10501_s4 + $0x124] ss:$8 sps:$4 sm:$0xff]  }
 0x563   : > { %v3907_v3 = vmul.f32 %v3903_v8, %v3887_v14  ;;  %v3889_v16 = vpop.f32.mrb[6].mxu0  ;;  %v7919_v14 = vld [vmem:[%s10501_s4 + $0x130] ss:$8 sps:$4 sm:$0xff]  }
 0x564   : > { %v3923_v15 = vadd.f32 %v3916_v9, %v3906_v13  ;;  %v3908_v17 = vmul.f32 %v3899_v42, %v3889_v16  ;;  %v3891_v11 = vpop.f32.mrb[7].mxu0  ;;  %v7921_v13 = vld [vmem:[%s10501_s4 + $0x134] ss:$8 sps:$4 sm:$0xff]   ;;  %v7922_v16 = vld [vmem:[%s10501_s4 + $0x140] ss:$8 sps:$4 sm:$0xff]  }
 0x565   : > { %v3924_v18 = vadd.f32 %v3920_v12, %v3907_v3  ;;  %v3909_v19 = vmul.f32 %v3903_v8, %v3891_v11  ;;  %v7924_v3 = vld [vmem:[%s10501_s4 + $0x144] ss:$8 sps:$4 sm:$0xff]  }
 0x566   : > { %8198 = vtanh.f32 %v3923_v15  ;;  %v3925_v24 = vadd.f32 %v3916_v9, %v3908_v17  ;;  %v7913_v9 = vld [vmem:[%s10501_s4 + $0x110] ss:$8 sps:$4 sm:$0xff]   ;;  %v7927_v15 = vld [vmem:[%s10501_s4 + $0x154] ss:$8 sps:$4 sm:$0xff]   ;;  %v7930_v11 = vld [vmem:[%s10501_s4 + $0x164] ss:$8 sps:$4 sm:$0xff]  }
 0x567   : > { %8200 = vtanh.f32 %v3924_v18  ;;  %v3926_v20 = vadd.f32 %v3920_v12, %v3909_v19  ;;  %v7916_v12 = vld [vmem:[%s10501_s4 + $0x120] ss:$8 sps:$4 sm:$0xff]   ;;  %v7925_v17 = vld [vmem:[%s10501_s4 + $0x150] ss:$8 sps:$4 sm:$0xff]   ;;  %v7933_v19 = vld [vmem:[%s10501_s4 + $0x174] ss:$8 sps:$4 sm:$0xff]  }
 0x568   : > { %8202 = vtanh.f32 %v3925_v24  ;;  %v7928_v18 = vld [vmem:[%s10501_s4 + $0x160] ss:$8 sps:$4 sm:$0xff]   ;;  %v7931_v24 = vld [vmem:[%s10501_s4 + $0x170] ss:$8 sps:$4 sm:$0xff]  }
 0x569   : > { %8204 = vtanh.f32 %v3926_v20  ;;  %v7936_v20 = vld [vmem:[%s10501_s4 + $0x184] ss:$8 sps:$4 sm:$0xff]  }
 0x570   : > { %v9756_v21 = vpop.eup %8198 }
 0x571   : > { %v8201_v22 = vpop.eup %8200  ;;  %3931 = vst [vmem:[#allocation2 + $0x10] sm:$0xff] %v9756_v21  ;;  %v3981_v0 = vrot.slane %v9756_v21, 2  ;;  %v4035_v53 = vpack.c.bf16 %v9756_v21, %v3935_v39  ;;  %v7954_v39 = vld [vmem:[%s10501_s4 + $0x1e4] ss:$8 sps:$4 sm:$0xff]  }
 0x572   : > { %v9759_v23 = vpop.eup %8202  ;;  %3932 = vst [vmem:[#allocation2 + $0x18] sm:$0xff] %v8201_v22  ;;  %v3982_v27 = vrot.slane %v8201_v22, 2  ;;  %v4036_v43 = vpack.c.bf16 %v8201_v22, %v3936_v32  ;;  %v3967_v50 = vrot.slane %v8201_v22, 1  ;;  %v7934_v22 = vld [vmem:[%s10501_s4 + $0x180] ss:$8 sps:$4 sm:$0xff]  }
 0x573   : > { %v9761_v25 = vpop.eup %8204  ;;  %3933 = vst [vmem:[#allocation2 + $0x20] sm:$0xff] %v9759_v23  ;;  %v3983_v26 = vrot.slane %v9759_v23, 2  ;;  %v4235_v6 = vrot.slane %v4035_v53, 3  ;;  %v7948_v32 = vld [vmem:[%s10501_s4 + $0x1c4] ss:$8 sps:$4 sm:$0xff]  }
 0x574   : > { %3934 = vst [vmem:[#allocation2 + $0x28] sm:$0xff] %v9761_v25  ;;  %v3985_v28 = vrot.slane %v9761_v25, 2  ;;  %v4238_v59 = vrot.slane %v4036_v43, 3  ;;  %v3968_v61 = vsel %vm413_vm1, %v3966_v49, %v3967_v50  ;;  %v7960_v53 = vld [vmem:[%s10501_s4 + $0x204] ss:$8 sps:$4 sm:$0xff]  }
 0x575   : > { %v3984_v30 = vsel %vm423_vm0, %v3981_v0, %v3983_v26  ;;  %v4049_v31 = vpack.c.bf16 %v3983_v26, %v3983_v26  ;;  %v7937_v26 = vld [vmem:[%s10501_s4 + $0x190] ss:$8 sps:$4 sm:$0xff]  }
 0x576   : > { %v3986_v33 = vsel %vm423_vm0, %v3982_v27, %v3985_v28  ;;  %v4050_v34 = vpack.c.bf16 %v3985_v28, %v3985_v28  ;;  %v4039_v35 = vpack.c.bf16 %v3984_v30, %v3981_v0  ;;  %v7939_v0 = vld [vmem:[%s10501_s4 + $0x194] ss:$8 sps:$4 sm:$0xff]   ;;  %v7940_v28 = vld [vmem:[%s10501_s4 + $0x1a0] ss:$8 sps:$4 sm:$0xff]  }
 0x577   : > { %v4040_v29 = vpack.c.bf16 %v3986_v33, %v3982_v27  ;;  %v4248_v37 = vrot.slane %v4049_v31, 3  ;;  %v7942_v27 = vld [vmem:[%s10501_s4 + $0x1a4] ss:$8 sps:$4 sm:$0xff]   ;;  %v7945_v30 = vld [vmem:[%s10501_s4 + $0x1b4] ss:$8 sps:$4 sm:$0xff]  }
 0x578   : > { %v4251_v40 = vrot.slane %v4050_v34, 3  ;;  %v4247_v41 = vrot.slane %v4039_v35, 3  ;;  %v7943_v31 = vld [vmem:[%s10501_s4 + $0x1b0] ss:$8 sps:$4 sm:$0xff]   ;;  %v7946_v33 = vld [vmem:[%s10501_s4 + $0x1c0] ss:$8 sps:$4 sm:$0xff]  }
 0x579   : > { %v4250_v48 = vrot.slane %v4040_v29, 3  ;;  %v7951_v35 = vld [vmem:[%s10501_s4 + $0x1d4] ss:$8 sps:$4 sm:$0xff]  }
 0x57a   : > { %v3939_v45 = vld [vmem:[#allocation2 + $0x20] sm:$0x3f]  ;;  %v9771_v51 = vsel %vm432_vm2, %v4247_v41, %v4248_v37  ;;  %v7949_v37 = vld [vmem:[%s10501_s4 + $0x1d0] ss:$8 sps:$4 sm:$0xff]   ;;  %v3964_v41 = vrot.slane %v9756_v21, 1 }
 0x57b   : > { %v3940_v52 = vld [vmem:[#allocation2 + $0x28] sm:$0x3f]  ;;  %v4045_v54 = vpack.c.bf16 %v3939_v45, %v3939_v45  ;;  %v9775_v56 = vsel %vm432_vm2, %v4250_v48, %v4251_v40  ;;  %v3943_v34 = vld [vmem:[#allocation2 + $0x20] sm:$0x7f]  ;;  %v3963_v40 = vrot.slane %v3941_v36, 1 }
 0x57c   : > { %v3944_v55 = vld [vmem:[#allocation2 + $0x28] sm:$0x7f]  ;;  %v4046_v57 = vpack.c.bf16 %v3940_v52, %v3940_v52  ;;  %v3969_v29 = vrot.slane %v3943_v34, 1  ;;  %v7957_v45 = vld [vmem:[%s10501_s4 + $0x1f4] ss:$8 sps:$4 sm:$0xff]  }
 0x57d   : > { %v3971_v58 = vrot.slane %v3944_v55, 1  ;;  %v4236_v47 = vrot.slane %v4045_v54, 3  ;;  %v7952_v48 = vld [vmem:[%s10501_s4 + $0x1e0] ss:$8 sps:$4 sm:$0xff]   ;;  %v3965_v49 = vsel %vm413_vm1, %v3963_v40, %v3964_v41  ;;  %v7955_v21 = vld [vmem:[%s10501_s4 + $0x1f0] ss:$8 sps:$4 sm:$0xff]  }
 0x57e   : > { %v4239_v60 = vrot.slane %v4046_v57, 3  ;;  %v3970_v43 = vsel %vm413_vm1, %v3964_v41, %v3969_v29  ;;  %v4047_v52 = vpack.c.bf16 %v3969_v29, %v3969_v29  ;;  %v7958_v57 = vld [vmem:[%s10501_s4 + $0x200] ss:$8 sps:$4 sm:$0xff]   ;;  %v8009_v40 = vld [vmem:[%s10501_s4 + $0x310] ss:$8 sps:$4 sm:$0xff]  }
 0x57f   : > { %v3972_v62 = vsel %vm413_vm1, %v3967_v50, %v3971_v58  ;;  %v4048_v63 = vpack.c.bf16 %v3971_v58, %v3971_v58  ;;  %v4237_v7 = vsel %vm432_vm2, %v4235_v6, %v4236_v47  ;;  %v4037_v50 = vpack.c.bf16 %v3970_v43, %v3965_v49  ;;  %v7963_v58 = vld [vmem:[%s10501_s4 + $0x214] ss:$8 sps:$4 sm:$0xff]   ;;  %v7961_v47 = vld [vmem:[%s10501_s4 + $0x210] ss:$8 sps:$4 sm:$0xff]   ;;  %v8006_v36 = vld [vmem:[%s10501_s4 + $0x300] ss:$8 sps:$4 sm:$0xff]  }
 0x580   : > { %v4038_v38 = vpack.c.bf16 %v3972_v62, %v3968_v61  ;;  %v4240_v2 = vsel %vm432_vm2, %v4238_v59, %v4239_v60  ;;  %v4242_v55 = vrot.slane %v4047_v52, 3  ;;  %v7966_v60 = vld [vmem:[%s10501_s4 + $0x224] ss:$8 sps:$4 sm:$0xff]   ;;  %v7964_v61 = vld [vmem:[%s10501_s4 + $0x220] ss:$8 sps:$4 sm:$0xff]  }
 0x581   : > { %v4245_v4 = vrot.slane %v4048_v63, 3  ;;  %5107 = vmatprep.mubr.bf16.mxu1 %v4240_v2  ;;  %v4241_v54 = vrot.slane %v4037_v50, 3  ;;  %v7969_v62 = vld [vmem:[%s10501_s4 + $0x234] ss:$8 sps:$4 sm:$0xff]   ;;  %v7972_v63 = vld [vmem:[%s10501_s4 + $0x244] ss:$8 sps:$4 sm:$0xff]  }
 0x582   : > { %v4244_v42 = vrot.slane %v4038_v38, 3  ;;  %5108 = vmatmul.mubr.bf16.vlgmr.msra.gmra.mrb[4].mxu1 %v4237_v7  ;;  %v7975_v6 = vld [vmem:[%s10501_s4 + $0x254] ss:$8 sps:$4 sm:$0xff]   ;;  %v7973_v38 = vld [vmem:[%s10501_s4 + $0x250] ss:$8 sps:$4 sm:$0xff]  }
 0x583   : > { %5119 = vmatpush1.bf16.msra.mxu1 %v7910_v1  ;;  %v4243_v59 = vsel %vm432_vm2, %v4241_v54, %v4242_v55  ;;  %v7970_v1 = vld [vmem:[%s10501_s4 + $0x240] ss:$8 sps:$4 sm:$0xff]   ;;  %v7978_v2 = vld [vmem:[%s10501_s4 + $0x264] ss:$8 sps:$4 sm:$0xff]   ;;  %v7979_v7 = vld [vmem:[%s10501_s4 + $0x270] ss:$8 sps:$4 sm:$0xff]  }
 0x584   : > { %v4246_v8 = vsel %vm432_vm2, %v4244_v42, %v4245_v4  ;;  %5120 = vmatprep.subr.bf16.mxu1 %v7915_v5  ;;  %v7976_v4 = vld [vmem:[%s10501_s4 + $0x260] ss:$8 sps:$4 sm:$0xff]   ;;  %v7981_v5 = vld [vmem:[%s10501_s4 + $0x274] ss:$8 sps:$4 sm:$0xff]   ;;  %v7984_v42 = vld [vmem:[%s10501_s4 + $0x284] ss:$8 sps:$4 sm:$0xff]  }
 0x585   : > { %5150 = vmatprep.mubr.bf16.mxu1 %v4246_v8  ;;  %v7982_v8 = vld [vmem:[%s10501_s4 + $0x280] ss:$8 sps:$4 sm:$0xff]   ;;  %v8014_v41 = vld [vmem:[%s10501_s4 + $0x324] ss:$8 sps:$4 sm:$0xff]   ;;  %v8023_v50 = vld [vmem:[%s10501_s4 + $0x354] ss:$8 sps:$4 sm:$0xff]  }
 0x586   : > { %v8012_v43 = vld [vmem:[%s10501_s4 + $0x320] ss:$8 sps:$4 sm:$0xff]   ;;  %v8021_v52 = vld [vmem:[%s10501_s4 + $0x350] ss:$8 sps:$4 sm:$0xff]   ;;  %v8029_v54 = vld [vmem:[%s10501_s4 + $0x374] ss:$8 sps:$4 sm:$0xff]  }
 0x587   : > { %5121 = vmatpush1.bf16.msra.mxu1 %v7913_v9  ;;  %v7987_v9 = vld [vmem:[%s10501_s4 + $0x294] ss:$8 sps:$4 sm:$0xff]   ;;  %v8018_v49 = vld [vmem:[%s10501_s4 + $0x340] ss:$8 sps:$4 sm:$0xff]   ;;  %v8027_v55 = vld [vmem:[%s10501_s4 + $0x370] ss:$8 sps:$4 sm:$0xff]  }
 0x588   : > { %5122 = vmatprep.subr.bf16.mxu1 %v7918_v10  ;;  %v7985_v10 = vld [vmem:[%s10501_s4 + $0x290] ss:$8 sps:$4 sm:$0xff]  }
 0x58b   : > { %5123 = vmatpush1.bf16.msra.mxu1 %v7916_v12  ;;  %v7990_v12 = vld [vmem:[%s10501_s4 + $0x2a4] ss:$8 sps:$4 sm:$0xff]  }
 0x58c   : > { %5124 = vmatprep.subr.bf16.mxu1 %v7921_v13  ;;  %v7988_v13 = vld [vmem:[%s10501_s4 + $0x2a0] ss:$8 sps:$4 sm:$0xff]  }
 0x58f   : > { %5125 = vmatpush1.bf16.msra.mxu1 %v7919_v14  ;;  %v7993_v14 = vld [vmem:[%s10501_s4 + $0x2b4] ss:$8 sps:$4 sm:$0xff]  }
 0x590   : > { %5126 = vmatprep.subr.bf16.mxu1 %v7924_v3  ;;  %v7991_v3 = vld [vmem:[%s10501_s4 + $0x2b0] ss:$8 sps:$4 sm:$0xff]  }
 0x593   : > { %5127 = vmatpush1.bf16.msra.mxu1 %v7922_v16  ;;  %v7996_v16 = vld [vmem:[%s10501_s4 + $0x2c4] ss:$8 sps:$4 sm:$0xff]  }
 0x594   : > { %5128 = vmatprep.subr.bf16.mxu1 %v7927_v15  ;;  %v7994_v15 = vld [vmem:[%s10501_s4 + $0x2c0] ss:$8 sps:$4 sm:$0xff]  }
 0x597   : > { %5129 = vmatpush1.bf16.msra.mxu1 %v7925_v17  ;;  %v7999_v17 = vld [vmem:[%s10501_s4 + $0x2d4] ss:$8 sps:$4 sm:$0xff]  }
 0x598   : > { %5130 = vmatprep.subr.bf16.mxu1 %v7930_v11  ;;  %v3948_v11 = vld [vmem:[#allocation2 + $0x18] sm:$0xfe] }
 0x59b   : > { %5131 = vmatpush1.bf16.msra.mxu1 %v7928_v18  ;;  %v3952_v18 = vld [vmem:[#allocation2 + $0x38] sm:$0x1] }
 0x59c   : > { %5132 = vmatprep.subr.bf16.mxu1 %v7933_v19  ;;  %v7997_v19 = vld [vmem:[%s10501_s4 + $0x2d0] ss:$8 sps:$4 sm:$0xff]  }
 0x59f   : > { %5133 = vmatpush1.bf16.msra.mxu1 %v7931_v24  ;;  %v4000_v24 = vrot.slane %v3948_v11, 3 }
 0x5a0   : > { %5134 = vmatprep.subr.bf16.mxu1 %v7936_v20  ;;  %v8002_v20 = vld [vmem:[%s10501_s4 + $0x2e4] ss:$8 sps:$4 sm:$0xff]  }
 0x5a3   : > { %5135 = vmatpush1.bf16.msra.mxu1 %v7934_v22  ;;  %v4003_v22 = vrot.slane %v9761_v25, 3 }
 0x5a4   : > { %5136 = vmatprep.subr.bf16.mxu1 %v7939_v0  ;;  %v4007_v0 = vrot.slane %v3952_v18, 3 }
 0x5a7   : > { %5137 = vmatpush1.bf16.msra.mxu1 %v7937_v26  ;;  %v8000_v26 = vld [vmem:[%s10501_s4 + $0x2e0] ss:$8 sps:$4 sm:$0xff]  }
 0x5a8   : > { %5138 = vmatprep.subr.bf16.mxu1 %v7942_v27  ;;  %v4004_v27 = vsel %vm432_vm2, %v4000_v24, %v4003_v22 }
 0x5ab   : > { %5139 = vmatpush1.bf16.msra.mxu1 %v7940_v28  ;;  %v8005_v28 = vld [vmem:[%s10501_s4 + $0x2f4] ss:$8 sps:$4 sm:$0xff]  }
 0x5ac   : > { %5140 = vmatprep.subr.bf16.mxu1 %v7945_v30  ;;  %v4008_v30 = vsel %vm432_vm2, %v4003_v22, %v4007_v0  ;;  %v8056_v22 = vld [vmem:[%s10501_s4 + $0x404] ss:$8 sps:$4 sm:$0xff]  }
 0x5ad   : > { %v4052_v34 = vpack.c.bf16 %v4008_v30, %v4008_v30  ;;  %v8054_v30 = vld [vmem:[%s10501_s4 + $0x400] ss:$8 sps:$4 sm:$0xff]  }
 0x5af   : > { %5141 = vmatpush1.bf16.msra.mxu1 %v7943_v31  ;;  %v4042_v31 = vpack.c.bf16 %v4004_v27, %v4000_v24  ;;  %v4257_v29 = vrot.slane %v4052_v34, 3  ;;  %v8051_v24 = vld [vmem:[%s10501_s4 + $0x3f0] ss:$8 sps:$4 sm:$0xff]  }
 0x5b0   : > { %5142 = vmatprep.subr.bf16.mxu1 %v7948_v32  ;;  %v8003_v32 = vld [vmem:[%s10501_s4 + $0x2f0] ss:$8 sps:$4 sm:$0xff]  }
 0x5b3   : > { %5143 = vmatpush1.bf16.msra.mxu1 %v7946_v33  ;;  %v8008_v33 = vld [vmem:[%s10501_s4 + $0x304] ss:$8 sps:$4 sm:$0xff]  }
 0x5b4   : > { %5144 = vmatprep.subr.bf16.mxu1 %v7951_v35  ;;  %v4256_v35 = vrot.slane %v4042_v31, 3 }
 0x5b7   : > { %5145 = vmatpush1.bf16.msra.mxu1 %v7949_v37  ;;  %v8011_v37 = vld [vmem:[%s10501_s4 + $0x314] ss:$8 sps:$4 sm:$0xff]  }
 0x5b8   : > { %5146 = vmatprep.subr.bf16.mxu1 %v7954_v39  ;;  %v4258_v39 = vsel %vm432_vm2, %v4256_v35, %v4257_v29  ;;  %v8057_v35 = vld [vmem:[%s10501_s4 + $0x410] ss:$8 sps:$4 sm:$0xff]   ;;  %v8060_v29 = vld [vmem:[%s10501_s4 + $0x420] ss:$8 sps:$4 sm:$0xff]  }
 0x5bb   : > { %5147 = vmatpush1.bf16.msra.mxu1 %v7952_v48  ;;  %v8015_v48 = vld [vmem:[%s10501_s4 + $0x330] ss:$8 sps:$4 sm:$0xff]  }
 0x5bc   : > { %5148 = vmatprep.subr.bf16.mxu1 %v7957_v45  ;;  %v8020_v45 = vld [vmem:[%s10501_s4 + $0x344] ss:$8 sps:$4 sm:$0xff]  }
 0x5bf   : > { %5149 = vmatpush1.bf16.msra.mxu1 %v7955_v21  ;;  %v8026_v21 = vld [vmem:[%s10501_s4 + $0x364] ss:$8 sps:$4 sm:$0xff]  }
 0x5c0   : > { %5161 = vmatprep.subr.bf16.mxu1 %v7960_v53  ;;  %v8024_v53 = vld [vmem:[%s10501_s4 + $0x360] ss:$8 sps:$4 sm:$0xff]  }
 0x5c2   : > { %5151 = vmatmul.mubr.bf16.vlgmr.msra.gmra.mrb[4].mxu1 %v4243_v59  ;;  %v8035_v59 = vld [vmem:[%s10501_s4 + $0x394] ss:$8 sps:$4 sm:$0xff]  }
 0x5c3   : > { %5162 = vmatpush1.bf16.msra.mxu1 %v7958_v57  ;;  %5193 = vmatprep.mubr.bf16.mxu1 %v9775_v56  ;;  %v7967_v56 = vld [vmem:[%s10501_s4 + $0x230] ss:$8 sps:$4 sm:$0xff]   ;;  %v8032_v57 = vld [vmem:[%s10501_s4 + $0x384] ss:$8 sps:$4 sm:$0xff]  }
 0x5c4   : > { %5163 = vmatprep.subr.bf16.mxu1 %v7963_v58  ;;  %v8030_v58 = vld [vmem:[%s10501_s4 + $0x380] ss:$8 sps:$4 sm:$0xff]  }
 0x5c7   : > { %5164 = vmatpush1.bf16.msra.mxu1 %v7961_v47  ;;  %v8033_v47 = vld [vmem:[%s10501_s4 + $0x390] ss:$8 sps:$4 sm:$0xff]  }
 0x5c8   : > { %5165 = vmatprep.subr.bf16.mxu1 %v7966_v60  ;;  %v8038_v60 = vld [vmem:[%s10501_s4 + $0x3a4] ss:$8 sps:$4 sm:$0xff]  }
 0x5cb   : > { %5166 = vmatpush1.bf16.msra.mxu1 %v7964_v61  ;;  %v8036_v61 = vld [vmem:[%s10501_s4 + $0x3a0] ss:$8 sps:$4 sm:$0xff]  }
 0x5cc   : > { %5167 = vmatprep.subr.bf16.mxu1 %v7969_v62  ;;  %v8041_v62 = vld [vmem:[%s10501_s4 + $0x3b4] ss:$8 sps:$4 sm:$0xff]  }
 0x5cf   : > { %5168 = vmatpush1.bf16.msra.mxu1 %v7967_v56  ;;  %v8039_v56 = vld [vmem:[%s10501_s4 + $0x3b0] ss:$8 sps:$4 sm:$0xff]  }
 0x5d0   : > { %5169 = vmatprep.subr.bf16.mxu1 %v7972_v63  ;;  %v8044_v63 = vld [vmem:[%s10501_s4 + $0x3c4] ss:$8 sps:$4 sm:$0xff]  }
 0x5d3   : > { %5170 = vmatpush1.bf16.msra.mxu1 %v7970_v1  ;;  %v8042_v1 = vld [vmem:[%s10501_s4 + $0x3c0] ss:$8 sps:$4 sm:$0xff]  }
 0x5d4   : > { %5171 = vmatprep.subr.bf16.mxu1 %v7975_v6  ;;  %v3947_v6 = vld [vmem:[#allocation2 + $0x10] sm:$0xfe] }
 0x5d7   : > { %5172 = vmatpush1.bf16.msra.mxu1 %v7973_v38  ;;  %v8047_v38 = vld [vmem:[%s10501_s4 + $0x3d4] ss:$8 sps:$4 sm:$0xff]  }
 0x5d8   : > { %5173 = vmatprep.subr.bf16.mxu1 %v7978_v2  ;;  %v3954_v2 = vld [vmem:[#allocation2 + $0x18] sm:$0xfc] }
 0x5db   : > { %5174 = vmatpush1.bf16.msra.mxu1 %v7976_v4  ;;  %v3951_v4 = vld [vmem:[#allocation2 + $0x30] sm:$0x1] }
 0x5dc   : > { %5175 = vmatprep.subr.bf16.mxu1 %v7981_v5  ;;  %v3999_v5 = vrot.slane %v3947_v6, 3  ;;  %v8098_v6 = vld [vmem:[%s10501_s4 + $0x4e4] ss:$8 sps:$4 sm:$0xff]  }
 0x5df   : > { %5176 = vmatpush1.bf16.msra.mxu1 %v7979_v7  ;;  %v3956_v7 = vld [vmem:[#allocation2 + $0x38] sm:$0x3] }
 0x5e0   : > { %5177 = vmatprep.subr.bf16.mxu1 %v7984_v42  ;;  %v8045_v42 = vld [vmem:[%s10501_s4 + $0x3d0] ss:$8 sps:$4 sm:$0xff]  }
 0x5e3   : > { %5178 = vmatpush1.bf16.msra.mxu1 %v7982_v8  ;;  %v4020_v8 = vrot.slane %v3954_v2, 4 }
 0x5e4   : > { %5179 = vmatprep.subr.bf16.mxu1 %v7987_v9  ;;  %v8050_v9 = vld [vmem:[%s10501_s4 + $0x3e4] ss:$8 sps:$4 sm:$0xff]  }
 0x5e7   : > { %5180 = vmatpush1.bf16.msra.mxu1 %v7985_v10  ;;  %v4001_v10 = vrot.slane %v9759_v23, 3 }
 0x5e8   : > { %5181 = vmatprep.subr.bf16.mxu1 %v7990_v12  ;;  %v4005_v12 = vrot.slane %v3951_v4, 3 }
 0x5ea   : > { %v4006_v11 = vsel %vm432_vm2, %v4001_v10, %v4005_v12 }
 0x5eb   : > { %5182 = vmatpush1.bf16.msra.mxu1 %v7988_v13  ;;  %v4023_v13 = vrot.slane %v9761_v25, 4 }
 0x5ec   : > { %5183 = vmatprep.subr.bf16.mxu1 %v7993_v14  ;;  %v4027_v14 = vrot.slane %v3956_v7, 4  ;;  %v8101_v7 = vld [vmem:[%s10501_s4 + $0x4f4] ss:$8 sps:$4 sm:$0xff]  }
 0x5ee   : > { %v4028_v25 = vsel %vm443_vm3, %v4023_v13, %v4027_v14  ;;  %v8102_v14 = vld [vmem:[%s10502_s5 + $0x40] sm:$0xff]  }
 0x5ef   : > { %5184 = vmatpush1.bf16.msra.mxu1 %v7991_v3  ;;  %v4002_v3 = vsel %vm432_vm2, %v3999_v5, %v4001_v10  ;;  %v4054_v0 = vpack.c.bf16 %v4028_v25, %v4028_v25  ;;  %7086 = vmatprep.subr.bf16.mxu0 %v8102_v14  ;;  %v8109_v25 = vld [vmem:[%s10502_s5 + $0x18] sm:$0xff]  }
 0x5f0   : > { %5185 = vmatprep.subr.bf16.mxu1 %v7996_v16  ;;  %v8048_v16 = vld [vmem:[%s10501_s4 + $0x3e0] ss:$8 sps:$4 sm:$0xff]   ;;  %v4041_v18 = vpack.c.bf16 %v4002_v3, %v3999_v5 }
 0x5f1   : > { %v4263_v31 = vrot.slane %v4054_v0, 3  ;;  %v8096_v5 = vld [vmem:[%s10501_s4 + $0x4e0] ss:$8 sps:$4 sm:$0xff]   ;;  %v8114_v0 = vld [vmem:[%s10502_s5 + $0x70] sm:$0xff]  }
 0x5f2   : > { %v8103_v3 = vld [vmem:[%s10502_s5] sm:$0xff]  }
 0x5f3   : > { %5186 = vmatpush1.bf16.msra.mxu1 %v7994_v15  ;;  %v4024_v15 = vsel %vm443_vm3, %v4020_v8, %v4023_v13  ;;  %7087 = vmatpush3.bf16.msra.mxu0 %v8103_v3 }
 0x5f4   : > { %5187 = vmatprep.subr.bf16.mxu1 %v7999_v17  ;;  %v8053_v17 = vld [vmem:[%s10501_s4 + $0x3f4] ss:$8 sps:$4 sm:$0xff]  }
 0x5f7   : > { %5188 = vmatpush1.bf16.msra.mxu1 %v7997_v19  ;;  %v4044_v19 = vpack.c.bf16 %v4024_v15, %v4020_v8  ;;  %v8105_v15 = vld [vmem:[%s10502_s5 + $0x8] sm:$0xff]  }
 0x5f8   : > { %5189 = vmatprep.subr.bf16.mxu1 %v8002_v20  ;;  %v4051_v20 = vpack.c.bf16 %v4006_v11, %v4006_v11  ;;  %v8107_v11 = vld [vmem:[%s10502_s5 + $0x10] sm:$0xff]  }
 0x5f9   : > { %v4262_v27 = vrot.slane %v4044_v19, 3  ;;  %v8110_v19 = vld [vmem:[%s10502_s5 + $0x60] sm:$0xff]  }
 0x5fb   : > { %5190 = vmatpush1.bf16.msra.mxu1 %v8000_v26  ;;  %v4253_v26 = vrot.slane %v4041_v18, 3  ;;  %v4264_v34 = vsel %vm432_vm2, %v4262_v27, %v4263_v31  ;;  %v8108_v18 = vld [vmem:[%s10502_s5 + $0x58] sm:$0xff]   ;;  %v5290_v31 = vld [vmem:[%s10506_s9] ss:$2 sm:$0x3] }
 0x5fc   : > { %5191 = vmatprep.subr.bf16.mxu1 %v8005_v28  ;;  %v4254_v28 = vrot.slane %v4051_v20, 3  ;;  %v8112_v20 = vld [vmem:[%s10502_s5 + $0x68] sm:$0xff]   ;;  %v8116_v27 = vld [vmem:[%s10502_s5 + $0x78] sm:$0xff]  }
 0x5ff   : > { %5192 = vmatpush1.bf16.msra.mxu1 %v8003_v32  ;;  %v8059_v32 = vld [vmem:[%s10501_s4 + $0x414] ss:$8 sps:$4 sm:$0xff]  }
 0x600   : > { %5204 = vmatprep.subr.bf16.mxu1 %v8008_v33  ;;  %v4255_v33 = vsel %vm432_vm2, %v4253_v26, %v4254_v28  ;;  %v8115_v26 = vld [vmem:[%s10502_s5 + $0x30] sm:$0xff]   ;;  %v8117_v28 = vld [vmem:[%s10502_s5 + $0x38] sm:$0xff]  }
 0x602   : > { %5194 = vmatmul.mubr.bf16.vlgmr.msra.gmra.mrb[4].mxu1 %v9771_v51  ;;  %v8017_v51 = vld [vmem:[%s10501_s4 + $0x334] ss:$8 sps:$4 sm:$0xff]  }
 0x603   : > { %5205 = vmatpush1.bf16.msra.mxu1 %v8006_v36  ;;  %5236 = vmatprep.mubr.bf16.mxu1 %v4258_v39  ;;  %v8062_v36 = vld [vmem:[%s10501_s4 + $0x424] ss:$8 sps:$4 sm:$0xff]   ;;  %v8063_v39 = vld [vmem:[%s10501_s4 + $0x430] ss:$8 sps:$4 sm:$0xff]  }
 0x604   : > { %5206 = vmatprep.subr.bf16.mxu1 %v8011_v37  ;;  %v8065_v37 = vld [vmem:[%s10501_s4 + $0x434] ss:$8 sps:$4 sm:$0xff]  }
 0x607   : > { %5207 = vmatpush1.bf16.msra.mxu1 %v8009_v40  ;;  %v8068_v40 = vld [vmem:[%s10501_s4 + $0x444] ss:$8 sps:$4 sm:$0xff]  }
 0x608   : > { %5208 = vmatprep.subr.bf16.mxu1 %v8014_v41  ;;  %v8066_v41 = vld [vmem:[%s10501_s4 + $0x440] ss:$8 sps:$4 sm:$0xff]  }
 0x60b   : > { %5209 = vmatpush1.bf16.msra.mxu1 %v8012_v43  ;;  %v8071_v43 = vld [vmem:[%s10501_s4 + $0x454] ss:$8 sps:$4 sm:$0xff]  }
 0x60c   : > { %5210 = vmatprep.subr.bf16.mxu1 %v8017_v51  ;;  %v8069_v51 = vld [vmem:[%s10501_s4 + $0x450] ss:$8 sps:$4 sm:$0xff]  }
 0x60f   : > { %5211 = vmatpush1.bf16.msra.mxu1 %v8015_v48  ;;  %v8074_v48 = vld [vmem:[%s10501_s4 + $0x464] ss:$8 sps:$4 sm:$0xff]  }
 0x610   : > { %5212 = vmatprep.subr.bf16.mxu1 %v8020_v45  ;;  %v8072_v45 = vld [vmem:[%s10501_s4 + $0x460] ss:$8 sps:$4 sm:$0xff]  }
 0x613   : > { %5213 = vmatpush1.bf16.msra.mxu1 %v8018_v49  ;;  %v8077_v49 = vld [vmem:[%s10501_s4 + $0x474] ss:$8 sps:$4 sm:$0xff]  }
 0x614   : > { %5214 = vmatprep.subr.bf16.mxu1 %v8023_v50  ;;  %v8075_v50 = vld [vmem:[%s10501_s4 + $0x470] ss:$8 sps:$4 sm:$0xff]  }
 0x617   : > { %5215 = vmatpush1.bf16.msra.mxu1 %v8021_v52  ;;  %v8080_v52 = vld [vmem:[%s10501_s4 + $0x484] ss:$8 sps:$4 sm:$0xff]  }
 0x618   : > { %5216 = vmatprep.subr.bf16.mxu1 %v8026_v21  ;;  %v8078_v21 = vld [vmem:[%s10501_s4 + $0x480] ss:$8 sps:$4 sm:$0xff]  }
 0x61b   : > { %5217 = vmatpush1.bf16.msra.mxu1 %v8024_v53  ;;  %v8083_v53 = vld [vmem:[%s10501_s4 + $0x494] ss:$8 sps:$4 sm:$0xff]  }
 0x61c   : > { %5218 = vmatprep.subr.bf16.mxu1 %v8029_v54  ;;  %v8081_v54 = vld [vmem:[%s10501_s4 + $0x490] ss:$8 sps:$4 sm:$0xff]  }
 0x61f   : > { %5219 = vmatpush1.bf16.msra.mxu1 %v8027_v55  ;;  %v8086_v55 = vld [vmem:[%s10501_s4 + $0x4a4] ss:$8 sps:$4 sm:$0xff]  }
 0x620   : > { %5220 = vmatprep.subr.bf16.mxu1 %v8032_v57  ;;  %v8084_v57 = vld [vmem:[%s10501_s4 + $0x4a0] ss:$8 sps:$4 sm:$0xff]  }
 0x623   : > { %5221 = vmatpush1.bf16.msra.mxu1 %v8030_v58  ;;  %v8089_v58 = vld [vmem:[%s10501_s4 + $0x4b4] ss:$8 sps:$4 sm:$0xff]  }
 0x624   : > { %5222 = vmatprep.subr.bf16.mxu1 %v8035_v59  ;;  %v8087_v59 = vld [vmem:[%s10501_s4 + $0x4b0] ss:$8 sps:$4 sm:$0xff]  }
 0x627   : > { %5223 = vmatpush1.bf16.msra.mxu1 %v8033_v47  ;;  %v8092_v47 = vld [vmem:[%s10501_s4 + $0x4c4] ss:$8 sps:$4 sm:$0xff]  }
 0x628   : > { %5224 = vmatprep.subr.bf16.mxu1 %v8038_v60  ;;  %v8090_v60 = vld [vmem:[%s10501_s4 + $0x4c0] ss:$8 sps:$4 sm:$0xff]  }
 0x62b   : > { %5225 = vmatpush1.bf16.msra.mxu1 %v8036_v61  ;;  %v3953_v61 = vld [vmem:[#allocation2 + $0x10] sm:$0xfc] }
 0x62c   : > { %5226 = vmatprep.subr.bf16.mxu1 %v8041_v62  ;;  %v8095_v62 = vld [vmem:[%s10501_s4 + $0x4d4] ss:$8 sps:$4 sm:$0xff]  }
 0x62f   : > { %5227 = vmatpush1.bf16.msra.mxu1 %v8039_v56  ;;  %v3955_v56 = vld [vmem:[#allocation2 + $0x30] sm:$0x3] }
 0x630   : > { %5228 = vmatprep.subr.bf16.mxu1 %v8044_v63  ;;  %v4019_v63 = vrot.slane %v3953_v61, 4  ;;  %v4025_v2 = vrot.slane %v3955_v56, 4 }
 0x633   : > { %5229 = vmatpush1.bf16.msra.mxu1 %v8042_v1  ;;  %v8093_v1 = vld [vmem:[%s10501_s4 + $0x4d0] ss:$8 sps:$4 sm:$0xff]  }
 0x634   : > { %5230 = vmatprep.subr.bf16.mxu1 %v8047_v38  ;;  %v4021_v38 = vrot.slane %v9759_v23, 4  ;;  %v8099_v23 = vld [vmem:[%s10501_s4 + $0x4f0] ss:$8 sps:$4 sm:$0xff]  }
 0x636   : > { %v4022_v4 = vsel %vm443_vm3, %v4019_v63, %v4021_v38 }
 0x637   : > { %5231 = vmatpush1.bf16.msra.mxu1 %v8045_v42  ;;  %v4026_v42 = vsel %vm443_vm3, %v4021_v38, %v4025_v2  ;;  %v4043_v8 = vpack.c.bf16 %v4022_v4, %v4019_v63  ;;  %v5338_v63 = vld [vmem:[#allocation2 + $0x8] sm:$0x80]  ;;  %v5331_v38 = vld [vmem:[#allocation2] sm:$0xc0] }
 0x638   : > { %5232 = vmatprep.subr.bf16.mxu1 %v8050_v9  ;;  %v4053_v9 = vpack.c.bf16 %v4026_v42, %v4026_v42 }
 0x639   : > { %v4259_v10 = vrot.slane %v4043_v8, 3 }
 0x63a   : > { %v4260_v12 = vrot.slane %v4053_v9, 3 }
 0x63b   : > { %5233 = vmatpush1.bf16.msra.mxu1 %v8048_v16  ;;  %v8104_v16 = vld [vmem:[%s10502_s5 + $0x48] sm:$0xff]  }
 0x63c   : > { %5234 = vmatprep.subr.bf16.mxu1 %v8053_v17  ;;  %v4261_v13 = vsel %vm432_vm2, %v4259_v10, %v4260_v12  ;;  %7088 = vmatprep.subr.bf16.mxu0 %v8104_v16  ;;  %v8106_v17 = vld [vmem:[%s10502_s5 + $0x50] sm:$0xff]  }
 0x63d   : > { %7089 = vmatpush3.bf16.msra.mxu0 %v8105_v15 }
 0x63e   : > { %7090 = vmatprep.subr.bf16.mxu0 %v8106_v17 }
 0x63f   : > { %5235 = vmatpush1.bf16.msra.mxu1 %v8051_v24  ;;  %v8111_v24 = vld [vmem:[%s10502_s5 + $0x20] sm:$0xff]  }
 0x640   : > { %5247 = vmatprep.subr.bf16.mxu1 %v8056_v22  ;;  %v8113_v22 = vld [vmem:[%s10502_s5 + $0x28] sm:$0xff]  }
 0x641   : > { %7091 = vmatpush3.bf16.msra.mxu0 %v8107_v11 }
 0x642   : > { %5237 = vmatmul.mubr.bf16.vlgmr.msra.gmra.mrb[4].mxu1 %v4255_v33  ;;  %7092 = vmatprep.subr.bf16.mxu0 %v8108_v18  ;;  %v5295_v33 = vrot.slane %v5290_v31, %v8666_v44 }
 0x643   : > { %5248 = vmatpush1.bf16.msra.mxu1 %v8054_v30  ;;  %5279 = vmatprep.mubr.bf16.mxu1 %v4264_v34  ;;  %v8118_v30 = vld [vmem:[%s10502_s5 + $0xc0] sm:$0xff]   ;;  %v5299_v34 = vrot.slane %v5290_v31, %v8671_v46 }
 0x644   : > { %5249 = vmatprep.subr.bf16.mxu1 %v8059_v32  ;;  %v6999_v32 = vld [vmem:[%s10506_s9 + $0x1] ss:$2 sm:$0x3] }
 0x645   : > { %7093 = vmatpush3.bf16.msra.mxu0 %v8109_v25 }
 0x646   : > { %7094 = vmatprep.subr.bf16.mxu0 %v8110_v19 }
 0x647   : > { %5250 = vmatpush1.bf16.msra.mxu1 %v8057_v35  ;;  %v5312_v35 = vrot.slane %v6999_v32, %v8666_v44 }
 0x648   : > { %5251 = vmatprep.subr.bf16.mxu1 %v8062_v36 }
 0x649   : > { %7095 = vmatpush3.bf16.msra.mxu0 %v8111_v24 }
 0x64a   : > { %7096 = vmatprep.subr.bf16.mxu0 %v8112_v20 }
 0x64b   : > { %5252 = vmatpush1.bf16.msra.mxu1 %v8060_v29  ;;  %v5316_v29 = vrot.slane %v6999_v32, %v8671_v46 }
 0x64c   : > { %5253 = vmatprep.subr.bf16.mxu1 %v8065_v37 }
 0x64d   : > { %7097 = vmatpush3.bf16.msra.mxu0 %v8113_v22  ;;  %v8119_v22 = vld [vmem:[%s10502_s5 + $0x80] sm:$0xff]  }
 0x64e   : > { %7098 = vmatprep.subr.bf16.mxu0 %v8114_v0 }
 0x64f   : > { %5254 = vmatpush1.bf16.msra.mxu1 %v8063_v39 }
 0x650   : > { %5255 = vmatprep.subr.bf16.mxu1 %v8068_v40 }
 0x651   : > { %7099 = vmatpush3.bf16.msra.mxu0 %v8115_v26 }
 0x652   : > { %7100 = vmatprep.subr.bf16.mxu0 %v8116_v27 }
 0x653   : > { %5256 = vmatpush1.bf16.msra.mxu1 %v8066_v41 }
 0x654   : > { %5257 = vmatprep.subr.bf16.mxu1 %v8071_v43 }
 0x655   : > { %7101 = vmatpush3.bf16.msra.mxu0 %v8117_v28  ;;  %v8120_v28 = vld [vmem:[%s10502_s5 + $0xc8] sm:$0xff]  }
 0x656   : > { %7108 = vmatprep.subr.bf16.mxu0 %v8118_v30 }
 0x657   : > { %5258 = vmatpush1.bf16.msra.mxu1 %v8069_v51 }
 0x658   : > { %5259 = vmatprep.subr.bf16.mxu1 %v8074_v48 }
 0x65b   : > { %5260 = vmatpush1.bf16.msra.mxu1 %v8072_v45 }
 0x65c   : > { %5261 = vmatprep.subr.bf16.mxu1 %v8077_v49 }
 0x65f   : > { %5262 = vmatpush1.bf16.msra.mxu1 %v8075_v50 }
 0x660   : > { %5263 = vmatprep.subr.bf16.mxu1 %v8080_v52 }
 0x663   : > { %5264 = vmatpush1.bf16.msra.mxu1 %v8078_v21 }
 0x664   : > { %5265 = vmatprep.subr.bf16.mxu1 %v8083_v53 }
 0x667   : > { %5266 = vmatpush1.bf16.msra.mxu1 %v8081_v54 }
 0x668   : > { %5267 = vmatprep.subr.bf16.mxu1 %v8086_v55 }
 0x66b   : > { %5268 = vmatpush1.bf16.msra.mxu1 %v8084_v57 }
 0x66c   : > { %5269 = vmatprep.subr.bf16.mxu1 %v8089_v58 }
 0x66f   : > { %5270 = vmatpush1.bf16.msra.mxu1 %v8087_v59 }
 0x670   : > { %5271 = vmatprep.subr.bf16.mxu1 %v8092_v47 }
 0x673   : > { %5272 = vmatpush1.bf16.msra.mxu1 %v8090_v60  ;;  %v5332_v60 = vld [vmem:[#allocation2 + $0x8] sm:$0xc0] }
 0x674   : > { %5273 = vmatprep.subr.bf16.mxu1 %v8095_v62 }
 0x677   : > { %5274 = vmatpush1.bf16.msra.mxu1 %v8093_v1 }
 0x678   : > { %5275 = vmatprep.subr.bf16.mxu1 %v8098_v6 }
 0x67b   : > { %5276 = vmatpush1.bf16.msra.mxu1 %v8096_v5 }
 0x67c   : > { %5277 = vmatprep.subr.bf16.mxu1 %v8101_v7 }
 0x67f   : > { %5278 = vmatpush1.bf16.msra.mxu1 %v8099_v23  ;;  %v5362_v23 = vrot.slane %v5338_v63, 1  ;;  %v8137_v63 = vld [vmem:[%s10502_s5 + $0x108] sm:$0xff]  }
 0x682   : > { %5280 = vmatmul.mubr.bf16.vlgmr.msra.gmra.mrb[4].mxu1 %v4261_v13 }
 0x755   : > { %v5281_v36 = vpop.f32.mrb[4].mxu1 }
 0x756   : > { %v5302_v37 = vmul.f32 %v5295_v33, %v5281_v36  ;;  %v5283_v39 = vpop.f32.mrb[5].mxu1  ;;  %v8124_v36 = vld [vmem:[%s10502_s5 + $0xd8] sm:$0xff]  }
 0x757   : > { %v5303_v40 = vmul.f32 %v5299_v34, %v5283_v39  ;;  %v5285_v41 = vpop.f32.mrb[6].mxu1  ;;  %v8127_v39 = vld [vmem:[%s10502_s5 + $0xa0] sm:$0xff]  }
 0x758   : > { %v5319_v43 = vadd.f32 %v5312_v35, %v5302_v37  ;;  %v5304_v51 = vmul.f32 %v5295_v33, %v5285_v41  ;;  %v5287_v48 = vpop.f32.mrb[7].mxu1  ;;  %v8121_v33 = vld [vmem:[%s10502_s5 + $0x88] sm:$0xff]   ;;  %v8126_v37 = vld [vmem:[%s10502_s5 + $0xe0] sm:$0xff]  }
 0x759   : > { %v5320_v45 = vadd.f32 %v5316_v29, %v5303_v40  ;;  %v5305_v49 = vmul.f32 %v5299_v34, %v5287_v48  ;;  %v8122_v34 = vld [vmem:[%s10502_s5 + $0xd0] sm:$0xff]   ;;  %v8128_v41 = vld [vmem:[%s10502_s5 + $0xe8] sm:$0xff]  }
 0x75a   : > { %8206 = vtanh.f32 %v5319_v43  ;;  %v5321_v50 = vadd.f32 %v5312_v35, %v5304_v51  ;;  %v8123_v35 = vld [vmem:[%s10502_s5 + $0x90] sm:$0xff]   ;;  %v5337_v43 = vld [vmem:[#allocation2] sm:$0x80]  ;;  %v8129_v48 = vld [vmem:[%s10502_s5 + $0xa8] sm:$0xff]  }
 0x75b   : > { %8208 = vtanh.f32 %v5320_v45  ;;  %v5322_v52 = vadd.f32 %v5316_v29, %v5305_v49  ;;  %v8125_v29 = vld [vmem:[%s10502_s5 + $0x98] sm:$0xff]   ;;  %v8130_v49 = vld [vmem:[%s10502_s5 + $0xf0] sm:$0xff]  }
 0x75c   : > { %8210 = vtanh.f32 %v5321_v50  ;;  %v5359_v50 = vrot.slane %v5337_v43, 1  ;;  %v8162_v43 = vld [vmem:[%s10502_s5 + $0x1f0] sm:$0xff]  }
 0x75d   : > { %8212 = vtanh.f32 %v5322_v52 }
 0x764   : > { %v10246_v21 = vpop.eup %8206 }
 0x765   : > { %v8209_v44 = vpop.eup %8208  ;;  %5327 = vst [vmem:[#allocation2 + $0x10] sm:$0xff] %v10246_v21  ;;  %v5377_v54 = vrot.slane %v10246_v21, 2  ;;  %v5431_v12 = vpack.c.bf16 %v10246_v21, %v5331_v38  ;;  %v5360_v45 = vrot.slane %v10246_v21, 1  ;;  %v8140_v38 = vld [vmem:[%s10502_s5 + $0x158] sm:$0xff]  }
 0x766   : > { %v10249_v46 = vpop.eup %8210  ;;  %5328 = vst [vmem:[#allocation2 + $0x18] sm:$0xff] %v8209_v44  ;;  %v5378_v57 = vrot.slane %v8209_v44, 2  ;;  %v5432_v5 = vpack.c.bf16 %v8209_v44, %v5332_v60  ;;  %v5363_v42 = vrot.slane %v8209_v44, 1  ;;  %v8131_v44 = vld [vmem:[%s10502_s5 + $0xb0] sm:$0xff]  }
 0x767   : > { %v10251_v53 = vpop.eup %8212  ;;  %5329 = vst [vmem:[#allocation2 + $0x20] sm:$0xff] %v10249_v46  ;;  %v5379_v55 = vrot.slane %v10249_v46, 2  ;;  %v5631_v20 = vrot.slane %v5431_v12, 3  ;;  %v5361_v21 = vsel %vm413_vm1, %v5359_v50, %v5360_v45  ;;  %v8146_v12 = vld [vmem:[%s10502_s5 + $0x170] sm:$0xff]  }
 0x768   : > { %5330 = vst [vmem:[#allocation2 + $0x28] sm:$0xff] %v10251_v53  ;;  %v5381_v58 = vrot.slane %v10251_v53, 2  ;;  %v5634_v17 = vrot.slane %v5432_v5, 3  ;;  %v5364_v25 = vsel %vm413_vm1, %v5362_v23, %v5363_v42  ;;  %v8143_v5 = vld [vmem:[%s10502_s5 + $0x120] sm:$0xff]   ;;  %v8145_v23 = vld [vmem:[%s10502_s5 + $0x128] sm:$0xff]  }
 0x769   : > { %v5380_v59 = vsel %vm423_vm0, %v5377_v54, %v5379_v55  ;;  %v5445_v47 = vpack.c.bf16 %v5379_v55, %v5379_v55 }
 0x76a   : > { %v5382_v61 = vsel %vm423_vm0, %v5378_v57, %v5381_v58  ;;  %v5446_v62 = vpack.c.bf16 %v5381_v58, %v5381_v58  ;;  %v5435_v56 = vpack.c.bf16 %v5380_v59, %v5377_v54  ;;  %v8132_v54 = vld [vmem:[%s10502_s5 + $0xf8] sm:$0xff]   ;;  %v8134_v59 = vld [vmem:[%s10502_s5 + $0x140] sm:$0xff]  }
 0x76b   : > { %v5436_v1 = vpack.c.bf16 %v5382_v61, %v5378_v57  ;;  %v5644_v6 = vrot.slane %v5445_v47, 3  ;;  %v8133_v58 = vld [vmem:[%s10502_s5 + $0xb8] sm:$0xff]   ;;  %v8135_v61 = vld [vmem:[%s10502_s5 + $0x100] sm:$0xff]  }
 0x76c   : > { %v5647_v2 = vrot.slane %v5446_v62, 3  ;;  %v5643_v4 = vrot.slane %v5435_v56, 3  ;;  %v8136_v62 = vld [vmem:[%s10502_s5 + $0x148] sm:$0xff]  }
 0x76d   : > { %v5646_v7 = vrot.slane %v5436_v1, 3  ;;  %v8138_v1 = vld [vmem:[%s10502_s5 + $0x150] sm:$0xff]  }
 0x76e   : > { %v5335_v8 = vld [vmem:[#allocation2 + $0x20] sm:$0x3f]  ;;  %v10261_v9 = vsel %vm432_vm2, %v5643_v4, %v5644_v6  ;;  %v8139_v6 = vld [vmem:[%s10502_s5 + $0x110] sm:$0xff]  }
 0x76f   : > { %v5336_v10 = vld [vmem:[#allocation2 + $0x28] sm:$0x3f]  ;;  %v5441_v13 = vpack.c.bf16 %v5335_v8, %v5335_v8  ;;  %v10265_v3 = vsel %vm432_vm2, %v5646_v7, %v5647_v2  ;;  %v5339_v40 = vld [vmem:[#allocation2 + $0x20] sm:$0x7f]  ;;  %v8141_v2 = vld [vmem:[%s10502_s5 + $0x118] sm:$0xff]  }
 0x770   : > { %v5340_v14 = vld [vmem:[#allocation2 + $0x28] sm:$0x7f]  ;;  %v5442_v16 = vpack.c.bf16 %v5336_v10, %v5336_v10  ;;  %v5365_v51 = vrot.slane %v5339_v40, 1  ;;  %v8142_v4 = vld [vmem:[%s10502_s5 + $0x160] sm:$0xff]   ;;  %v5348_v8 = vld [vmem:[#allocation2 + $0x38] sm:$0x1] }
 0x771   : > { %v5367_v15 = vrot.slane %v5340_v14, 1  ;;  %v5632_v11 = vrot.slane %v5441_v13, 3  ;;  %v8144_v7 = vld [vmem:[%s10502_s5 + $0x168] sm:$0xff]   ;;  %v5399_v13 = vrot.slane %v10251_v53, 3  ;;  %v5403_v14 = vrot.slane %v5348_v8, 3  ;;  %v8173_v8 = vld [vmem:[%s10502_s5 + $0x218] sm:$0xff]  }
 0x772   : > { %v5635_v18 = vrot.slane %v5442_v16, 3  ;;  %v5366_v52 = vsel %vm413_vm1, %v5360_v45, %v5365_v51  ;;  %v5443_v57 = vpack.c.bf16 %v5365_v51, %v5365_v51  ;;  %v8161_v40 = vld [vmem:[%s10502_s5 + $0x1a8] sm:$0xff]   ;;  %v5397_v51 = vrot.slane %v10249_v46, 3 }
 0x773   : > { %v5368_v19 = vsel %vm413_vm1, %v5363_v42, %v5367_v15  ;;  %v5444_v24 = vpack.c.bf16 %v5367_v15, %v5367_v15  ;;  %v5633_v30 = vsel %vm432_vm2, %v5631_v20, %v5632_v11  ;;  %v5433_v55 = vpack.c.bf16 %v5366_v52, %v5361_v21  ;;  %v5344_v42 = vld [vmem:[#allocation2 + $0x18] sm:$0xfe]  ;;  %v8151_v20 = vld [vmem:[%s10502_s5 + $0x180] sm:$0xff]   ;;  %v8163_v52 = vld [vmem:[%s10502_s5 + $0x1b0] sm:$0xff]  }
 0x774   : > { %v5434_v0 = vpack.c.bf16 %v5368_v19, %v5364_v25  ;;  %v5636_v26 = vsel %vm432_vm2, %v5634_v17, %v5635_v18  ;;  %v5638_v60 = vrot.slane %v5443_v57, 3  ;;  %v5396_v10 = vrot.slane %v5344_v42, 3  ;;  %v8148_v15 = vld [vmem:[%s10502_s5 + $0x178] sm:$0xff]   ;;  %v8150_v25 = vld [vmem:[%s10502_s5 + $0x1c0] sm:$0xff]  }
 0x775   : > { %v5641_v27 = vrot.slane %v5444_v24, 3  ;;  %6183 = vmatprep.mubr.bf16.mxu0 %v5636_v26  ;;  %v5637_v47 = vrot.slane %v5433_v55, 3  ;;  %v5404_v17 = vsel %vm432_vm2, %v5399_v13, %v5403_v14  ;;  %v8149_v18 = vld [vmem:[%s10502_s5 + $0x138] sm:$0xff]   ;;  %v5419_v45 = vrot.slane %v10251_v53, 4  ;;  %v5351_v14 = vld [vmem:[#allocation2 + $0x30] sm:$0x3] }
 0x776   : > { %v5640_v31 = vrot.slane %v5434_v0, 3  ;;  %6184 = vmatmul.mubr.bf16.vlgmr.msra.gmra.mrb[8].mxu0 %v5633_v30  ;;  %v5400_v16 = vsel %vm432_vm2, %v5396_v10, %v5399_v13  ;;  %v5448_v19 = vpack.c.bf16 %v5404_v17, %v5404_v17  ;;  %v8152_v0 = vld [vmem:[%s10502_s5 + $0x1c8] sm:$0xff]   ;;  %v8155_v30 = vld [vmem:[%s10502_s5 + $0x190] sm:$0xff]   ;;  %v8172_v42 = vld [vmem:[%s10502_s5 + $0x258] sm:$0xff]   ;;  %v5417_v17 = vrot.slane %v10249_v46, 4 }
 0x777   : > { %7109 = vmatpush3.bf16.msra.mxu0 %v8119_v22  ;;  %v5639_v56 = vsel %vm432_vm2, %v5637_v47, %v5638_v60  ;;  %v5438_v11 = vpack.c.bf16 %v5400_v16, %v5396_v10  ;;  %v8166_v47 = vld [vmem:[%s10502_s5 + $0x240] sm:$0xff]   ;;  %v8176_v13 = vld [vmem:[%s10502_s5 + $0x268] sm:$0xff]   ;;  %v8181_v46 = vld [vmem:[%s10502_s5 + $0x238] sm:$0xff]  }
 0x778   : > { %v5642_v32 = vsel %vm432_vm2, %v5640_v31, %v5641_v27  ;;  %7110 = vmatprep.subr.bf16.mxu0 %v8120_v28  ;;  %v5653_v22 = vrot.slane %v5448_v19, 3  ;;  %v8153_v27 = vld [vmem:[%s10502_s5 + $0x188] sm:$0xff]   ;;  %v8154_v28 = vld [vmem:[%s10502_s5 + $0x1d0] sm:$0xff]   ;;  %v8157_v31 = vld [vmem:[%s10502_s5 + $0x198] sm:$0xff]  }
 0x779   : > { %6224 = vmatprep.mubr.bf16.mxu0 %v5642_v32  ;;  %v5652_v24 = vrot.slane %v5438_v11, 3  ;;  %v8158_v32 = vld [vmem:[%s10502_s5 + $0x1e0] sm:$0xff]   ;;  %v8177_v16 = vld [vmem:[%s10502_s5 + $0x228] sm:$0xff]   ;;  %v5421_v11 = vrot.slane %v5351_v14, 4  ;;  %v8180_v19 = vld [vmem:[%s10502_s5 + $0x278] sm:$0xff]  }
 0x77a   : > { %v8175_v10 = vld [vmem:[%s10502_s5 + $0x220] sm:$0xff]  }
 0x77b   : > { %7111 = vmatpush3.bf16.msra.mxu0 %v8121_v33  ;;  %v5654_v26 = vsel %vm432_vm2, %v5652_v24, %v5653_v22  ;;  %v8159_v33 = vld [vmem:[%s10502_s5 + $0x1a0] sm:$0xff]   ;;  %v5422_v24 = vsel %vm443_vm3, %v5417_v17, %v5421_v11 }
 0x77c   : > { %7112 = vmatprep.subr.bf16.mxu0 %v8122_v34  ;;  %v5343_v34 = vld [vmem:[#allocation2 + $0x10] sm:$0xfe]  ;;  %v5449_v22 = vpack.c.bf16 %v5422_v24, %v5422_v24 }
 0x77f   : > { %7113 = vmatpush3.bf16.msra.mxu0 %v8123_v35  ;;  %v8160_v35 = vld [vmem:[%s10502_s5 + $0x1e8] sm:$0xff]  }
 0x780   : > { %7114 = vmatprep.subr.bf16.mxu0 %v8124_v36  ;;  %v5350_v36 = vld [vmem:[#allocation2 + $0x18] sm:$0xfc] }
 0x783   : > { %7115 = vmatpush3.bf16.msra.mxu0 %v8125_v29  ;;  %v5347_v29 = vld [vmem:[#allocation2 + $0x30] sm:$0x1] }
 0x784   : > { %7116 = vmatprep.subr.bf16.mxu0 %v8126_v37  ;;  %v5395_v37 = vrot.slane %v5343_v34, 3 }
 0x786   : > { %v5398_v50 = vsel %vm432_vm2, %v5395_v37, %v5397_v51 }
 0x787   : > { %7117 = vmatpush3.bf16.msra.mxu0 %v8127_v39  ;;  %v5352_v39 = vld [vmem:[#allocation2 + $0x38] sm:$0x3]  ;;  %v5437_v55 = vpack.c.bf16 %v5398_v50, %v5395_v37 }
 0x788   : > { %7118 = vmatprep.subr.bf16.mxu0 %v8128_v41  ;;  %v5416_v41 = vrot.slane %v5350_v36, 4 }
 0x78b   : > { %7119 = vmatpush3.bf16.msra.mxu0 %v8129_v48  ;;  %v5401_v48 = vrot.slane %v5347_v29, 3 }
 0x78c   : > { %7120 = vmatprep.subr.bf16.mxu0 %v8130_v49  ;;  %v5423_v49 = vrot.slane %v5352_v39, 4 }
 0x78d   : > { %v5402_v21 = vsel %vm432_vm2, %v5397_v51, %v5401_v48 }
 0x78e   : > { %v5424_v53 = vsel %vm443_vm3, %v5419_v45, %v5423_v49 }
 0x78f   : > { %7121 = vmatpush3.bf16.msra.mxu0 %v8131_v44  ;;  %v5420_v44 = vsel %vm443_vm3, %v5416_v41, %v5419_v45  ;;  %v5450_v60 = vpack.c.bf16 %v5424_v53, %v5424_v53 }
 0x790   : > { %7122 = vmatprep.subr.bf16.mxu0 %v8132_v54  ;;  %v8164_v54 = vld [vmem:[%s10502_s5 + $0x1f8] sm:$0xff]   ;;  %v5440_v57 = vpack.c.bf16 %v5420_v44, %v5416_v41 }
 0x793   : > { %7123 = vmatpush3.bf16.msra.mxu0 %v8133_v58  ;;  %v8165_v58 = vld [vmem:[%s10502_s5 + $0x1b8] sm:$0xff]  }
 0x794   : > { %7130 = vmatprep.subr.bf16.mxu0 %v8134_v59  ;;  %v5447_v59 = vpack.c.bf16 %v5402_v21, %v5402_v21 }
 0x796   : > { %6225 = vmatmul.mubr.bf16.vlgmr.msra.gmra.mrb[12].mxu0 %v5639_v56  ;;  %v5650_v56 = vrot.slane %v5447_v59, 3 }
 0x797   : > { %7131 = vmatpush3.bf16.msra.mxu0 %v8135_v61  ;;  %6265 = vmatprep.mubr.bf16.mxu0 %v10265_v3  ;;  %v8147_v3 = vld [vmem:[%s10502_s5 + $0x130] sm:$0xff]   ;;  %v5649_v61 = vrot.slane %v5437_v55, 3 }
 0x798   : > { %7132 = vmatprep.subr.bf16.mxu0 %v8136_v62  ;;  %v5658_v62 = vrot.slane %v5440_v57, 3 }
 0x79b   : > { %7133 = vmatpush3.bf16.msra.mxu0 %v8137_v63  ;;  %v8167_v63 = vld [vmem:[%s10502_s5 + $0x200] sm:$0xff]  }
 0x79c   : > { %7134 = vmatprep.subr.bf16.mxu0 %v8138_v1  ;;  %v5659_v1 = vrot.slane %v5450_v60, 3 }
 0x79f   : > { %7135 = vmatpush3.bf16.msra.mxu0 %v8139_v6  ;;  %v8168_v6 = vld [vmem:[%s10502_s5 + $0x248] sm:$0xff]  }
 0x7a0   : > { %7136 = vmatprep.subr.bf16.mxu0 %v8140_v38  ;;  %v5651_v38 = vsel %vm432_vm2, %v5649_v61, %v5650_v56 }
 0x7a3   : > { %7137 = vmatpush3.bf16.msra.mxu0 %v8141_v2  ;;  %v5660_v2 = vsel %vm432_vm2, %v5658_v62, %v5659_v1 }
 0x7a4   : > { %7138 = vmatprep.subr.bf16.mxu0 %v8142_v4  ;;  %v8169_v4 = vld [vmem:[%s10502_s5 + $0x208] sm:$0xff]  }
 0x7a7   : > { %7139 = vmatpush3.bf16.msra.mxu0 %v8143_v5  ;;  %v8170_v5 = vld [vmem:[%s10502_s5 + $0x250] sm:$0xff]  }
 0x7a8   : > { %7140 = vmatprep.subr.bf16.mxu0 %v8144_v7  ;;  %v8171_v7 = vld [vmem:[%s10502_s5 + $0x210] sm:$0xff]  }
 0x7ab   : > { %7141 = vmatpush3.bf16.msra.mxu0 %v8145_v23  ;;  %v8174_v23 = vld [vmem:[%s10502_s5 + $0x260] sm:$0xff]  }
 0x7ac   : > { %7142 = vmatprep.subr.bf16.mxu0 %v8146_v12  ;;  %v5349_v12 = vld [vmem:[#allocation2 + $0x10] sm:$0xfc] }
 0x7af   : > { %7143 = vmatpush3.bf16.msra.mxu0 %v8147_v3  ;;  %v5415_v3 = vrot.slane %v5349_v12, 4 }
 0x7b0   : > { %7144 = vmatprep.subr.bf16.mxu0 %v8148_v15  ;;  %v8178_v15 = vld [vmem:[%s10502_s5 + $0x270] sm:$0xff]  }
 0x7b3   : > { %7145 = vmatpush3.bf16.msra.mxu0 %v8149_v18  ;;  %v5418_v18 = vsel %vm443_vm3, %v5415_v3, %v5417_v17 }
 0x7b4   : > { %7152 = vmatprep.subr.bf16.mxu0 %v8150_v25  ;;  %v8179_v25 = vld [vmem:[%s10502_s5 + $0x230] sm:$0xff]  }
 0x7b6   : > { %6266 = vmatmul.mubr.bf16.vlgmr.msra.gmra.mrb[16].mxu0 %v10261_v9  ;;  %v8156_v9 = vld [vmem:[%s10502_s5 + $0x1d8] sm:$0xff]  }
 0x7b7   : > { %7153 = vmatpush3.bf16.msra.mxu0 %v8151_v20  ;;  %6306 = vmatprep.mubr.bf16.mxu0 %v5654_v26  ;;  %v5439_v20 = vpack.c.bf16 %v5418_v18, %v5415_v3  ;;  %v5656_v26 = vrot.slane %v5449_v22, 3 }
 0x7b8   : > { %7154 = vmatprep.subr.bf16.mxu0 %v8152_v0 }
 0x7b9   : > { %v5655_v0 = vrot.slane %v5439_v20, 3 }
 0x7bb   : > { %7155 = vmatpush3.bf16.msra.mxu0 %v8153_v27  ;;  %v5657_v27 = vsel %vm432_vm2, %v5655_v0, %v5656_v26 }
 0x7bc   : > { %7156 = vmatprep.subr.bf16.mxu0 %v8154_v28 }
 0x7bf   : > { %7157 = vmatpush3.bf16.msra.mxu0 %v8155_v30 }
 0x7c0   : > { %7158 = vmatprep.subr.bf16.mxu0 %v8156_v9 }
 0x7c3   : > { %7159 = vmatpush3.bf16.msra.mxu0 %v8157_v31 }
 0x7c4   : > { %7160 = vmatprep.subr.bf16.mxu0 %v8158_v32 }
 0x7c7   : > { %7161 = vmatpush3.bf16.msra.mxu0 %v8159_v33 }
 0x7c8   : > { %7162 = vmatprep.subr.bf16.mxu0 %v8160_v35 }
 0x7cb   : > { %7163 = vmatpush3.bf16.msra.mxu0 %v8161_v40 }
 0x7cc   : > { %7164 = vmatprep.subr.bf16.mxu0 %v8162_v43 }
 0x7cf   : > { %7165 = vmatpush3.bf16.msra.mxu0 %v8163_v52 }
 0x7d0   : > { %7166 = vmatprep.subr.bf16.mxu0 %v8164_v54 }
 0x7d3   : > { %7167 = vmatpush3.bf16.msra.mxu0 %v8165_v58 }
 0x7d4   : > { %7174 = vmatprep.subr.bf16.mxu0 %v8166_v47 }
 0x7d6   : > { %6307 = vmatmul.mubr.bf16.vlgmr.msra.gmra.mrb[20].mxu0 %v5651_v38 }
 0x7d7   : > { %7175 = vmatpush3.bf16.msra.mxu0 %v8167_v63  ;;  %6347 = vmatprep.mubr.bf16.mxu0 %v5660_v2  ;;  %v7080_v63 = vld [vmem:[%s10507_s10] ss:$0 sm:$0xff]  ;;  %v7081_v2 = vld [vmem:[%s10507_s10 + $0x1] ss:$0 sm:$0xff] }
 0x7d8   : > { %7176 = vmatprep.subr.bf16.mxu0 %v8168_v6 }
 0x7db   : > { %7177 = vmatpush3.bf16.msra.mxu0 %v8169_v4 }
 0x7dc   : > { %7178 = vmatprep.subr.bf16.mxu0 %v8170_v5 }
 0x7df   : > { %7179 = vmatpush3.bf16.msra.mxu0 %v8171_v7 }
 0x7e0   : > { %7180 = vmatprep.subr.bf16.mxu0 %v8172_v42 }
 0x7e3   : > { %7181 = vmatpush3.bf16.msra.mxu0 %v8173_v8 }
 0x7e4   : > { %7182 = vmatprep.subr.bf16.mxu0 %v8174_v23 }
 0x7e7   : > { %7183 = vmatpush3.bf16.msra.mxu0 %v8175_v10 }
 0x7e8   : > { %7184 = vmatprep.subr.bf16.mxu0 %v8176_v13 }
 0x7eb   : > { %7185 = vmatpush3.bf16.msra.mxu0 %v8177_v16 }
 0x7ec   : > { %7186 = vmatprep.subr.bf16.mxu0 %v8178_v15 }
 0x7ef   : > { %7187 = vmatpush3.bf16.msra.mxu0 %v8179_v25 }
 0x7f0   : > { %7188 = vmatprep.subr.bf16.mxu0 %v8180_v19 }
 0x7f3   : > { %7189 = vmatpush3.bf16.msra.mxu0 %v8181_v46 }
 0x7f6   : > { %6348 = vmatmul.mubr.bf16.vlgmr.msra.gmra.mrb[24].mxu0 %v5657_v27 }
 0x849   : > { %v7102_v28 = vpop.f32.mrb[8].mxu0 }
 0x84a   : > { %v7103_v30 = vpop.f32.mrb[9].mxu0 }
 0x84b   : > { %v7104_v9 = vadd.f32 %v7103_v30, %v7102_v28  ;;  %v7105_v31 = vpop.f32.mrb[10].mxu0 }
 0x84c   : > { %v7106_v32 = vpop.f32.mrb[11].mxu0 }
 0x84d   : > { %v7107_v33 = vadd.f32 %v7106_v32, %v7105_v31 }
 0x869   : > { %v7124_v34 = vpop.f32.mrb[12].mxu0 }
 0x86a   : > { %v7125_v35 = vpop.f32.mrb[13].mxu0 }
 0x86b   : > { %v7126_v36 = vadd.f32 %v7125_v35, %v7124_v34  ;;  %v7127_v29 = vpop.f32.mrb[14].mxu0 }
 0x86c   : > { %v7128_v37 = vpop.f32.mrb[15].mxu0 }
 0x86d   : > { %v6227_v39 = vadd.f32 %v7126_v36, %v7104_v9  ;;  %v7129_v40 = vadd.f32 %v7128_v37, %v7127_v29 }
 0x86f   : > { %v6230_v41 = vadd.f32 %v7129_v40, %v7107_v33 }
 0x889   : > { %v7146_v43 = vpop.f32.mrb[16].mxu0 }
 0x88a   : > { %v7147_v51 = vpop.f32.mrb[17].mxu0 }
 0x88b   : > { %v7148_v48 = vadd.f32 %v7147_v51, %v7146_v43  ;;  %v7149_v45 = vpop.f32.mrb[18].mxu0 }
 0x88c   : > { %v7150_v49 = vpop.f32.mrb[19].mxu0 }
 0x88d   : > { %v6268_v50 = vadd.f32 %v7148_v48, %v6227_v39  ;;  %v7151_v52 = vadd.f32 %v7150_v49, %v7149_v45 }
 0x88f   : > { %v6271_v44 = vadd.f32 %v7151_v52, %v6230_v41 }
 0x8a9   : > { %v7168_v54 = vpop.f32.mrb[20].mxu0 }
 0x8aa   : > { %v7169_v21 = vpop.f32.mrb[21].mxu0 }
 0x8ab   : > { %v7170_v55 = vadd.f32 %v7169_v21, %v7168_v54  ;;  %v7171_v53 = vpop.f32.mrb[22].mxu0 }
 0x8ac   : > { %v7172_v57 = vpop.f32.mrb[23].mxu0 }
 0x8ad   : > { %v6309_v58 = vadd.f32 %v7170_v55, %v6268_v50  ;;  %v7173_v59 = vadd.f32 %v7172_v57, %v7171_v53 }
 0x8af   : > { %v6312_v47 = vadd.f32 %v7173_v59, %v6271_v44 }
 0x8c9   : > { %v7190_v60 = vpop.f32.mrb[24].mxu0 }
 0x8ca   : > { %v7191_v61 = vpop.f32.mrb[25].mxu0 }
 0x8cb   : > { %v7192_v62 = vadd.f32 %v7191_v61, %v7190_v60  ;;  %v7193_v56 = vpop.f32.mrb[26].mxu0 }
 0x8cc   : > { %v7194_v1 = vpop.f32.mrb[27].mxu0 }
 0x8cd   : > { %v6350_v6 = vadd.f32 %v7192_v62, %v6309_v58  ;;  %v7195_v38 = vadd.f32 %v7194_v1, %v7193_v56 }
 0x8cf   : > { %v6361_v4 = vmul.f32 %v7080_v63, %v6350_v6  ;;  %v6353_v5 = vadd.f32 %v7195_v38, %v6312_v47 }
 0x8d1   : > { %v6368_v7 = vadd.f32 %v7081_v2, %v6361_v4  ;;  %v6362_v42 = vmul.f32 %v7080_v63, %v6353_v5 }
 0x8d3   : > { %6370 = vst [vmem:[%s386_s28] sm:$0xff] %v6368_v7  ;;  %v6369_v8 = vadd.f32 %v7081_v2, %v6362_v42 }
 0x8d5   : > { %6371 = vst [vmem:[%s386_s28 + $0x8] sm:$0xff] %v6369_v8 }
 0x8d6 PF: > { %s21_s17 = sadd.s32 1, %s8220_s17  }
 0x8d7   : > { %p18_p4 = scmp.ge.s32.totalorder %s21_s17, 4  }
 0x8d9   :  { %20 = sbr.rel (!%p18_p4) target bundleno = 1 (0x1), region = 98 }

</bundles_post_ra>
